<compile_context>
chip_gen: v5e
topology: v5e:2x2
jax: 0.10.0
libtpu: 0.0.40
codegen_flags: <defaults>
</compile_context>

<pallas_src>
import functools
import jax
import jax.numpy as jnp
from jax.experimental import pallas as pl
from jax.experimental.pallas import tpu as pltpu

# ---------------------- per-generation tuning knobs --------------------------

def _is_v7x():
    try:
        kind = jax.devices()[0].device_kind.lower()
    except Exception:
        return False
    return ("v7" in kind) or ("7x" in kind)


_IS_V7X = _is_v7x()
# v5e/v6e: 128 MiB physical VMEM -> larger tiles + 64 MiB scoped budget.
# v7x: 64 MiB physical -> keep 512-wide tiles and a 32 MiB scoped budget.
_VMEM_LIMIT = (32 if _IS_V7X else 64) * 1024 * 1024
_TILE_CAP = 512 if _IS_V7X else 1024

# bf16 MXU operands (f32 accumulation is kept everywhere).
_BF16_MATMUL = True
_MM_DTYPE = jnp.bfloat16 if _BF16_MATMUL else jnp.float32


# ------------------------------ tile helpers --------------------------------

def _pick_row_tile(m, cap=None):
    """Row (sublane) tile: full dim if small, else `cap` with a padded tail block."""
    cap = _TILE_CAP if cap is None else cap
    return m if m <= cap else cap


def _pick_div_tile(n, cap=None):
    """Largest multiple-of-8 divisor of n that is <= cap (n itself if n <= cap)."""
    cap = _TILE_CAP if cap is None else cap
    if n <= cap:
        return n
    for cand in range(cap - cap % 8, 7, -8):
        if n % cand == 0:
            return cand
    return n


def _pick_lane_div_tile(n, cap=None):
    """Largest multiple-of-128 divisor of n that is <= cap (n itself if n <= cap)."""
    cap = _TILE_CAP if cap is None else cap
    if n <= cap:
        return n
    for cand in range(cap - cap % 128, 127, -128):
        if n % cand == 0:
            return cand
    return n


def _maybe_split_for_megacore(M, N, tm, tn):
    """v7x has 2 TensorCores sharded over 'parallel' grid axes: make sure the hot
    grids expose at least 2 parallel blocks (harmless on 1-TC chips)."""
    if pl.cdiv(M, tm) * pl.cdiv(N, tn) >= 2:
        return tm, tn
    if N >= 256:
        tn = ((N + 1) // 2 + 127) // 128 * 128
    elif M >= 16:
        tm = ((M + 1) // 2 + 7) // 8 * 8
    return tm, tn


# ----------------------------- Pallas kernels -------------------------------

def _gelu_tanh(x):
    c = jnp.sqrt(2.0 / jnp.pi).astype(x.dtype)
    return 0.5 * x * (1.0 + jnp.tanh(c * (x + 0.044715 * x * x * x)))


def _matmul_kernel(a_ref, w_ref, b_ref, o_ref, acc_ref, *, activation):
    @pl.when(pl.program_id(2) == 0)
    def _():
        acc_ref[...] = jnp.zeros_like(acc_ref)

    a = a_ref[...]
    if a.dtype != w_ref.dtype:
        a = a.astype(w_ref.dtype)
    acc_ref[...] += jnp.dot(a, w_ref[...], preferred_element_type=jnp.float32)

    @pl.when(pl.program_id(2) == pl.num_programs(2) - 1)
    def _():
        acc = acc_ref[...] + b_ref[...].astype(jnp.float32)
        if activation == "gelu":
            acc = _gelu_tanh(acc)
        o_ref[...] = acc.astype(o_ref.dtype)


def linear(x, w, b, activation="none"):
    """y = activation(x @ w + b).  x: [..., K], w: [K, N] (bf16 ok), b: [N].

    M/N tiled with padded tails; K streamed via a reduction grid axis into a f32 VMEM
    accumulator; activations cast to the weight dtype in-kernel (MXU bf16 path)."""
    orig_shape = x.shape
    K, N = w.shape
    a = x.reshape(-1, K)
    M = a.shape[0]
    tm = _pick_row_tile(M)
    tn = N if N <= _TILE_CAP else _TILE_CAP
    tk = _pick_lane_div_tile(K)
    tm, tn = _maybe_split_for_megacore(M, N, tm, tn)
    w_kwargs = dict(pipeline_mode=pl.Buffered(3)) if (K // tk) >= 4 else {}
    grid = (pl.cdiv(M, tm), pl.cdiv(N, tn), K // tk)
    out = pl.pallas_call(
        functools.partial(_matmul_kernel, activation=activation),
        out_shape=jax.ShapeDtypeStruct((M, N), x.dtype),
        grid=grid,
        in_specs=[
            pl.BlockSpec((tm, tk), lambda i, j, k: (i, k)),
            pl.BlockSpec((tk, tn), lambda i, j, k: (k, j), **w_kwargs),
            pl.BlockSpec((1, tn), lambda i, j, k: (0, j)),
        ],
        out_specs=pl.BlockSpec((tm, tn), lambda i, j, k: (i, j)),
        scratch_shapes=[pltpu.VMEM((tm, tn), jnp.float32)],
        compiler_params=pltpu.CompilerParams(
            dimension_semantics=("parallel", "parallel", "arbitrary"),
            vmem_limit_bytes=_VMEM_LIMIT,
        ),
    )(a, w, b.reshape(1, N))
    return out.reshape(*orig_shape[:-1], N)


def _ln_mod_linear_kernel(x_ref, shift_ref, scale_ref, w_ref, b_ref, o_ref, a_ref,
                          *, activation):
    # Build the LayerNorm'd + modulated A tile once per (b, s-tile); reuse across nj.
    @pl.when(pl.program_id(2) == 0)
    def _():
        x = x_ref[0].astype(jnp.float32)                     # [ts, D]
        mu = jnp.mean(x, axis=-1, keepdims=True)
        xc = x - mu
        var = jnp.mean(xc * xc, axis=-1, keepdims=True)
        xn = xc * jax.lax.rsqrt(var + 1e-6)
        y = xn * (1.0 + scale_ref[0].astype(jnp.float32)) + shift_ref[0].astype(jnp.float32)
        a_ref[...] = y.astype(a_ref.dtype)

    acc = jnp.dot(a_ref[...], w_ref[...], preferred_element_type=jnp.float32)
    acc = acc + b_ref[...].astype(jnp.float32)
    if activation == "gelu":
        acc = _gelu_tanh(acc)
    o_ref[0] = acc.astype(o_ref.dtype)


def ln_mod_linear(x, shift, scale, w, b, activation="none", out_dtype=None):
    """activation(LN(x)*(1+scale)+shift) @ w + b, fully fused (no [B,S,D] intermediate).

    x: [B, S, K]; shift/scale: [B, K]; w: [K, N]; b: [N]. Requires K resident in VMEM."""
    B, S, K = x.shape
    N = w.shape[1]
    if out_dtype is None:
        out_dtype = x.dtype
    ts = _pick_div_tile(S)
    tn = N if N <= _TILE_CAP else _TILE_CAP
    grid = (B, S // ts, pl.cdiv(N, tn))
    return pl.pallas_call(
        functools.partial(_ln_mod_linear_kernel, activation=activation),
        out_shape=jax.ShapeDtypeStruct((B, S, N), out_dtype),
        grid=grid,
        in_specs=[
            pl.BlockSpec((1, ts, K), lambda bi, si, nj: (bi, si, 0)),
            pl.BlockSpec((1, 1, K), lambda bi, si, nj: (bi, 0, 0)),
            pl.BlockSpec((1, 1, K), lambda bi, si, nj: (bi, 0, 0)),
            pl.BlockSpec((K, tn), lambda bi, si, nj: (0, nj)),
            pl.BlockSpec((1, tn), lambda bi, si, nj: (0, nj)),
        ],
        out_specs=pl.BlockSpec((1, ts, tn), lambda bi, si, nj: (bi, si, nj)),
        scratch_shapes=[pltpu.VMEM((ts, K), w.dtype)],
        compiler_params=pltpu.CompilerParams(
            dimension_semantics=("parallel", "parallel", "arbitrary"),
            vmem_limit_bytes=_VMEM_LIMIT,
        ),
    )(x, shift.reshape(B, 1, K), scale.reshape(B, 1, K), w, b.reshape(1, N))


def _linear_gate_res_kernel(x_ref, w_ref, b_ref, gate_ref, res_ref, o_ref, acc_ref):
    ki = pl.program_id(3)

    @pl.when(ki == 0)
    def _():
        acc_ref[...] = jnp.zeros_like(acc_ref)

    a = x_ref[0]
    if a.dtype != w_ref.dtype:
        a = a.astype(w_ref.dtype)
    acc_ref[...] += jnp.dot(a, w_ref[...], preferred_element_type=jnp.float32)

    @pl.when(ki == pl.num_programs(3) - 1)
    def _():
        y = acc_ref[...] + b_ref[...].astype(jnp.float32)
        y = res_ref[0].astype(jnp.float32) + gate_ref[0].astype(jnp.float32) * y
        o_ref[0] = y.astype(o_ref.dtype)


def linear_gate_residual(x, w, b, gate, residual):
    """out = residual + gate[:, None, :] * (x @ w + b), fully fused, N-tiled.

    x: [B, S, K], w: [K, N], b: [N], gate: [B, N], residual: [B, S, N] (f32)."""
    B, S, K = x.shape
    N = w.shape[1]
    ts = _pick_div_tile(S)
    tn = N if N <= _TILE_CAP else _TILE_CAP
    tk = _pick_lane_div_tile(K)
    w_kwargs = dict(pipeline_mode=pl.Buffered(3)) if (K // tk) >= 4 else {}
    grid = (B, S // ts, pl.cdiv(N, tn), K // tk)
    return pl.pallas_call(
        _linear_gate_res_kernel,
        out_shape=jax.ShapeDtypeStruct((B, S, N), residual.dtype),
        grid=grid,
        in_specs=[
            pl.BlockSpec((1, ts, tk), lambda bi, si, nj, ki: (bi, si, ki)),
            pl.BlockSpec((tk, tn), lambda bi, si, nj, ki: (ki, nj), **w_kwargs),
            pl.BlockSpec((1, tn), lambda bi, si, nj, ki: (0, nj)),
            pl.BlockSpec((1, 1, tn), lambda bi, si, nj, ki: (bi, 0, nj)),
            pl.BlockSpec((1, ts, tn), lambda bi, si, nj, ki: (bi, si, nj)),
        ],
        out_specs=pl.BlockSpec((1, ts, tn), lambda bi, si, nj, ki: (bi, si, nj)),
        scratch_shapes=[pltpu.VMEM((ts, tn), jnp.float32)],
        compiler_params=pltpu.CompilerParams(
            dimension_semantics=("parallel", "parallel", "parallel", "arbitrary"),
            vmem_limit_bytes=_VMEM_LIMIT,
        ),
    )(x, w, b.reshape(1, N), gate.reshape(B, 1, N), residual)


def _flash_attn_kernel(q_ref, k_ref, v_ref, o_ref, m_ref, l_ref, acc_ref):
    ki = pl.program_id(2)

    @pl.when(ki == 0)
    def _():
        m_ref[...] = jnp.full(m_ref.shape, -jnp.inf, jnp.float32)
        l_ref[...] = jnp.zeros_like(l_ref)
        acc_ref[...] = jnp.zeros_like(acc_ref)

    q = q_ref[0]                                  # [tq, Dh] (already 1/sqrt(Dh)-scaled)
    k = k_ref[0]                                  # [tk, Dh]
    v = v_ref[0]                                  # [tk, Dh]
    # contract head_dim of both operands (no explicit k transpose)
    s = jax.lax.dot_general(q, k, (((1,), (1,)), ((), ())),
                            preferred_element_type=jnp.float32)        # [tq, tk]
    m_prev = m_ref[...]
    m_new = jnp.maximum(m_prev, jnp.max(s, axis=-1, keepdims=True))
    alpha = jnp.exp(m_prev - m_new)
    p = jnp.exp(s - m_new)
    l_ref[...] = alpha * l_ref[...] + jnp.sum(p, axis=-1, keepdims=True)
    acc_ref[...] = alpha * acc_ref[...] + jnp.dot(p.astype(v.dtype), v,
                                                  preferred_element_type=jnp.float32)
    m_ref[...] = m_new

    @pl.when(ki == pl.num_programs(2) - 1)
    def _():
        # TODO(synk): approx reciprocal (~1e-3 rel err); use exact divide for parity.
        inv = pl.reciprocal(l_ref[...], approx=True)
        o_ref[0] = (acc_ref[...] * inv).astype(o_ref.dtype)


def flash_attention(q, k, v):
    """Flash attention per (batch*head). q/k/v: [BH, S, Dh] -> [BH, S, Dh].

    The head axis is folded into the grid (no per-head lane slicing in-kernel, no
    over-wide qkv DMA); online softmax keeps VMEM O(tq*tk)."""
    BH, S, Dh = q.shape
    tq = _pick_div_tile(S, 256)
    tk = _pick_div_tile(S, 256)
    kv_kwargs = dict(pipeline_mode=pl.Buffered(3)) if (S // tk) >= 4 else {}
    grid = (BH, S // tq, S // tk)
    return pl.pallas_call(
        _flash_attn_kernel,
        out_shape=jax.ShapeDtypeStruct((BH, S, Dh), q.dtype),
        grid=grid,
        in_specs=[
            pl.BlockSpec((1, tq, Dh), lambda b, qi, ki: (b, qi, 0)),
            pl.BlockSpec((1, tk, Dh), lambda b, qi, ki: (b, ki, 0), **kv_kwargs),
            pl.BlockSpec((1, tk, Dh), lambda b, qi, ki: (b, ki, 0), **kv_kwargs),
        ],
        out_specs=pl.BlockSpec((1, tq, Dh), lambda b, qi, ki: (b, qi, 0)),
        scratch_shapes=[
            pltpu.VMEM((tq, 1), jnp.float32),    # running max
            pltpu.VMEM((tq, 1), jnp.float32),    # running sum
            pltpu.VMEM((tq, Dh), jnp.float32),   # output accumulator
        ],
        compiler_params=pltpu.CompilerParams(
            dimension_semantics=("parallel", "parallel", "arbitrary"),
            vmem_limit_bytes=_VMEM_LIMIT,
        ),
    )(q, k, v)


def mhsa(qkv, num_heads):
    """Multi-head self-attention. qkv: [B, S, 3D] -> [B, S, D].

    Head split / merge done ONCE in the wrapper (cheap XLA transposes) so the flash
    kernel sees head-major [B*nh, S, Dh] operands (lane-dense when Dh==128)."""
    B, S, three_d = qkv.shape
    D = three_d // 3
    Dh = D // num_heads
    qkv5 = qkv.reshape(B, S, 3, num_heads, Dh)

    def split(i):
        return qkv5[:, :, i].transpose(0, 2, 1, 3).reshape(B * num_heads, S, Dh)

    o = flash_attention(split(0), split(1), split(2))
    return o.reshape(B, num_heads, S, Dh).transpose(0, 2, 1, 3).reshape(B, S, D)


def _level_mix_kernel(x_ref, w_ref, b_ref, o_ref, *, n_in, n_out):
    # x block: [1, n_in, tt, D]; w/b live in SMEM (tiny); D stays on the lane axis.
    # x tiles are re-read from VMEM inside the loop to bound vreg live ranges.
    for no in range(n_out):
        acc = x_ref[0, 0].astype(jnp.float32) * w_ref[0, no]
        for n in range(1, n_in):
            acc = acc + x_ref[0, n].astype(jnp.float32) * w_ref[n, no]
        o_ref[0, no] = (acc + b_ref[no]).astype(o_ref.dtype)


def level_mix(x, w, b):
    """out[b, j, t, :] = sum_i x[b, i, t, :] * w[i, j] + b[j]   (lane-dense in D).

    x: [B, n_in, T, D], w: [n_in, n_out], b: [n_out] -> [B, n_out, T, D]."""
    B, n_in, T, D = x.shape
    n_out = w.shape[1]
    tt = _pick_div_tile(T, 512)
    grid = (B, T // tt)
    return pl.pallas_call(
        functools.partial(_level_mix_kernel, n_in=n_in, n_out=n_out),
        out_shape=jax.ShapeDtypeStruct((B, n_out, T, D), x.dtype),
        grid=grid,
        in_specs=[
            pl.BlockSpec((1, n_in, tt, D), lambda bi, ti: (bi, 0, ti, 0)),
            pl.BlockSpec(memory_space=pltpu.MemorySpace.SMEM),
            pl.BlockSpec(memory_space=pltpu.MemorySpace.SMEM),
        ],
        out_specs=pl.BlockSpec((1, n_out, tt, D), lambda bi, ti: (bi, 0, ti, 0)),
        compiler_params=pltpu.CompilerParams(
            dimension_semantics=("parallel", "parallel"),
            vmem_limit_bytes=_VMEM_LIMIT,
        ),
    )(x, w, b)


# ------------------------------ model (glue) --------------------------------

def fourier_expansion(x, lower, upper, d):
    """Aurora-style Fourier expansion of a scalar into d dims (no parameters)."""
    wavelengths = jnp.logspace(jnp.log10(lower), jnp.log10(upper), d // 2,
                               dtype=jnp.float32)
    prod = x[..., None].astype(jnp.float32) * (2.0 * jnp.pi) / wavelengths
    return jnp.concatenate([jnp.sin(prod), jnp.cos(prod)], axis=-1)


def init_params(key, cfg):
    D = cfg["hidden_size"]
    V = cfg["variables"]
    Nl = cfg["n_level"]
    p = cfg["patch_size"]
    L = cfg["latent_levels"]
    Hm = int(D * cfg["mlp_ratio"])
    Dh = D // cfg["num_heads"]

    def tn(k, shape):  # approximates trunc_normal_(std=0.02)
        return jax.random.truncated_normal(k, -2.0, 2.0, shape, jnp.float32) * 0.02

    def mm(w):  # big matmul weights stored in the MXU operand dtype (no per-call cast)
        return w.astype(_MM_DTYPE)

    keys = iter(jax.random.split(key, 16 + 8 * cfg["depth"]))
    params = {
        "enc_patch_w": mm(tn(next(keys), (V * p * p, D))),
        "enc_patch_b": jnp.zeros((D,), jnp.float32),
        "enc_level_w": tn(next(keys), (Nl, L)),            # scalar mix weights stay f32 (SMEM)
        "enc_level_b": jnp.zeros((L,), jnp.float32),
        "dec_level_w": tn(next(keys), (L, Nl)),
        "dec_level_b": jnp.zeros((Nl,), jnp.float32),
        "dec_head_w": mm(tn(next(keys), (D, V * p * p))),
        "dec_head_b": jnp.zeros((V * p * p,), jnp.float32),
        "blocks": [],
    }
    scale = 1.0 / (Dh ** 0.5)
    for _ in range(cfg["depth"]):
        qkv_w = tn(next(keys), (D, 3 * D))
        qkv_b = jnp.zeros((3 * D,), jnp.float32)
        # Fold the 1/sqrt(Dh) softmax scale into the q columns (host-side, free).
        qkv_w = qkv_w.at[:, :D].multiply(scale)
        qkv_b = qkv_b.at[:D].multiply(scale)
        params["blocks"].append({
            "ada_w": mm(tn(next(keys), (D, 6 * D))), "ada_b": jnp.zeros((6 * D,), jnp.float32),
            "qkv_w": mm(qkv_w),                      "qkv_b": qkv_b,
            "proj_w": mm(tn(next(keys), (D, D))),    "proj_b": jnp.zeros((D,), jnp.float32),
            "fc1_w": mm(tn(next(keys), (D, Hm))),    "fc1_b": jnp.zeros((Hm,), jnp.float32),
            "fc2_w": mm(tn(next(keys), (Hm, D))),    "fc2_b": jnp.zeros((D,), jnp.float32),
        })
    return params


def _patchify(x, p):
    # x: [B, V, N, Hp, Wp] -> tokens [B, N, T, V*p*p]  (patch vector order: V, ph, pw)
    B, V, N, Hp, Wp = x.shape
    Hg, Wg = Hp // p, Wp // p
    x = x.reshape(B, V, N, Hg, p, Wg, p)
    x = x.transpose(0, 2, 3, 5, 1, 4, 6)          # [B, N, Hg, Wg, V, p, p]
    return x.reshape(B, N, Hg * Wg, V * p * p)


def _unpatchify(t, p, V, Hp, Wp):
    # t: [B, N, T, V*p*p] -> [B, V, N, Hp, Wp]
    B, N, T, _ = t.shape
    Hg, Wg = Hp // p, Wp // p
    t = t.reshape(B, N, Hg, Wg, V, p, p)
    t = t.transpose(0, 4, 1, 2, 5, 3, 6)          # [B, V, N, Hg, p, Wg, p]
    return t.reshape(B, V, N, Hp, Wp)


def poseidon_pre_forward(params, x, x_mark, y_mark, cfg):
    B, V, N, H, W = x.shape
    p = cfg["patch_size"]
    D = cfg["hidden_size"]
    L = cfg["latent_levels"]
    nh = cfg["num_heads"]

    # ---- padding: matches F.pad(x, (pad_w, 0, pad_h, 0)) in the reference.
    # The reference computes BOTH pads with `p - dim % p` whenever either dim is
    # ragged (so a fully-divisible dim gets a full extra patch); kept for fidelity.
    pad_h = pad_w = 0
    if H % p != 0 or W % p != 0:
        pad_h = p - H % p
        pad_w = p - W % p
        x = jnp.pad(x, ((0, 0), (0, 0), (0, 0), (pad_h, 0), (pad_w, 0)))
    Hp, Wp = H + pad_h, W + pad_w

    # ---- Encoder: per-level patch embed + n_level -> latent_levels mix ----
    tokens = _patchify(x, p)                                               # [B,N,T,Vpp]
    T = tokens.shape[2]
    tokens = linear(tokens, params["enc_patch_w"], params["enc_patch_b"])  # [B,N,T,D]
    x_lat = level_mix(tokens, params["enc_level_w"], params["enc_level_b"])  # [B,L,T,D]

    # rearrange 'B L C D -> B (L C) D'
    S = L * T
    xs = x_lat.reshape(B, S, D)

    # ---- time embeddings (tiny, host glue) ----
    x_time_emb = (fourier_expansion(x_mark[:, 0], 1.0, 12.0, D)
                  + fourier_expansion(x_mark[:, 1], 1.0, 31.0, D))
    y_time_emb = (fourier_expansion(y_mark[:, 0], 1.0, 12.0, D)
                  + fourier_expansion(y_mark[:, 1], 1.0, 31.0, D))

    inter_dt = _MM_DTYPE if _BF16_MATMUL else xs.dtype   # bf16 intermediates; f32 residual

    # ---- DiT-style adaLN blocks ----
    for blk in params["blocks"]:
        c = jax.nn.silu(x_time_emb)                              # [B, D]
        ada = linear(c, blk["ada_w"], blk["ada_b"])              # [B, 6D]
        (shift_msa, scale_msa, gate_msa,
         shift_mlp, scale_mlp, gate_mlp) = jnp.split(ada, 6, axis=-1)

        # fused LN + adaLN modulate + qkv projection (q pre-scaled via weight fold)
        qkv = ln_mod_linear(xs, shift_msa, scale_msa, blk["qkv_w"], blk["qkv_b"],
                            out_dtype=inter_dt)                  # [B, S, 3D]
        attn = mhsa(qkv, nh)                                     # [B, S, D]
        xs = linear_gate_residual(attn, blk["proj_w"], blk["proj_b"], gate_msa, xs)

        # fused LN + adaLN modulate + fc1 (+GELU)
        h = ln_mod_linear(xs, shift_mlp, scale_mlp, blk["fc1_w"], blk["fc1_b"],
                          activation="gelu", out_dtype=inter_dt)  # [B, S, Hm]
        xs = linear_gate_residual(h, blk["fc2_w"], blk["fc2_b"], gate_mlp, xs)

    # rearrange 'B (L C) D -> B L C D'
    x_lat = xs.reshape(B, L, T, D)

    # ---- Decoder: add target-time emb, latent -> full levels, head, unpatchify ----
    x_lat = x_lat + y_time_emb[:, None, None, :]
    x_full = level_mix(x_lat, params["dec_level_w"], params["dec_level_b"])  # [B,N,T,D]
    x_full = linear(x_full, params["dec_head_w"], params["dec_head_b"])      # [B,N,T,Vpp]
    out = _unpatchify(x_full, p, V, Hp, Wp)                                  # [B,V,N,Hp,Wp]

    # x[:, :, :, pad_h:, pad_w:]
    return out[:, :, :, pad_h:, pad_w:]


# ---------------------------------- main -------------------------------------

if __name__ == "__main__":
    cfg = dict(
        in_img_size=(15, 14),   # non-divisible by patch_size -> exercises padding path
        variables=3,
        n_level=5,
        patch_size=4,
        hidden_size=64,
        depth=2,
        num_heads=4,
        mlp_ratio=4.0,
        latent_levels=2,
    )
    B = 2

    key = jax.random.PRNGKey(0)
    kparam, kx, km, kd, kym, kyd = jax.random.split(key, 6)
    params = init_params(kparam, cfg)

    x = jax.random.normal(
        kx, (B, cfg["variables"], cfg["n_level"], *cfg["in_img_size"]), jnp.float32)
    x_mark = jnp.stack(
        [jax.random.randint(km, (B,), 1, 13).astype(jnp.float32),
         jax.random.randint(kd, (B,), 1, 32).astype(jnp.float32)], axis=1)
    y_mark = jnp.stack(
        [jax.random.randint(kym, (B,), 1, 13).astype(jnp.float32),
         jax.random.randint(kyd, (B,), 1, 32).astype(jnp.float32)], axis=1)

    fwd = jax.jit(lambda p_, a, b, c: poseidon_pre_forward(p_, a, b, c, cfg))
    out = fwd(params, x, x_mark, y_mark)
    out = jax.block_until_ready(out)

    expected = (B, cfg["variables"], cfg["n_level"], *cfg["in_img_size"])
    assert out.shape == expected, (out.shape, expected)
    assert jnp.all(jnp.isfinite(out))
    print("KERNEL_OK")
</pallas_src>

<mosaic_0001>
module attributes {stable_mosaic.version = 11 : i64} {
  func.func @_matmul_kernel(%arg0: i32, %arg1: i32, %arg2: i32, %arg3: memref<80x48xf32, #tpu.memory_space<vmem>>, %arg4: memref<48x64xbf16, #tpu.memory_space<vmem>>, %arg5: memref<1x64xf32, #tpu.memory_space<vmem>>, %arg6: memref<80x64xf32, #tpu.memory_space<vmem>>, %arg7: memref<80x64xf32, #tpu.memory_space<vmem>>) attributes {dimension_semantics = [#tpu.dimension_semantics<parallel>, #tpu.dimension_semantics<parallel>, #tpu.dimension_semantics<arbitrary>], iteration_bounds = array<i64: 2, 1, 1>, scalar_prefetch = 0 : i64, scratch_operands = 1 : i64, tpu.core_type = #tpu.core_type<tc>, window_params = [{transform_indices = @transform_0, window_bounds = array<i64: 80, 48>}, {transform_indices = @transform_1, window_bounds = array<i64: 48, 64>}, {transform_indices = @transform_2, window_bounds = array<i64: 1, 64>}, {transform_indices = @transform_3, window_bounds = array<i64: 80, 64>}]} {
    %c0_i32 = arith.constant 0 : i32
    %0 = arith.cmpi eq, %arg2, %c0_i32 : i32
    %1 = arith.extui %0 : i1 to i32
    %c0_i32_0 = arith.constant 0 : i32
    %2 = arith.cmpi ne, %1, %c0_i32_0 : i32
    scf.if %2 {
      %cst_10 = arith.constant 0.000000e+00 : f32
      %13 = vector.broadcast %cst_10 : f32 to vector<80x64xf32>
      %c0_11 = arith.constant 0 : index
      %c0_12 = arith.constant 0 : index
      %14 = vector.load %arg7[%c0_11, %c0_12] : memref<80x64xf32, #tpu.memory_space<vmem>>, vector<80x64xf32>
      tpu.vector_store %arg7[%c0_11, %c0_12], %13 {strides = array<i32>} : memref<80x64xf32, #tpu.memory_space<vmem>>, vector<80x64xf32>,
    } else {
    }
    %c0 = arith.constant 0 : index
    %c0_1 = arith.constant 0 : index
    %3 = vector.load %arg3[%c0, %c0_1] : memref<80x48xf32, #tpu.memory_space<vmem>>, vector<80x48xf32>
    %4 = arith.truncf %3 : vector<80x48xf32> to vector<80x48xbf16>
    %c0_2 = arith.constant 0 : index
    %c0_3 = arith.constant 0 : index
    %5 = vector.load %arg7[%c0_2, %c0_3] : memref<80x64xf32, #tpu.memory_space<vmem>>, vector<80x64xf32>
    %c0_4 = arith.constant 0 : index
    %c0_5 = arith.constant 0 : index
    %6 = vector.load %arg4[%c0_4, %c0_5] : memref<48x64xbf16, #tpu.memory_space<vmem>>, vector<48x64xbf16>
    %cst = arith.constant dense<0.000000e+00> : vector<80x64xf32>
    %7 = tpu.matmul %4, %6, %cst {dimension_numbers = #tpu.dot_dimension_numbers<[1], [0], [0], [1], [0, 0, 1, 1], [], []>} : vector<80x48xbf16>, vector<48x64xbf16>, vector<80x64xf32> -> vector<80x64xf32>
    %8 = arith.addf %5, %7 : vector<80x64xf32>
    %c0_6 = arith.constant 0 : index
    %c0_7 = arith.constant 0 : index
    %9 = vector.load %arg7[%c0_6, %c0_7] : memref<80x64xf32, #tpu.memory_space<vmem>>, vector<80x64xf32>
    tpu.vector_store %arg7[%c0_6, %c0_7], %8 {strides = array<i32>} : memref<80x64xf32, #tpu.memory_space<vmem>>, vector<80x64xf32>,
    %c0_i32_8 = arith.constant 0 : i32
    %10 = arith.cmpi eq, %arg2, %c0_i32_8 : i32
    %11 = arith.extui %10 : i1 to i32
    %c0_i32_9 = arith.constant 0 : i32
    %12 = arith.cmpi ne, %11, %c0_i32_9 : i32
    scf.if %12 {
      %c0_10 = arith.constant 0 : index
      %c0_11 = arith.constant 0 : index
      %13 = vector.load %arg7[%c0_10, %c0_11] : memref<80x64xf32, #tpu.memory_space<vmem>>, vector<80x64xf32>
      %c0_12 = arith.constant 0 : index
      %c0_13 = arith.constant 0 : index
      %14 = vector.load %arg5[%c0_12, %c0_13] : memref<1x64xf32, #tpu.memory_space<vmem>>, vector<1x64xf32>
      %15 = vector.broadcast %14 : vector<1x64xf32> to vector<80x64xf32>
      %16 = arith.addf %13, %15 : vector<80x64xf32>
      %c0_14 = arith.constant 0 : index
      %c0_15 = arith.constant 0 : index
      %17 = vector.load %arg6[%c0_14, %c0_15] : memref<80x64xf32, #tpu.memory_space<vmem>>, vector<80x64xf32>
      tpu.vector_store %arg6[%c0_14, %c0_15], %16 {strides = array<i32>} : memref<80x64xf32, #tpu.memory_space<vmem>>, vector<80x64xf32>,
    } else {
    }
    return
  }
  func.func @transform_0(%arg0: i32, %arg1: i32, %arg2: i32) -> (i32, i32) {
    %c0_i32 = arith.constant 0 : i32
    return %arg0, %arg2 : i32, i32
  }
  func.func @transform_1(%arg0: i32, %arg1: i32, %arg2: i32) -> (i32, i32) {
    %c0_i32 = arith.constant 0 : i32
    return %arg2, %arg1 : i32, i32
  }
  func.func @transform_2(%arg0: i32, %arg1: i32, %arg2: i32) -> (i32, i32) {
    %c0_i32 = arith.constant 0 : i32
    %c0_i32_0 = arith.constant 0 : i32
    return %c0_i32, %arg1 : i32, i32
  }
  func.func @transform_3(%arg0: i32, %arg1: i32, %arg2: i32) -> (i32, i32) {
    %c0_i32 = arith.constant 0 : i32
    return %arg0, %arg1 : i32, i32
  }
}

module attributes {stable_mosaic.version = 11 : i64} {
  func.func @_level_mix_kernel(%arg0: i32, %arg1: i32, %arg2: memref<1x5x16x64xf32, #tpu.memory_space<vmem>>, %arg3: memref<5x2xf32, #tpu.memory_space<smem>>, %arg4: memref<2xf32, #tpu.memory_space<smem>>, %arg5: memref<1x2x16x64xf32, #tpu.memory_space<vmem>>) attributes {dimension_semantics = [#tpu.dimension_semantics<parallel>, #tpu.dimension_semantics<parallel>], iteration_bounds = array<i64: 2, 1>, scalar_prefetch = 0 : i64, scratch_operands = 0 : i64, tpu.core_type = #tpu.core_type<tc>, window_params = [{transform_indices = @transform_0, window_bounds = array<i64: 1, 5, 16, 64>}, {transform_indices = @transform_1, window_bounds = array<i64: 5, 2>}, {transform_indices = @transform_2, window_bounds = array<i64: 2>}, {transform_indices = @transform_3, window_bounds = array<i64: 1, 2, 16, 64>}]} {
    %c0 = arith.constant 0 : index
    %c0_0 = arith.constant 0 : index
    %c0_1 = arith.constant 0 : index
    %c0_2 = arith.constant 0 : index
    %0 = vector.load %arg2[%c0, %c0_0, %c0_1, %c0_2] : memref<1x5x16x64xf32, #tpu.memory_space<vmem>>, vector<1x1x16x64xf32>
    %1 = vector.shape_cast %0 : vector<1x1x16x64xf32> to vector<16x64xf32>
    %c0_3 = arith.constant 0 : index
    %c0_4 = arith.constant 0 : index
    %2 = memref.load %arg3[%c0_3, %c0_4] : memref<5x2xf32, #tpu.memory_space<smem>>
    %3 = vector.broadcast %2 : f32 to vector<16x64xf32>
    %4 = arith.mulf %1, %3 : vector<16x64xf32>
    %c0_5 = arith.constant 0 : index
    %c1 = arith.constant 1 : index
    %c0_6 = arith.constant 0 : index
    %c0_7 = arith.constant 0 : index
    %5 = vector.load %arg2[%c0_5, %c1, %c0_6, %c0_7] : memref<1x5x16x64xf32, #tpu.memory_space<vmem>>, vector<1x1x16x64xf32>
    %6 = vector.shape_cast %5 : vector<1x1x16x64xf32> to vector<16x64xf32>
    %c1_8 = arith.constant 1 : index
    %c0_9 = arith.constant 0 : index
    %7 = memref.load %arg3[%c1_8, %c0_9] : memref<5x2xf32, #tpu.memory_space<smem>>
    %8 = vector.broadcast %7 : f32 to vector<16x64xf32>
    %9 = arith.mulf %6, %8 : vector<16x64xf32>
    %10 = arith.addf %4, %9 : vector<16x64xf32>
    %c0_10 = arith.constant 0 : index
    %c2 = arith.constant 2 : index
    %c0_11 = arith.constant 0 : index
    %c0_12 = arith.constant 0 : index
    %11 = vector.load %arg2[%c0_10, %c2, %c0_11, %c0_12] : memref<1x5x16x64xf32, #tpu.memory_space<vmem>>, vector<1x1x16x64xf32>
    %12 = vector.shape_cast %11 : vector<1x1x16x64xf32> to vector<16x64xf32>
    %c2_13 = arith.constant 2 : index
    %c0_14 = arith.constant 0 : index
    %13 = memref.load %arg3[%c2_13, %c0_14] : memref<5x2xf32, #tpu.memory_space<smem>>
    %14 = vector.broadcast %13 : f32 to vector<16x64xf32>
    %15 = arith.mulf %12, %14 : vector<16x64xf32>
    %16 = arith.addf %10, %15 : vector<16x64xf32>
    %c0_15 = arith.constant 0 : index
    %c3 = arith.constant 3 : index
    %c0_16 = arith.constant 0 : index
    %c0_17 = arith.constant 0 : index
    %17 = vector.load %arg2[%c0_15, %c3, %c0_16, %c0_17] : memref<1x5x16x64xf32, #tpu.memory_space<vmem>>, vector<1x1x16x64xf32>
    %18 = vector.shape_cast %17 : vector<1x1x16x64xf32> to vector<16x64xf32>
    %c3_18 = arith.constant 3 : index
    %c0_19 = arith.constant 0 : index
    %19 = memref.load %arg3[%c3_18, %c0_19] : memref<5x2xf32, #tpu.memory_space<smem>>
    %20 = vector.broadcast %19 : f32 to vector<16x64xf32>
    %21 = arith.mulf %18, %20 : vector<16x64xf32>
    %22 = arith.addf %16, %21 : vector<16x64xf32>
    %c0_20 = arith.constant 0 : index
    %c4 = arith.constant 4 : index
    %c0_21 = arith.constant 0 : index
    %c0_22 = arith.constant 0 : index
    %23 = vector.load %arg2[%c0_20, %c4, %c0_21, %c0_22] : memref<1x5x16x64xf32, #tpu.memory_space<vmem>>, vector<1x1x16x64xf32>
    %24 = vector.shape_cast %23 : vector<1x1x16x64xf32> to vector<16x64xf32>
    %c4_23 = arith.constant 4 : index
    %c0_24 = arith.constant 0 : index
    %25 = memref.load %arg3[%c4_23, %c0_24] : memref<5x2xf32, #tpu.memory_space<smem>>
    %26 = vector.broadcast %25 : f32 to vector<16x64xf32>
    %27 = arith.mulf %24, %26 : vector<16x64xf32>
    %28 = arith.addf %22, %27 : vector<16x64xf32>
    %c0_25 = arith.constant 0 : index
    %29 = memref.load %arg4[%c0_25] : memref<2xf32, #tpu.memory_space<smem>>
    %30 = vector.broadcast %29 : f32 to vector<16x64xf32>
    %31 = arith.addf %28, %30 : vector<16x64xf32>
    %c0_26 = arith.constant 0 : index
    %c0_27 = arith.constant 0 : index
    %c0_28 = arith.constant 0 : index
    %c0_29 = arith.constant 0 : index
    %32 = vector.load %arg5[%c0_26, %c0_27, %c0_28, %c0_29] : memref<1x2x16x64xf32, #tpu.memory_space<vmem>>, vector<1x1x16x64xf32>
    %33 = vector.shape_cast %32 : vector<1x1x16x64xf32> to vector<16x64xf32>
    %34 = vector.shape_cast %31 : vector<16x64xf32> to vector<1x1x16x64xf32>
    tpu.vector_store %arg5[%c0_26, %c0_27, %c0_28, %c0_29], %34 {strides = array<i32>} : memref<1x2x16x64xf32, #tpu.memory_space<vmem>>, vector<1x1x16x64xf32>,
    %c0_30 = arith.constant 0 : index
    %c0_31 = arith.constant 0 : index
    %c0_32 = arith.constant 0 : index
    %c0_33 = arith.constant 0 : index
    %35 = vector.load %arg2[%c0_30, %c0_31, %c0_32, %c0_33] : memref<1x5x16x64xf32, #tpu.memory_space<vmem>>, vector<1x1x16x64xf32>
    %36 = vector.shape_cast %35 : vector<1x1x16x64xf32> to vector<16x64xf32>
    %c0_34 = arith.constant 0 : index
    %c1_35 = arith.constant 1 : index
    %37 = memref.load %arg3[%c0_34, %c1_35] : memref<5x2xf32, #tpu.memory_space<smem>>
    %38 = vector.broadcast %37 : f32 to vector<16x64xf32>
    %39 = arith.mulf %36, %38 : vector<16x64xf32>
    %c0_36 = arith.constant 0 : index
    %c1_37 = arith.constant 1 : index
    %c0_38 = arith.constant 0 : index
    %c0_39 = arith.constant 0 : index
    %40 = vector.load %arg2[%c0_36, %c1_37, %c0_38, %c0_39] : memref<1x5x16x64xf32, #tpu.memory_space<vmem>>, vector<1x1x16x64xf32>
    %41 = vector.shape_cast %40 : vector<1x1x16x64xf32> to vector<16x64xf32>
    %c1_40 = arith.constant 1 : index
    %c1_41 = arith.constant 1 : index
    %42 = memref.load %arg3[%c1_40, %c1_41] : memref<5x2xf32, #tpu.memory_space<smem>>
    %43 = vector.broadcast %42 : f32 to vector<16x64xf32>
    %44 = arith.mulf %41, %43 : vector<16x64xf32>
    %45 = arith.addf %39, %44 : vector<16x64xf32>
    %c0_42 = arith.constant 0 : index
    %c2_43 = arith.constant 2 : index
    %c0_44 = arith.constant 0 : index
    %c0_45 = arith.constant 0 : index
    %46 = vector.load %arg2[%c0_42, %c2_43, %c0_44, %c0_45] : memref<1x5x16x64xf32, #tpu.memory_space<vmem>>, vector<1x1x16x64xf32>
    %47 = vector.shape_cast %46 : vector<1x1x16x64xf32> to vector<16x64xf32>
    %c2_46 = arith.constant 2 : index
    %c1_47 = arith.constant 1 : index
    %48 = memref.load %arg3[%c2_46, %c1_47] : memref<5x2xf32, #tpu.memory_space<smem>>
    %49 = vector.broadcast %48 : f32 to vector<16x64xf32>
    %50 = arith.mulf %47, %49 : vector<16x64xf32>
    %51 = arith.addf %45, %50 : vector<16x64xf32>
    %c0_48 = arith.constant 0 : index
    %c3_49 = arith.constant 3 : index
    %c0_50 = arith.constant 0 : index
    %c0_51 = arith.constant 0 : index
    %52 = vector.load %arg2[%c0_48, %c3_49, %c0_50, %c0_51] : memref<1x5x16x64xf32, #tpu.memory_space<vmem>>, vector<1x1x16x64xf32>
    %53 = vector.shape_cast %52 : vector<1x1x16x64xf32> to vector<16x64xf32>
    %c3_52 = arith.constant 3 : index
    %c1_53 = arith.constant 1 : index
    %54 = memref.load %arg3[%c3_52, %c1_53] : memref<5x2xf32, #tpu.memory_space<smem>>
    %55 = vector.broadcast %54 : f32 to vector<16x64xf32>
    %56 = arith.mulf %53, %55 : vector<16x64xf32>
    %57 = arith.addf %51, %56 : vector<16x64xf32>
    %c0_54 = arith.constant 0 : index
    %c4_55 = arith.constant 4 : index
    %c0_56 = arith.constant 0 : index
    %c0_57 = arith.constant 0 : index
    %58 = vector.load %arg2[%c0_54, %c4_55, %c0_56, %c0_57] : memref<1x5x16x64xf32, #tpu.memory_space<vmem>>, vector<1x1x16x64xf32>
    %59 = vector.shape_cast %58 : vector<1x1x16x64xf32> to vector<16x64xf32>
    %c4_58 = arith.constant 4 : index
    %c1_59 = arith.constant 1 : index
    %60 = memref.load %arg3[%c4_58, %c1_59] : memref<5x2xf32, #tpu.memory_space<smem>>
    %61 = vector.broadcast %60 : f32 to vector<16x64xf32>
    %62 = arith.mulf %59, %61 : vector<16x64xf32>
    %63 = arith.addf %57, %62 : vector<16x64xf32>
    %c1_60 = arith.constant 1 : index
    %64 = memref.load %arg4[%c1_60] : memref<2xf32, #tpu.memory_space<smem>>
    %65 = vector.broadcast %64 : f32 to vector<16x64xf32>
    %66 = arith.addf %63, %65 : vector<16x64xf32>
    %c0_61 = arith.constant 0 : index
    %c1_62 = arith.constant 1 : index
    %c0_63 = arith.constant 0 : index
    %c0_64 = arith.constant 0 : index
    %67 = vector.load %arg5[%c0_61, %c1_62, %c0_63, %c0_64] : memref<1x2x16x64xf32, #tpu.memory_space<vmem>>, vector<1x1x16x64xf32>
    %68 = vector.shape_cast %67 : vector<1x1x16x64xf32> to vector<16x64xf32>
    %69 = vector.shape_cast %66 : vector<16x64xf32> to vector<1x1x16x64xf32>
    tpu.vector_store %arg5[%c0_61, %c1_62, %c0_63, %c0_64], %69 {strides = array<i32>} : memref<1x2x16x64xf32, #tpu.memory_space<vmem>>, vector<1x1x16x64xf32>,
    return
  }
  func.func @transform_0(%arg0: i32, %arg1: i32) -> (i32, i32, i32, i32) {
    %c0_i32 = arith.constant 0 : i32
    %c0_i32_0 = arith.constant 0 : i32
    %c0_i32_1 = arith.constant 0 : i32
    return %arg0, %c0_i32, %arg1, %c0_i32_0 : i32, i32, i32, i32
  }
  func.func @transform_1(%arg0: i32, %arg1: i32) -> (i32, i32) {
    %c0_i32 = arith.constant 0 : i32
    %c0_i32_0 = arith.constant 0 : i32
    %c0_i32_1 = arith.constant 0 : i32
    return %c0_i32, %c0_i32_0 : i32, i32
  }
  func.func @transform_2(%arg0: i32, %arg1: i32) -> i32 {
    %c0_i32 = arith.constant 0 : i32
    %c0_i32_0 = arith.constant 0 : i32
    return %c0_i32 : i32
  }
  func.func @transform_3(%arg0: i32, %arg1: i32) -> (i32, i32, i32, i32) {
    %c0_i32 = arith.constant 0 : i32
    %c0_i32_0 = arith.constant 0 : i32
    %c0_i32_1 = arith.constant 0 : i32
    return %arg0, %c0_i32, %arg1, %c0_i32_0 : i32, i32, i32, i32
  }
}

module attributes {stable_mosaic.version = 11 : i64} {
  func.func @_matmul_kernel(%arg0: i32, %arg1: i32, %arg2: i32, %arg3: memref<2x64xf32, #tpu.memory_space<vmem>>, %arg4: memref<64x256xbf16, #tpu.memory_space<vmem>>, %arg5: memref<1x256xf32, #tpu.memory_space<vmem>>, %arg6: memref<2x256xf32, #tpu.memory_space<vmem>>, %arg7: memref<2x256xf32, #tpu.memory_space<vmem>>) attributes {dimension_semantics = [#tpu.dimension_semantics<parallel>, #tpu.dimension_semantics<parallel>, #tpu.dimension_semantics<arbitrary>], iteration_bounds = array<i64: 1, 2, 1>, scalar_prefetch = 0 : i64, scratch_operands = 1 : i64, tpu.core_type = #tpu.core_type<tc>, window_params = [{transform_indices = @transform_0, window_bounds = array<i64: 2, 64>}, {transform_indices = @transform_1, window_bounds = array<i64: 64, 256>}, {transform_indices = @transform_2, window_bounds = array<i64: 1, 256>}, {transform_indices = @transform_3, window_bounds = array<i64: 2, 256>}]} {
    %c0_i32 = arith.constant 0 : i32
    %0 = arith.cmpi eq, %arg2, %c0_i32 : i32
    %1 = arith.extui %0 : i1 to i32
    %c0_i32_0 = arith.constant 0 : i32
    %2 = arith.cmpi ne, %1, %c0_i32_0 : i32
    scf.if %2 {
      %cst_10 = arith.constant 0.000000e+00 : f32
      %13 = vector.broadcast %cst_10 : f32 to vector<2x256xf32>
      %c0_11 = arith.constant 0 : index
      %c0_12 = arith.constant 0 : index
      %14 = vector.load %arg7[%c0_11, %c0_12] : memref<2x256xf32, #tpu.memory_space<vmem>>, vector<2x256xf32>
      tpu.vector_store %arg7[%c0_11, %c0_12], %13 {strides = array<i32>} : memref<2x256xf32, #tpu.memory_space<vmem>>, vector<2x256xf32>,
    } else {
    }
    %c0 = arith.constant 0 : index
    %c0_1 = arith.constant 0 : index
    %3 = vector.load %arg3[%c0, %c0_1] : memref<2x64xf32, #tpu.memory_space<vmem>>, vector<2x64xf32>
    %4 = arith.truncf %3 : vector<2x64xf32> to vector<2x64xbf16>
    %c0_2 = arith.constant 0 : index
    %c0_3 = arith.constant 0 : index
    %5 = vector.load %arg7[%c0_2, %c0_3] : memref<2x256xf32, #tpu.memory_space<vmem>>, vector<2x256xf32>
    %c0_4 = arith.constant 0 : index
    %c0_5 = arith.constant 0 : index
    %6 = vector.load %arg4[%c0_4, %c0_5] : memref<64x256xbf16, #tpu.memory_space<vmem>>, vector<64x256xbf16>
    %cst = arith.constant dense<0.000000e+00> : vector<2x256xf32>
    %7 = tpu.matmul %4, %6, %cst {dimension_numbers = #tpu.dot_dimension_numbers<[1], [0], [0], [1], [0, 0, 1, 1], [], []>} : vector<2x64xbf16>, vector<64x256xbf16>, vector<2x256xf32> -> vector<2x256xf32>
    %8 = arith.addf %5, %7 : vector<2x256xf32>
    %c0_6 = arith.constant 0 : index
    %c0_7 = arith.constant 0 : index
    %9 = vector.load %arg7[%c0_6, %c0_7] : memref<2x256xf32, #tpu.memory_space<vmem>>, vector<2x256xf32>
    tpu.vector_store %arg7[%c0_6, %c0_7], %8 {strides = array<i32>} : memref<2x256xf32, #tpu.memory_space<vmem>>, vector<2x256xf32>,
    %c0_i32_8 = arith.constant 0 : i32
    %10 = arith.cmpi eq, %arg2, %c0_i32_8 : i32
    %11 = arith.extui %10 : i1 to i32
    %c0_i32_9 = arith.constant 0 : i32
    %12 = arith.cmpi ne, %11, %c0_i32_9 : i32
    scf.if %12 {
      %c0_10 = arith.constant 0 : index
      %c0_11 = arith.constant 0 : index
      %13 = vector.load %arg7[%c0_10, %c0_11] : memref<2x256xf32, #tpu.memory_space<vmem>>, vector<2x256xf32>
      %c0_12 = arith.constant 0 : index
      %c0_13 = arith.constant 0 : index
      %14 = vector.load %arg5[%c0_12, %c0_13] : memref<1x256xf32, #tpu.memory_space<vmem>>, vector<1x256xf32>
      %15 = vector.broadcast %14 : vector<1x256xf32> to vector<2x256xf32>
      %16 = arith.addf %13, %15 : vector<2x256xf32>
      %c0_14 = arith.constant 0 : index
      %c0_15 = arith.constant 0 : index
      %17 = vector.load %arg6[%c0_14, %c0_15] : memref<2x256xf32, #tpu.memory_space<vmem>>, vector<2x256xf32>
      tpu.vector_store %arg6[%c0_14, %c0_15], %16 {strides = array<i32>} : memref<2x256xf32, #tpu.memory_space<vmem>>, vector<2x256xf32>,
    } else {
    }
    return
  }
  func.func @transform_0(%arg0: i32, %arg1: i32, %arg2: i32) -> (i32, i32) {
    %c0_i32 = arith.constant 0 : i32
    return %arg0, %arg2 : i32, i32
  }
  func.func @transform_1(%arg0: i32, %arg1: i32, %arg2: i32) -> (i32, i32) {
    %c0_i32 = arith.constant 0 : i32
    return %arg2, %arg1 : i32, i32
  }
  func.func @transform_2(%arg0: i32, %arg1: i32, %arg2: i32) -> (i32, i32) {
    %c0_i32 = arith.constant 0 : i32
    %c0_i32_0 = arith.constant 0 : i32
    return %c0_i32, %arg1 : i32, i32
  }
  func.func @transform_3(%arg0: i32, %arg1: i32, %arg2: i32) -> (i32, i32) {
    %c0_i32 = arith.constant 0 : i32
    return %arg0, %arg1 : i32, i32
  }
}

module attributes {stable_mosaic.version = 11 : i64} {
  func.func @_ln_mod_linear_kernel(%arg0: i32, %arg1: i32, %arg2: i32, %arg3: memref<1x32x64xf32, #tpu.memory_space<vmem>>, %arg4: memref<1x1x64xf32, #tpu.memory_space<vmem>>, %arg5: memref<1x1x64xf32, #tpu.memory_space<vmem>>, %arg6: memref<64x192xbf16, #tpu.memory_space<vmem>>, %arg7: memref<1x192xf32, #tpu.memory_space<vmem>>, %arg8: memref<1x32x192xbf16, #tpu.memory_space<vmem>>, %arg9: memref<32x64xbf16, #tpu.memory_space<vmem>>) attributes {dimension_semantics = [#tpu.dimension_semantics<parallel>, #tpu.dimension_semantics<parallel>, #tpu.dimension_semantics<arbitrary>], iteration_bounds = array<i64: 2, 1, 1>, scalar_prefetch = 0 : i64, scratch_operands = 1 : i64, tpu.core_type = #tpu.core_type<tc>, window_params = [{transform_indices = @transform_0, window_bounds = array<i64: 1, 32, 64>}, {transform_indices = @transform_1, window_bounds = array<i64: 1, 1, 64>}, {transform_indices = @transform_2, window_bounds = array<i64: 1, 1, 64>}, {transform_indices = @transform_3, window_bounds = array<i64: 64, 192>}, {transform_indices = @transform_4, window_bounds = array<i64: 1, 192>}, {transform_indices = @transform_5, window_bounds = array<i64: 1, 32, 192>}]} {
    %c0_i32 = arith.constant 0 : i32
    %0 = arith.cmpi eq, %arg2, %c0_i32 : i32
    %1 = arith.extui %0 : i1 to i32
    %c0_i32_0 = arith.constant 0 : i32
    %2 = arith.cmpi ne, %1, %c0_i32_0 : i32
    scf.if %2 {
      %c0_9 = arith.constant 0 : index
      %c0_10 = arith.constant 0 : index
      %c0_11 = arith.constant 0 : index
      %13 = vector.load %arg3[%c0_9, %c0_10, %c0_11] : memref<1x32x64xf32, #tpu.memory_space<vmem>>, vector<1x32x64xf32>
      %14 = vector.shape_cast %13 : vector<1x32x64xf32> to vector<32x64xf32>
      %cst_12 = arith.constant dense<0.000000e+00> : vector<32xf32>
      %15 = vector.multi_reduction <add>, %14, %cst_12 [1] : vector<32x64xf32> to vector<32xf32>
      %16 = vector.shape_cast %15 : vector<32xf32> to vector<32x1xf32>
      %cst_13 = arith.constant 6.400000e+01 : f32
      %17 = vector.broadcast %cst_13 : f32 to vector<32x1xf32>
      %18 = arith.divf %16, %17 : vector<32x1xf32>
      %19 = vector.broadcast %18 : vector<32x1xf32> to vector<32x64xf32>
      %20 = arith.subf %14, %19 : vector<32x64xf32>
      %21 = arith.mulf %20, %20 : vector<32x64xf32>
      %cst_14 = arith.constant dense<0.000000e+00> : vector<32xf32>
      %22 = vector.multi_reduction <add>, %21, %cst_14 [1] : vector<32x64xf32> to vector<32xf32>
      %23 = vector.shape_cast %22 : vector<32xf32> to vector<32x1xf32>
      %cst_15 = arith.constant 6.400000e+01 : f32
      %24 = vector.broadcast %cst_15 : f32 to vector<32x1xf32>
      %25 = arith.divf %23, %24 : vector<32x1xf32>
      %cst_16 = arith.constant 9.99999997E-7 : f32
      %26 = vector.broadcast %cst_16 : f32 to vector<32x1xf32>
      %27 = arith.addf %25, %26 : vector<32x1xf32>
      %28 = math.rsqrt %27 : vector<32x1xf32>
      %29 = vector.broadcast %28 : vector<32x1xf32> to vector<32x64xf32>
      %30 = arith.mulf %20, %29 : vector<32x64xf32>
      %c0_17 = arith.constant 0 : index
      %c0_18 = arith.constant 0 : index
      %c0_19 = arith.constant 0 : index
      %31 = vector.load %arg5[%c0_17, %c0_18, %c0_19] : memref<1x1x64xf32, #tpu.memory_space<vmem>>, vector<1x1x64xf32>
      %32 = vector.shape_cast %31 : vector<1x1x64xf32> to vector<1x64xf32>
      %cst_20 = arith.constant 1.000000e+00 : f32
      %33 = vector.broadcast %cst_20 : f32 to vector<1x64xf32>
      %34 = arith.addf %33, %32 : vector<1x64xf32>
      %35 = vector.broadcast %34 : vector<1x64xf32> to vector<32x64xf32>
      %36 = arith.mulf %30, %35 : vector<32x64xf32>
      %c0_21 = arith.constant 0 : index
      %c0_22 = arith.constant 0 : index
      %c0_23 = arith.constant 0 : index
      %37 = vector.load %arg4[%c0_21, %c0_22, %c0_23] : memref<1x1x64xf32, #tpu.memory_space<vmem>>, vector<1x1x64xf32>
      %38 = vector.shape_cast %37 : vector<1x1x64xf32> to vector<1x64xf32>
      %39 = vector.broadcast %38 : vector<1x64xf32> to vector<32x64xf32>
      %40 = arith.addf %36, %39 : vector<32x64xf32>
      %41 = arith.truncf %40 : vector<32x64xf32> to vector<32x64xbf16>
      %c0_24 = arith.constant 0 : index
      %c0_25 = arith.constant 0 : index
      %42 = vector.load %arg9[%c0_24, %c0_25] : memref<32x64xbf16, #tpu.memory_space<vmem>>, vector<32x64xbf16>
      tpu.vector_store %arg9[%c0_24, %c0_25], %41 {strides = array<i32>} : memref<32x64xbf16, #tpu.memory_space<vmem>>, vector<32x64xbf16>,
    } else {
    }
    %c0 = arith.constant 0 : index
    %c0_1 = arith.constant 0 : index
    %3 = vector.load %arg9[%c0, %c0_1] : memref<32x64xbf16, #tpu.memory_space<vmem>>, vector<32x64xbf16>
    %c0_2 = arith.constant 0 : index
    %c0_3 = arith.constant 0 : index
    %4 = vector.load %arg6[%c0_2, %c0_3] : memref<64x192xbf16, #tpu.memory_space<vmem>>, vector<64x192xbf16>
    %cst = arith.constant dense<0.000000e+00> : vector<32x192xf32>
    %5 = tpu.matmul %3, %4, %cst {dimension_numbers = #tpu.dot_dimension_numbers<[1], [0], [0], [1], [0, 0, 1, 1], [], []>} : vector<32x64xbf16>, vector<64x192xbf16>, vector<32x192xf32> -> vector<32x192xf32>
    %c0_4 = arith.constant 0 : index
    %c0_5 = arith.constant 0 : index
    %6 = vector.load %arg7[%c0_4, %c0_5] : memref<1x192xf32, #tpu.memory_space<vmem>>, vector<1x192xf32>
    %7 = vector.broadcast %6 : vector<1x192xf32> to vector<32x192xf32>
    %8 = arith.addf %5, %7 : vector<32x192xf32>
    %9 = arith.truncf %8 : vector<32x192xf32> to vector<32x192xbf16>
    %c0_6 = arith.constant 0 : index
    %c0_7 = arith.constant 0 : index
    %c0_8 = arith.constant 0 : index
    %10 = vector.load %arg8[%c0_6, %c0_7, %c0_8] : memref<1x32x192xbf16, #tpu.memory_space<vmem>>, vector<1x32x192xbf16>
    %11 = vector.shape_cast %10 : vector<1x32x192xbf16> to vector<32x192xbf16>
    %12 = vector.shape_cast %9 : vector<32x192xbf16> to vector<1x32x192xbf16>
    tpu.vector_store %arg8[%c0_6, %c0_7, %c0_8], %12 {strides = array<i32>} : memref<1x32x192xbf16, #tpu.memory_space<vmem>>, vector<1x32x192xbf16>,
    return
  }
  func.func @transform_0(%arg0: i32, %arg1: i32, %arg2: i32) -> (i32, i32, i32) {
    %c0_i32 = arith.constant 0 : i32
    %c0_i32_0 = arith.constant 0 : i32
    return %arg0, %arg1, %c0_i32 : i32, i32, i32
  }
  func.func @transform_1(%arg0: i32, %arg1: i32, %arg2: i32) -> (i32, i32, i32) {
    %c0_i32 = arith.constant 0 : i32
    %c0_i32_0 = arith.constant 0 : i32
    %c0_i32_1 = arith.constant 0 : i32
    return %arg0, %c0_i32, %c0_i32_0 : i32, i32, i32
  }
  func.func @transform_2(%arg0: i32, %arg1: i32, %arg2: i32) -> (i32, i32, i32) {
    %c0_i32 = arith.constant 0 : i32
    %c0_i32_0 = arith.constant 0 : i32
    %c0_i32_1 = arith.constant 0 : i32
    return %arg0, %c0_i32, %c0_i32_0 : i32, i32, i32
  }
  func.func @transform_3(%arg0: i32, %arg1: i32, %arg2: i32) -> (i32, i32) {
    %c0_i32 = arith.constant 0 : i32
    %c0_i32_0 = arith.constant 0 : i32
    return %c0_i32, %arg2 : i32, i32
  }
  func.func @transform_4(%arg0: i32, %arg1: i32, %arg2: i32) -> (i32, i32) {
    %c0_i32 = arith.constant 0 : i32
    %c0_i32_0 = arith.constant 0 : i32
    return %c0_i32, %arg2 : i32, i32
  }
  func.func @transform_5(%arg0: i32, %arg1: i32, %arg2: i32) -> (i32, i32, i32) {
    %c0_i32 = arith.constant 0 : i32
    return %arg0, %arg1, %arg2 : i32, i32, i32
  }
}

module attributes {stable_mosaic.version = 11 : i64} {
  func.func @_flash_attn_kernel(%arg0: i32, %arg1: i32, %arg2: i32, %arg3: memref<1x32x16xbf16, #tpu.memory_space<vmem>>, %arg4: memref<1x32x16xbf16, #tpu.memory_space<vmem>>, %arg5: memref<1x32x16xbf16, #tpu.memory_space<vmem>>, %arg6: memref<1x32x16xbf16, #tpu.memory_space<vmem>>, %arg7: memref<32x1xf32, #tpu.memory_space<vmem>>, %arg8: memref<32x1xf32, #tpu.memory_space<vmem>>, %arg9: memref<32x16xf32, #tpu.memory_space<vmem>>) attributes {dimension_semantics = [#tpu.dimension_semantics<parallel>, #tpu.dimension_semantics<parallel>, #tpu.dimension_semantics<arbitrary>], iteration_bounds = array<i64: 8, 1, 1>, scalar_prefetch = 0 : i64, scratch_operands = 3 : i64, tpu.core_type = #tpu.core_type<tc>, window_params = [{transform_indices = @transform_0, window_bounds = array<i64: 1, 32, 16>}, {transform_indices = @transform_1, window_bounds = array<i64: 1, 32, 16>}, {transform_indices = @transform_2, window_bounds = array<i64: 1, 32, 16>}, {transform_indices = @transform_3, window_bounds = array<i64: 1, 32, 16>}]} {
    %c0_i32 = arith.constant 0 : i32
    %0 = arith.cmpi eq, %arg2, %c0_i32 : i32
    %1 = arith.extui %0 : i1 to i32
    %c0_i32_0 = arith.constant 0 : i32
    %2 = arith.cmpi ne, %1, %c0_i32_0 : i32
    scf.if %2 {
      %cst_26 = arith.constant 0xFF800000 : f32
      %36 = vector.broadcast %cst_26 : f32 to vector<32x1xf32>
      %c0_27 = arith.constant 0 : index
      %c0_28 = arith.constant 0 : index
      %37 = vector.load %arg7[%c0_27, %c0_28] : memref<32x1xf32, #tpu.memory_space<vmem>>, vector<32x1xf32>
      tpu.vector_store %arg7[%c0_27, %c0_28], %36 {strides = array<i32>} : memref<32x1xf32, #tpu.memory_space<vmem>>, vector<32x1xf32>,
      %cst_29 = arith.constant 0.000000e+00 : f32
      %38 = vector.broadcast %cst_29 : f32 to vector<32x1xf32>
      %c0_30 = arith.constant 0 : index
      %c0_31 = arith.constant 0 : index
      %39 = vector.load %arg8[%c0_30, %c0_31] : memref<32x1xf32, #tpu.memory_space<vmem>>, vector<32x1xf32>
      tpu.vector_store %arg8[%c0_30, %c0_31], %38 {strides = array<i32>} : memref<32x1xf32, #tpu.memory_space<vmem>>, vector<32x1xf32>,
      %cst_32 = arith.constant 0.000000e+00 : f32
      %40 = vector.broadcast %cst_32 : f32 to vector<32x16xf32>
      %c0_33 = arith.constant 0 : index
      %c0_34 = arith.constant 0 : index
      %41 = vector.load %arg9[%c0_33, %c0_34] : memref<32x16xf32, #tpu.memory_space<vmem>>, vector<32x16xf32>
      tpu.vector_store %arg9[%c0_33, %c0_34], %40 {strides = array<i32>} : memref<32x16xf32, #tpu.memory_space<vmem>>, vector<32x16xf32>,
    } else {
    }
    %c0 = arith.constant 0 : index
    %c0_1 = arith.constant 0 : index
    %c0_2 = arith.constant 0 : index
    %3 = vector.load %arg3[%c0, %c0_1, %c0_2] : memref<1x32x16xbf16, #tpu.memory_space<vmem>>, vector<1x32x16xbf16>
    %4 = vector.shape_cast %3 : vector<1x32x16xbf16> to vector<32x16xbf16>
    %c0_3 = arith.constant 0 : index
    %c0_4 = arith.constant 0 : index
    %c0_5 = arith.constant 0 : index
    %5 = vector.load %arg4[%c0_3, %c0_4, %c0_5] : memref<1x32x16xbf16, #tpu.memory_space<vmem>>, vector<1x32x16xbf16>
    %6 = vector.shape_cast %5 : vector<1x32x16xbf16> to vector<32x16xbf16>
    %c0_6 = arith.constant 0 : index
    %c0_7 = arith.constant 0 : index
    %c0_8 = arith.constant 0 : index
    %7 = vector.load %arg5[%c0_6, %c0_7, %c0_8] : memref<1x32x16xbf16, #tpu.memory_space<vmem>>, vector<1x32x16xbf16>
    %8 = vector.shape_cast %7 : vector<1x32x16xbf16> to vector<32x16xbf16>
    %cst = arith.constant dense<0.000000e+00> : vector<32x32xf32>
    %9 = tpu.matmul %4, %6, %cst {dimension_numbers = #tpu.dot_dimension_numbers<[1], [1], [0], [0], [0, 0, 1, 0], [], []>} : vector<32x16xbf16>, vector<32x16xbf16>, vector<32x32xf32> -> vector<32x32xf32>
    %c0_9 = arith.constant 0 : index
    %c0_10 = arith.constant 0 : index
    %10 = vector.load %arg7[%c0_9, %c0_10] : memref<32x1xf32, #tpu.memory_space<vmem>>, vector<32x1xf32>
    %cst_11 = arith.constant dense<0xFF800000> : vector<32xf32>
    %11 = vector.multi_reduction <maximumf>, %9, %cst_11 [1] : vector<32x32xf32> to vector<32xf32>
    %12 = vector.shape_cast %11 : vector<32xf32> to vector<32x1xf32>
    %13 = arith.maximumf %10, %12 : vector<32x1xf32>
    %14 = arith.subf %10, %13 : vector<32x1xf32>
    %15 = math.exp %14 : vector<32x1xf32>
    %16 = vector.broadcast %13 : vector<32x1xf32> to vector<32x32xf32>
    %17 = arith.subf %9, %16 : vector<32x32xf32>
    %18 = math.exp %17 : vector<32x32xf32>
    %c0_12 = arith.constant 0 : index
    %c0_13 = arith.constant 0 : index
    %19 = vector.load %arg8[%c0_12, %c0_13] : memref<32x1xf32, #tpu.memory_space<vmem>>, vector<32x1xf32>
    %20 = arith.mulf %15, %19 : vector<32x1xf32>
    %cst_14 = arith.constant dense<0.000000e+00> : vector<32xf32>
    %21 = vector.multi_reduction <add>, %18, %cst_14 [1] : vector<32x32xf32> to vector<32xf32>
    %22 = vector.shape_cast %21 : vector<32xf32> to vector<32x1xf32>
    %23 = arith.addf %20, %22 : vector<32x1xf32>
    %c0_15 = arith.constant 0 : index
    %c0_16 = arith.constant 0 : index
    %24 = vector.load %arg8[%c0_15, %c0_16] : memref<32x1xf32, #tpu.memory_space<vmem>>, vector<32x1xf32>
    tpu.vector_store %arg8[%c0_15, %c0_16], %23 {strides = array<i32>} : memref<32x1xf32, #tpu.memory_space<vmem>>, vector<32x1xf32>,
    %c0_17 = arith.constant 0 : index
    %c0_18 = arith.constant 0 : index
    %25 = vector.load %arg9[%c0_17, %c0_18] : memref<32x16xf32, #tpu.memory_space<vmem>>, vector<32x16xf32>
    %26 = vector.broadcast %15 : vector<32x1xf32> to vector<32x16xf32>
    %27 = arith.mulf %26, %25 : vector<32x16xf32>
    %28 = arith.truncf %18 : vector<32x32xf32> to vector<32x32xbf16>
    %cst_19 = arith.constant dense<0.000000e+00> : vector<32x16xf32>
    %29 = tpu.matmul %28, %8, %cst_19 {dimension_numbers = #tpu.dot_dimension_numbers<[1], [0], [0], [1], [0, 0, 1, 1], [], []>} : vector<32x32xbf16>, vector<32x16xbf16>, vector<32x16xf32> -> vector<32x16xf32>
    %30 = arith.addf %27, %29 : vector<32x16xf32>
    %c0_20 = arith.constant 0 : index
    %c0_21 = arith.constant 0 : index
    %31 = vector.load %arg9[%c0_20, %c0_21] : memref<32x16xf32, #tpu.memory_space<vmem>>, vector<32x16xf32>
    tpu.vector_store %arg9[%c0_20, %c0_21], %30 {strides = array<i32>} : memref<32x16xf32, #tpu.memory_space<vmem>>, vector<32x16xf32>,
    %c0_22 = arith.constant 0 : index
    %c0_23 = arith.constant 0 : index
    %32 = vector.load %arg7[%c0_22, %c0_23] : memref<32x1xf32, #tpu.memory_space<vmem>>, vector<32x1xf32>
    tpu.vector_store %arg7[%c0_22, %c0_23], %13 {strides = array<i32>} : memref<32x1xf32, #tpu.memory_space<vmem>>, vector<32x1xf32>,
    %c0_i32_24 = arith.constant 0 : i32
    %33 = arith.cmpi eq, %arg2, %c0_i32_24 : i32
    %34 = arith.extui %33 : i1 to i32
    %c0_i32_25 = arith.constant 0 : i32
    %35 = arith.cmpi ne, %34, %c0_i32_25 : i32
    scf.if %35 {
      %c0_26 = arith.constant 0 : index
      %c0_27 = arith.constant 0 : index
      %36 = vector.load %arg8[%c0_26, %c0_27] : memref<32x1xf32, #tpu.memory_space<vmem>>, vector<32x1xf32>
      %37 = tpu.reciprocal %36 {approx = true} : vector<32x1xf32> -> vector<32x1xf32>
      %c0_28 = arith.constant 0 : index
      %c0_29 = arith.constant 0 : index
      %38 = vector.load %arg9[%c0_28, %c0_29] : memref<32x16xf32, #tpu.memory_space<vmem>>, vector<32x16xf32>
      %39 = vector.broadcast %37 : vector<32x1xf32> to vector<32x16xf32>
      %40 = arith.mulf %38, %39 : vector<32x16xf32>
      %41 = arith.truncf %40 : vector<32x16xf32> to vector<32x16xbf16>
      %c0_30 = arith.constant 0 : index
      %c0_31 = arith.constant 0 : index
      %c0_32 = arith.constant 0 : index
      %42 = vector.load %arg6[%c0_30, %c0_31, %c0_32] : memref<1x32x16xbf16, #tpu.memory_space<vmem>>, vector<1x32x16xbf16>
      %43 = vector.shape_cast %42 : vector<1x32x16xbf16> to vector<32x16xbf16>
      %44 = vector.shape_cast %41 : vector<32x16xbf16> to vector<1x32x16xbf16>
      tpu.vector_store %arg6[%c0_30, %c0_31, %c0_32], %44 {strides = array<i32>} : memref<1x32x16xbf16, #tpu.memory_space<vmem>>, vector<1x32x16xbf16>,
    } else {
    }
    return
  }
  func.func @transform_0(%arg0: i32, %arg1: i32, %arg2: i32) -> (i32, i32, i32) {
    %c0_i32 = arith.constant 0 : i32
    %c0_i32_0 = arith.constant 0 : i32
    return %arg0, %arg1, %c0_i32 : i32, i32, i32
  }
  func.func @transform_1(%arg0: i32, %arg1: i32, %arg2: i32) -> (i32, i32, i32) {
    %c0_i32 = arith.constant 0 : i32
    %c0_i32_0 = arith.constant 0 : i32
    return %arg0, %arg2, %c0_i32 : i32, i32, i32
  }
  func.func @transform_2(%arg0: i32, %arg1: i32, %arg2: i32) -> (i32, i32, i32) {
    %c0_i32 = arith.constant 0 : i32
    %c0_i32_0 = arith.constant 0 : i32
    return %arg0, %arg2, %c0_i32 : i32, i32, i32
  }
  func.func @transform_3(%arg0: i32, %arg1: i32, %arg2: i32) -> (i32, i32, i32) {
    %c0_i32 = arith.constant 0 : i32
    %c0_i32_0 = arith.constant 0 : i32
    return %arg0, %arg1, %c0_i32 : i32, i32, i32
  }
}

module attributes {stable_mosaic.version = 11 : i64} {
  func.func @_ln_mod_linear_kernel(%arg0: i32, %arg1: i32, %arg2: i32, %arg3: memref<1x32x64xf32, #tpu.memory_space<vmem>>, %arg4: memref<1x1x64xf32, #tpu.memory_space<vmem>>, %arg5: memref<1x1x64xf32, #tpu.memory_space<vmem>>, %arg6: memref<64x256xbf16, #tpu.memory_space<vmem>>, %arg7: memref<1x256xf32, #tpu.memory_space<vmem>>, %arg8: memref<1x32x256xbf16, #tpu.memory_space<vmem>>, %arg9: memref<32x64xbf16, #tpu.memory_space<vmem>>) attributes {dimension_semantics = [#tpu.dimension_semantics<parallel>, #tpu.dimension_semantics<parallel>, #tpu.dimension_semantics<arbitrary>], iteration_bounds = array<i64: 2, 1, 1>, scalar_prefetch = 0 : i64, scratch_operands = 1 : i64, tpu.core_type = #tpu.core_type<tc>, window_params = [{transform_indices = @transform_0, window_bounds = array<i64: 1, 32, 64>}, {transform_indices = @transform_1, window_bounds = array<i64: 1, 1, 64>}, {transform_indices = @transform_2, window_bounds = array<i64: 1, 1, 64>}, {transform_indices = @transform_3, window_bounds = array<i64: 64, 256>}, {transform_indices = @transform_4, window_bounds = array<i64: 1, 256>}, {transform_indices = @transform_5, window_bounds = array<i64: 1, 32, 256>}]} {
    %c0_i32 = arith.constant 0 : i32
    %0 = arith.cmpi eq, %arg2, %c0_i32 : i32
    %1 = arith.extui %0 : i1 to i32
    %c0_i32_0 = arith.constant 0 : i32
    %2 = arith.cmpi ne, %1, %c0_i32_0 : i32
    scf.if %2 {
      %c0_13 = arith.constant 0 : index
      %c0_14 = arith.constant 0 : index
      %c0_15 = arith.constant 0 : index
      %27 = vector.load %arg3[%c0_13, %c0_14, %c0_15] : memref<1x32x64xf32, #tpu.memory_space<vmem>>, vector<1x32x64xf32>
      %28 = vector.shape_cast %27 : vector<1x32x64xf32> to vector<32x64xf32>
      %cst_16 = arith.constant dense<0.000000e+00> : vector<32xf32>
      %29 = vector.multi_reduction <add>, %28, %cst_16 [1] : vector<32x64xf32> to vector<32xf32>
      %30 = vector.shape_cast %29 : vector<32xf32> to vector<32x1xf32>
      %cst_17 = arith.constant 6.400000e+01 : f32
      %31 = vector.broadcast %cst_17 : f32 to vector<32x1xf32>
      %32 = arith.divf %30, %31 : vector<32x1xf32>
      %33 = vector.broadcast %32 : vector<32x1xf32> to vector<32x64xf32>
      %34 = arith.subf %28, %33 : vector<32x64xf32>
      %35 = arith.mulf %34, %34 : vector<32x64xf32>
      %cst_18 = arith.constant dense<0.000000e+00> : vector<32xf32>
      %36 = vector.multi_reduction <add>, %35, %cst_18 [1] : vector<32x64xf32> to vector<32xf32>
      %37 = vector.shape_cast %36 : vector<32xf32> to vector<32x1xf32>
      %cst_19 = arith.constant 6.400000e+01 : f32
      %38 = vector.broadcast %cst_19 : f32 to vector<32x1xf32>
      %39 = arith.divf %37, %38 : vector<32x1xf32>
      %cst_20 = arith.constant 9.99999997E-7 : f32
      %40 = vector.broadcast %cst_20 : f32 to vector<32x1xf32>
      %41 = arith.addf %39, %40 : vector<32x1xf32>
      %42 = math.rsqrt %41 : vector<32x1xf32>
      %43 = vector.broadcast %42 : vector<32x1xf32> to vector<32x64xf32>
      %44 = arith.mulf %34, %43 : vector<32x64xf32>
      %c0_21 = arith.constant 0 : index
      %c0_22 = arith.constant 0 : index
      %c0_23 = arith.constant 0 : index
      %45 = vector.load %arg5[%c0_21, %c0_22, %c0_23] : memref<1x1x64xf32, #tpu.memory_space<vmem>>, vector<1x1x64xf32>
      %46 = vector.shape_cast %45 : vector<1x1x64xf32> to vector<1x64xf32>
      %cst_24 = arith.constant 1.000000e+00 : f32
      %47 = vector.broadcast %cst_24 : f32 to vector<1x64xf32>
      %48 = arith.addf %47, %46 : vector<1x64xf32>
      %49 = vector.broadcast %48 : vector<1x64xf32> to vector<32x64xf32>
      %50 = arith.mulf %44, %49 : vector<32x64xf32>
      %c0_25 = arith.constant 0 : index
      %c0_26 = arith.constant 0 : index
      %c0_27 = arith.constant 0 : index
      %51 = vector.load %arg4[%c0_25, %c0_26, %c0_27] : memref<1x1x64xf32, #tpu.memory_space<vmem>>, vector<1x1x64xf32>
      %52 = vector.shape_cast %51 : vector<1x1x64xf32> to vector<1x64xf32>
      %53 = vector.broadcast %52 : vector<1x64xf32> to vector<32x64xf32>
      %54 = arith.addf %50, %53 : vector<32x64xf32>
      %55 = arith.truncf %54 : vector<32x64xf32> to vector<32x64xbf16>
      %c0_28 = arith.constant 0 : index
      %c0_29 = arith.constant 0 : index
      %56 = vector.load %arg9[%c0_28, %c0_29] : memref<32x64xbf16, #tpu.memory_space<vmem>>, vector<32x64xbf16>
      tpu.vector_store %arg9[%c0_28, %c0_29], %55 {strides = array<i32>} : memref<32x64xbf16, #tpu.memory_space<vmem>>, vector<32x64xbf16>,
    } else {
    }
    %c0 = arith.constant 0 : index
    %c0_1 = arith.constant 0 : index
    %3 = vector.load %arg9[%c0, %c0_1] : memref<32x64xbf16, #tpu.memory_space<vmem>>, vector<32x64xbf16>
    %c0_2 = arith.constant 0 : index
    %c0_3 = arith.constant 0 : index
    %4 = vector.load %arg6[%c0_2, %c0_3] : memref<64x256xbf16, #tpu.memory_space<vmem>>, vector<64x256xbf16>
    %cst = arith.constant dense<0.000000e+00> : vector<32x256xf32>
    %5 = tpu.matmul %3, %4, %cst {dimension_numbers = #tpu.dot_dimension_numbers<[1], [0], [0], [1], [0, 0, 1, 1], [], []>} : vector<32x64xbf16>, vector<64x256xbf16>, vector<32x256xf32> -> vector<32x256xf32>
    %c0_4 = arith.constant 0 : index
    %c0_5 = arith.constant 0 : index
    %6 = vector.load %arg7[%c0_4, %c0_5] : memref<1x256xf32, #tpu.memory_space<vmem>>, vector<1x256xf32>
    %7 = vector.broadcast %6 : vector<1x256xf32> to vector<32x256xf32>
    %8 = arith.addf %5, %7 : vector<32x256xf32>
    %cst_6 = arith.constant 0.636619746 : f32
    %9 = math.sqrt %cst_6 : f32
    %cst_7 = arith.constant 5.000000e-01 : f32
    %10 = vector.broadcast %cst_7 : f32 to vector<32x256xf32>
    %11 = arith.mulf %10, %8 : vector<32x256xf32>
    %cst_8 = arith.constant 4.471500e-02 : f32
    %12 = vector.broadcast %cst_8 : f32 to vector<32x256xf32>
    %13 = arith.mulf %12, %8 : vector<32x256xf32>
    %14 = arith.mulf %13, %8 : vector<32x256xf32>
    %15 = arith.mulf %14, %8 : vector<32x256xf32>
    %16 = arith.addf %8, %15 : vector<32x256xf32>
    %17 = vector.broadcast %9 : f32 to vector<32x256xf32>
    %18 = arith.mulf %17, %16 : vector<32x256xf32>
    %19 = math.tanh %18 : vector<32x256xf32>
    %cst_9 = arith.constant 1.000000e+00 : f32
    %20 = vector.broadcast %cst_9 : f32 to vector<32x256xf32>
    %21 = arith.addf %20, %19 : vector<32x256xf32>
    %22 = arith.mulf %11, %21 : vector<32x256xf32>
    %23 = arith.truncf %22 : vector<32x256xf32> to vector<32x256xbf16>
    %c0_10 = arith.constant 0 : index
    %c0_11 = arith.constant 0 : index
    %c0_12 = arith.constant 0 : index
    %24 = vector.load %arg8[%c0_10, %c0_11, %c0_12] : memref<1x32x256xbf16, #tpu.memory_space<vmem>>, vector<1x32x256xbf16>
    %25 = vector.shape_cast %24 : vector<1x32x256xbf16> to vector<32x256xbf16>
    %26 = vector.shape_cast %23 : vector<32x256xbf16> to vector<1x32x256xbf16>
    tpu.vector_store %arg8[%c0_10, %c0_11, %c0_12], %26 {strides = array<i32>} : memref<1x32x256xbf16, #tpu.memory_space<vmem>>, vector<1x32x256xbf16>,
    return
  }
  func.func @transform_0(%arg0: i32, %arg1: i32, %arg2: i32) -> (i32, i32, i32) {
    %c0_i32 = arith.constant 0 : i32
    %c0_i32_0 = arith.constant 0 : i32
    return %arg0, %arg1, %c0_i32 : i32, i32, i32
  }
  func.func @transform_1(%arg0: i32, %arg1: i32, %arg2: i32) -> (i32, i32, i32) {
    %c0_i32 = arith.constant 0 : i32
    %c0_i32_0 = arith.constant 0 : i32
    %c0_i32_1 = arith.constant 0 : i32
    return %arg0, %c0_i32, %c0_i32_0 : i32, i32, i32
  }
  func.func @transform_2(%arg0: i32, %arg1: i32, %arg2: i32) -> (i32, i32, i32) {
    %c0_i32 = arith.constant 0 : i32
    %c0_i32_0 = arith.constant 0 : i32
    %c0_i32_1 = arith.constant 0 : i32
    return %arg0, %c0_i32, %c0_i32_0 : i32, i32, i32
  }
  func.func @transform_3(%arg0: i32, %arg1: i32, %arg2: i32) -> (i32, i32) {
    %c0_i32 = arith.constant 0 : i32
    %c0_i32_0 = arith.constant 0 : i32
    return %c0_i32, %arg2 : i32, i32
  }
  func.func @transform_4(%arg0: i32, %arg1: i32, %arg2: i32) -> (i32, i32) {
    %c0_i32 = arith.constant 0 : i32
    %c0_i32_0 = arith.constant 0 : i32
    return %c0_i32, %arg2 : i32, i32
  }
  func.func @transform_5(%arg0: i32, %arg1: i32, %arg2: i32) -> (i32, i32, i32) {
    %c0_i32 = arith.constant 0 : i32
    return %arg0, %arg1, %arg2 : i32, i32, i32
  }
}

module attributes {stable_mosaic.version = 11 : i64} {
  func.func @_linear_gate_res_kernel(%arg0: i32, %arg1: i32, %arg2: i32, %arg3: i32, %arg4: memref<1x32x64xbf16, #tpu.memory_space<vmem>>, %arg5: memref<64x64xbf16, #tpu.memory_space<vmem>>, %arg6: memref<1x64xf32, #tpu.memory_space<vmem>>, %arg7: memref<1x1x64xf32, #tpu.memory_space<vmem>>, %arg8: memref<1x32x64xf32, #tpu.memory_space<vmem>>, %arg9: memref<1x32x64xf32, #tpu.memory_space<vmem>>, %arg10: memref<32x64xf32, #tpu.memory_space<vmem>>) attributes {dimension_semantics = [#tpu.dimension_semantics<parallel>, #tpu.dimension_semantics<parallel>, #tpu.dimension_semantics<parallel>, #tpu.dimension_semantics<arbitrary>], iteration_bounds = array<i64: 2, 1, 1, 1>, scalar_prefetch = 0 : i64, scratch_operands = 1 : i64, tpu.core_type = #tpu.core_type<tc>, window_params = [{transform_indices = @transform_0, window_bounds = array<i64: 1, 32, 64>}, {transform_indices = @transform_1, window_bounds = array<i64: 64, 64>}, {transform_indices = @transform_2, window_bounds = array<i64: 1, 64>}, {transform_indices = @transform_3, window_bounds = array<i64: 1, 1, 64>}, {transform_indices = @transform_4, window_bounds = array<i64: 1, 32, 64>}, {transform_indices = @transform_5, window_bounds = array<i64: 1, 32, 64>}]} {
    %c0_i32 = arith.constant 0 : i32
    %0 = arith.cmpi eq, %arg3, %c0_i32 : i32
    %1 = arith.extui %0 : i1 to i32
    %c0_i32_0 = arith.constant 0 : i32
    %2 = arith.cmpi ne, %1, %c0_i32_0 : i32
    scf.if %2 {
      %cst_11 = arith.constant 0.000000e+00 : f32
      %13 = vector.broadcast %cst_11 : f32 to vector<32x64xf32>
      %c0_12 = arith.constant 0 : index
      %c0_13 = arith.constant 0 : index
      %14 = vector.load %arg10[%c0_12, %c0_13] : memref<32x64xf32, #tpu.memory_space<vmem>>, vector<32x64xf32>
      tpu.vector_store %arg10[%c0_12, %c0_13], %13 {strides = array<i32>} : memref<32x64xf32, #tpu.memory_space<vmem>>, vector<32x64xf32>,
    } else {
    }
    %c0 = arith.constant 0 : index
    %c0_1 = arith.constant 0 : index
    %c0_2 = arith.constant 0 : index
    %3 = vector.load %arg4[%c0, %c0_1, %c0_2] : memref<1x32x64xbf16, #tpu.memory_space<vmem>>, vector<1x32x64xbf16>
    %4 = vector.shape_cast %3 : vector<1x32x64xbf16> to vector<32x64xbf16>
    %c0_3 = arith.constant 0 : index
    %c0_4 = arith.constant 0 : index
    %5 = vector.load %arg10[%c0_3, %c0_4] : memref<32x64xf32, #tpu.memory_space<vmem>>, vector<32x64xf32>
    %c0_5 = arith.constant 0 : index
    %c0_6 = arith.constant 0 : index
    %6 = vector.load %arg5[%c0_5, %c0_6] : memref<64x64xbf16, #tpu.memory_space<vmem>>, vector<64x64xbf16>
    %cst = arith.constant dense<0.000000e+00> : vector<32x64xf32>
    %7 = tpu.matmul %4, %6, %cst {dimension_numbers = #tpu.dot_dimension_numbers<[1], [0], [0], [1], [0, 0, 1, 1], [], []>} : vector<32x64xbf16>, vector<64x64xbf16>, vector<32x64xf32> -> vector<32x64xf32>
    %8 = arith.addf %5, %7 : vector<32x64xf32>
    %c0_7 = arith.constant 0 : index
    %c0_8 = arith.constant 0 : index
    %9 = vector.load %arg10[%c0_7, %c0_8] : memref<32x64xf32, #tpu.memory_space<vmem>>, vector<32x64xf32>
    tpu.vector_store %arg10[%c0_7, %c0_8], %8 {strides = array<i32>} : memref<32x64xf32, #tpu.memory_space<vmem>>, vector<32x64xf32>,
    %c0_i32_9 = arith.constant 0 : i32
    %10 = arith.cmpi eq, %arg3, %c0_i32_9 : i32
    %11 = arith.extui %10 : i1 to i32
    %c0_i32_10 = arith.constant 0 : i32
    %12 = arith.cmpi ne, %11, %c0_i32_10 : i32
    scf.if %12 {
      %c0_11 = arith.constant 0 : index
      %c0_12 = arith.constant 0 : index
      %13 = vector.load %arg10[%c0_11, %c0_12] : memref<32x64xf32, #tpu.memory_space<vmem>>, vector<32x64xf32>
      %c0_13 = arith.constant 0 : index
      %c0_14 = arith.constant 0 : index
      %14 = vector.load %arg6[%c0_13, %c0_14] : memref<1x64xf32, #tpu.memory_space<vmem>>, vector<1x64xf32>
      %15 = vector.broadcast %14 : vector<1x64xf32> to vector<32x64xf32>
      %16 = arith.addf %13, %15 : vector<32x64xf32>
      %c0_15 = arith.constant 0 : index
      %c0_16 = arith.constant 0 : index
      %c0_17 = arith.constant 0 : index
      %17 = vector.load %arg8[%c0_15, %c0_16, %c0_17] : memref<1x32x64xf32, #tpu.memory_space<vmem>>, vector<1x32x64xf32>
      %18 = vector.shape_cast %17 : vector<1x32x64xf32> to vector<32x64xf32>
      %c0_18 = arith.constant 0 : index
      %c0_19 = arith.constant 0 : index
      %c0_20 = arith.constant 0 : index
      %19 = vector.load %arg7[%c0_18, %c0_19, %c0_20] : memref<1x1x64xf32, #tpu.memory_space<vmem>>, vector<1x1x64xf32>
      %20 = vector.shape_cast %19 : vector<1x1x64xf32> to vector<1x64xf32>
      %21 = vector.broadcast %20 : vector<1x64xf32> to vector<32x64xf32>
      %22 = arith.mulf %21, %16 : vector<32x64xf32>
      %23 = arith.addf %18, %22 : vector<32x64xf32>
      %c0_21 = arith.constant 0 : index
      %c0_22 = arith.constant 0 : index
      %c0_23 = arith.constant 0 : index
      %24 = vector.load %arg9[%c0_21, %c0_22, %c0_23] : memref<1x32x64xf32, #tpu.memory_space<vmem>>, vector<1x32x64xf32>
      %25 = vector.shape_cast %24 : vector<1x32x64xf32> to vector<32x64xf32>
      %26 = vector.shape_cast %23 : vector<32x64xf32> to vector<1x32x64xf32>
      tpu.vector_store %arg9[%c0_21, %c0_22, %c0_23], %26 {strides = array<i32>} : memref<1x32x64xf32, #tpu.memory_space<vmem>>, vector<1x32x64xf32>,
    } else {
    }
    return
  }
  func.func @transform_0(%arg0: i32, %arg1: i32, %arg2: i32, %arg3: i32) -> (i32, i32, i32) {
    %c0_i32 = arith.constant 0 : i32
    return %arg0, %arg1, %arg3 : i32, i32, i32
  }
  func.func @transform_1(%arg0: i32, %arg1: i32, %arg2: i32, %arg3: i32) -> (i32, i32) {
    %c0_i32 = arith.constant 0 : i32
    return %arg3, %arg2 : i32, i32
  }
  func.func @transform_2(%arg0: i32, %arg1: i32, %arg2: i32, %arg3: i32) -> (i32, i32) {
    %c0_i32 = arith.constant 0 : i32
    %c0_i32_0 = arith.constant 0 : i32
    return %c0_i32, %arg2 : i32, i32
  }
  func.func @transform_3(%arg0: i32, %arg1: i32, %arg2: i32, %arg3: i32) -> (i32, i32, i32) {
    %c0_i32 = arith.constant 0 : i32
    %c0_i32_0 = arith.constant 0 : i32
    return %arg0, %c0_i32, %arg2 : i32, i32, i32
  }
  func.func @transform_4(%arg0: i32, %arg1: i32, %arg2: i32, %arg3: i32) -> (i32, i32, i32) {
    %c0_i32 = arith.constant 0 : i32
    return %arg0, %arg1, %arg2 : i32, i32, i32
  }
  func.func @transform_5(%arg0: i32, %arg1: i32, %arg2: i32, %arg3: i32) -> (i32, i32, i32) {
    %c0_i32 = arith.constant 0 : i32
    return %arg0, %arg1, %arg2 : i32, i32, i32
  }
}

module attributes {stable_mosaic.version = 11 : i64} {
  func.func @_linear_gate_res_kernel(%arg0: i32, %arg1: i32, %arg2: i32, %arg3: i32, %arg4: memref<1x32x256xbf16, #tpu.memory_space<vmem>>, %arg5: memref<256x64xbf16, #tpu.memory_space<vmem>>, %arg6: memref<1x64xf32, #tpu.memory_space<vmem>>, %arg7: memref<1x1x64xf32, #tpu.memory_space<vmem>>, %arg8: memref<1x32x64xf32, #tpu.memory_space<vmem>>, %arg9: memref<1x32x64xf32, #tpu.memory_space<vmem>>, %arg10: memref<32x64xf32, #tpu.memory_space<vmem>>) attributes {dimension_semantics = [#tpu.dimension_semantics<parallel>, #tpu.dimension_semantics<parallel>, #tpu.dimension_semantics<parallel>, #tpu.dimension_semantics<arbitrary>], iteration_bounds = array<i64: 2, 1, 1, 1>, scalar_prefetch = 0 : i64, scratch_operands = 1 : i64, tpu.core_type = #tpu.core_type<tc>, window_params = [{transform_indices = @transform_0, window_bounds = array<i64: 1, 32, 256>}, {transform_indices = @transform_1, window_bounds = array<i64: 256, 64>}, {transform_indices = @transform_2, window_bounds = array<i64: 1, 64>}, {transform_indices = @transform_3, window_bounds = array<i64: 1, 1, 64>}, {transform_indices = @transform_4, window_bounds = array<i64: 1, 32, 64>}, {transform_indices = @transform_5, window_bounds = array<i64: 1, 32, 64>}]} {
    %c0_i32 = arith.constant 0 : i32
    %0 = arith.cmpi eq, %arg3, %c0_i32 : i32
    %1 = arith.extui %0 : i1 to i32
    %c0_i32_0 = arith.constant 0 : i32
    %2 = arith.cmpi ne, %1, %c0_i32_0 : i32
    scf.if %2 {
      %cst_11 = arith.constant 0.000000e+00 : f32
      %13 = vector.broadcast %cst_11 : f32 to vector<32x64xf32>
      %c0_12 = arith.constant 0 : index
      %c0_13 = arith.constant 0 : index
      %14 = vector.load %arg10[%c0_12, %c0_13] : memref<32x64xf32, #tpu.memory_space<vmem>>, vector<32x64xf32>
      tpu.vector_store %arg10[%c0_12, %c0_13], %13 {strides = array<i32>} : memref<32x64xf32, #tpu.memory_space<vmem>>, vector<32x64xf32>,
    } else {
    }
    %c0 = arith.constant 0 : index
    %c0_1 = arith.constant 0 : index
    %c0_2 = arith.constant 0 : index
    %3 = vector.load %arg4[%c0, %c0_1, %c0_2] : memref<1x32x256xbf16, #tpu.memory_space<vmem>>, vector<1x32x256xbf16>
    %4 = vector.shape_cast %3 : vector<1x32x256xbf16> to vector<32x256xbf16>
    %c0_3 = arith.constant 0 : index
    %c0_4 = arith.constant 0 : index
    %5 = vector.load %arg10[%c0_3, %c0_4] : memref<32x64xf32, #tpu.memory_space<vmem>>, vector<32x64xf32>
    %c0_5 = arith.constant 0 : index
    %c0_6 = arith.constant 0 : index
    %6 = vector.load %arg5[%c0_5, %c0_6] : memref<256x64xbf16, #tpu.memory_space<vmem>>, vector<256x64xbf16>
    %cst = arith.constant dense<0.000000e+00> : vector<32x64xf32>
    %7 = tpu.matmul %4, %6, %cst {dimension_numbers = #tpu.dot_dimension_numbers<[1], [0], [0], [1], [0, 0, 1, 1], [], []>} : vector<32x256xbf16>, vector<256x64xbf16>, vector<32x64xf32> -> vector<32x64xf32>
    %8 = arith.addf %5, %7 : vector<32x64xf32>
    %c0_7 = arith.constant 0 : index
    %c0_8 = arith.constant 0 : index
    %9 = vector.load %arg10[%c0_7, %c0_8] : memref<32x64xf32, #tpu.memory_space<vmem>>, vector<32x64xf32>
    tpu.vector_store %arg10[%c0_7, %c0_8], %8 {strides = array<i32>} : memref<32x64xf32, #tpu.memory_space<vmem>>, vector<32x64xf32>,
    %c0_i32_9 = arith.constant 0 : i32
    %10 = arith.cmpi eq, %arg3, %c0_i32_9 : i32
    %11 = arith.extui %10 : i1 to i32
    %c0_i32_10 = arith.constant 0 : i32
    %12 = arith.cmpi ne, %11, %c0_i32_10 : i32
    scf.if %12 {
      %c0_11 = arith.constant 0 : index
      %c0_12 = arith.constant 0 : index
      %13 = vector.load %arg10[%c0_11, %c0_12] : memref<32x64xf32, #tpu.memory_space<vmem>>, vector<32x64xf32>
      %c0_13 = arith.constant 0 : index
      %c0_14 = arith.constant 0 : index
      %14 = vector.load %arg6[%c0_13, %c0_14] : memref<1x64xf32, #tpu.memory_space<vmem>>, vector<1x64xf32>
      %15 = vector.broadcast %14 : vector<1x64xf32> to vector<32x64xf32>
      %16 = arith.addf %13, %15 : vector<32x64xf32>
      %c0_15 = arith.constant 0 : index
      %c0_16 = arith.constant 0 : index
      %c0_17 = arith.constant 0 : index
      %17 = vector.load %arg8[%c0_15, %c0_16, %c0_17] : memref<1x32x64xf32, #tpu.memory_space<vmem>>, vector<1x32x64xf32>
      %18 = vector.shape_cast %17 : vector<1x32x64xf32> to vector<32x64xf32>
      %c0_18 = arith.constant 0 : index
      %c0_19 = arith.constant 0 : index
      %c0_20 = arith.constant 0 : index
      %19 = vector.load %arg7[%c0_18, %c0_19, %c0_20] : memref<1x1x64xf32, #tpu.memory_space<vmem>>, vector<1x1x64xf32>
      %20 = vector.shape_cast %19 : vector<1x1x64xf32> to vector<1x64xf32>
      %21 = vector.broadcast %20 : vector<1x64xf32> to vector<32x64xf32>
      %22 = arith.mulf %21, %16 : vector<32x64xf32>
      %23 = arith.addf %18, %22 : vector<32x64xf32>
      %c0_21 = arith.constant 0 : index
      %c0_22 = arith.constant 0 : index
      %c0_23 = arith.constant 0 : index
      %24 = vector.load %arg9[%c0_21, %c0_22, %c0_23] : memref<1x32x64xf32, #tpu.memory_space<vmem>>, vector<1x32x64xf32>
      %25 = vector.shape_cast %24 : vector<1x32x64xf32> to vector<32x64xf32>
      %26 = vector.shape_cast %23 : vector<32x64xf32> to vector<1x32x64xf32>
      tpu.vector_store %arg9[%c0_21, %c0_22, %c0_23], %26 {strides = array<i32>} : memref<1x32x64xf32, #tpu.memory_space<vmem>>, vector<1x32x64xf32>,
    } else {
    }
    return
  }
  func.func @transform_0(%arg0: i32, %arg1: i32, %arg2: i32, %arg3: i32) -> (i32, i32, i32) {
    %c0_i32 = arith.constant 0 : i32
    return %arg0, %arg1, %arg3 : i32, i32, i32
  }
  func.func @transform_1(%arg0: i32, %arg1: i32, %arg2: i32, %arg3: i32) -> (i32, i32) {
    %c0_i32 = arith.constant 0 : i32
    return %arg3, %arg2 : i32, i32
  }
  func.func @transform_2(%arg0: i32, %arg1: i32, %arg2: i32, %arg3: i32) -> (i32, i32) {
    %c0_i32 = arith.constant 0 : i32
    %c0_i32_0 = arith.constant 0 : i32
    return %c0_i32, %arg2 : i32, i32
  }
  func.func @transform_3(%arg0: i32, %arg1: i32, %arg2: i32, %arg3: i32) -> (i32, i32, i32) {
    %c0_i32 = arith.constant 0 : i32
    %c0_i32_0 = arith.constant 0 : i32
    return %arg0, %c0_i32, %arg2 : i32, i32, i32
  }
  func.func @transform_4(%arg0: i32, %arg1: i32, %arg2: i32, %arg3: i32) -> (i32, i32, i32) {
    %c0_i32 = arith.constant 0 : i32
    return %arg0, %arg1, %arg2 : i32, i32, i32
  }
  func.func @transform_5(%arg0: i32, %arg1: i32, %arg2: i32, %arg3: i32) -> (i32, i32, i32) {
    %c0_i32 = arith.constant 0 : i32
    return %arg0, %arg1, %arg2 : i32, i32, i32
  }
}

module attributes {stable_mosaic.version = 11 : i64} {
  func.func @_level_mix_kernel(%arg0: i32, %arg1: i32, %arg2: memref<1x2x16x64xf32, #tpu.memory_space<vmem>>, %arg3: memref<2x5xf32, #tpu.memory_space<smem>>, %arg4: memref<5xf32, #tpu.memory_space<smem>>, %arg5: memref<1x5x16x64xf32, #tpu.memory_space<vmem>>) attributes {dimension_semantics = [#tpu.dimension_semantics<parallel>, #tpu.dimension_semantics<parallel>], iteration_bounds = array<i64: 2, 1>, scalar_prefetch = 0 : i64, scratch_operands = 0 : i64, tpu.core_type = #tpu.core_type<tc>, window_params = [{transform_indices = @transform_0, window_bounds = array<i64: 1, 2, 16, 64>}, {transform_indices = @transform_1, window_bounds = array<i64: 2, 5>}, {transform_indices = @transform_2, window_bounds = array<i64: 5>}, {transform_indices = @transform_3, window_bounds = array<i64: 1, 5, 16, 64>}]} {
    %c0 = arith.constant 0 : index
    %c0_0 = arith.constant 0 : index
    %c0_1 = arith.constant 0 : index
    %c0_2 = arith.constant 0 : index
    %0 = vector.load %arg2[%c0, %c0_0, %c0_1, %c0_2] : memref<1x2x16x64xf32, #tpu.memory_space<vmem>>, vector<1x1x16x64xf32>
    %1 = vector.shape_cast %0 : vector<1x1x16x64xf32> to vector<16x64xf32>
    %c0_3 = arith.constant 0 : index
    %c0_4 = arith.constant 0 : index
    %2 = memref.load %arg3[%c0_3, %c0_4] : memref<2x5xf32, #tpu.memory_space<smem>>
    %3 = vector.broadcast %2 : f32 to vector<16x64xf32>
    %4 = arith.mulf %1, %3 : vector<16x64xf32>
    %c0_5 = arith.constant 0 : index
    %c1 = arith.constant 1 : index
    %c0_6 = arith.constant 0 : index
    %c0_7 = arith.constant 0 : index
    %5 = vector.load %arg2[%c0_5, %c1, %c0_6, %c0_7] : memref<1x2x16x64xf32, #tpu.memory_space<vmem>>, vector<1x1x16x64xf32>
    %6 = vector.shape_cast %5 : vector<1x1x16x64xf32> to vector<16x64xf32>
    %c1_8 = arith.constant 1 : index
    %c0_9 = arith.constant 0 : index
    %7 = memref.load %arg3[%c1_8, %c0_9] : memref<2x5xf32, #tpu.memory_space<smem>>
    %8 = vector.broadcast %7 : f32 to vector<16x64xf32>
    %9 = arith.mulf %6, %8 : vector<16x64xf32>
    %10 = arith.addf %4, %9 : vector<16x64xf32>
    %c0_10 = arith.constant 0 : index
    %11 = memref.load %arg4[%c0_10] : memref<5xf32, #tpu.memory_space<smem>>
    %12 = vector.broadcast %11 : f32 to vector<16x64xf32>
    %13 = arith.addf %10, %12 : vector<16x64xf32>
    %c0_11 = arith.constant 0 : index
    %c0_12 = arith.constant 0 : index
    %c0_13 = arith.constant 0 : index
    %c0_14 = arith.constant 0 : index
    %14 = vector.load %arg5[%c0_11, %c0_12, %c0_13, %c0_14] : memref<1x5x16x64xf32, #tpu.memory_space<vmem>>, vector<1x1x16x64xf32>
    %15 = vector.shape_cast %14 : vector<1x1x16x64xf32> to vector<16x64xf32>
    %16 = vector.shape_cast %13 : vector<16x64xf32> to vector<1x1x16x64xf32>
    tpu.vector_store %arg5[%c0_11, %c0_12, %c0_13, %c0_14], %16 {strides = array<i32>} : memref<1x5x16x64xf32, #tpu.memory_space<vmem>>, vector<1x1x16x64xf32>,
    %c0_15 = arith.constant 0 : index
    %c0_16 = arith.constant 0 : index
    %c0_17 = arith.constant 0 : index
    %c0_18 = arith.constant 0 : index
    %17 = vector.load %arg2[%c0_15, %c0_16, %c0_17, %c0_18] : memref<1x2x16x64xf32, #tpu.memory_space<vmem>>, vector<1x1x16x64xf32>
    %18 = vector.shape_cast %17 : vector<1x1x16x64xf32> to vector<16x64xf32>
    %c0_19 = arith.constant 0 : index
    %c1_20 = arith.constant 1 : index
    %19 = memref.load %arg3[%c0_19, %c1_20] : memref<2x5xf32, #tpu.memory_space<smem>>
    %20 = vector.broadcast %19 : f32 to vector<16x64xf32>
    %21 = arith.mulf %18, %20 : vector<16x64xf32>
    %c0_21 = arith.constant 0 : index
    %c1_22 = arith.constant 1 : index
    %c0_23 = arith.constant 0 : index
    %c0_24 = arith.constant 0 : index
    %22 = vector.load %arg2[%c0_21, %c1_22, %c0_23, %c0_24] : memref<1x2x16x64xf32, #tpu.memory_space<vmem>>, vector<1x1x16x64xf32>
    %23 = vector.shape_cast %22 : vector<1x1x16x64xf32> to vector<16x64xf32>
    %c1_25 = arith.constant 1 : index
    %c1_26 = arith.constant 1 : index
    %24 = memref.load %arg3[%c1_25, %c1_26] : memref<2x5xf32, #tpu.memory_space<smem>>
    %25 = vector.broadcast %24 : f32 to vector<16x64xf32>
    %26 = arith.mulf %23, %25 : vector<16x64xf32>
    %27 = arith.addf %21, %26 : vector<16x64xf32>
    %c1_27 = arith.constant 1 : index
    %28 = memref.load %arg4[%c1_27] : memref<5xf32, #tpu.memory_space<smem>>
    %29 = vector.broadcast %28 : f32 to vector<16x64xf32>
    %30 = arith.addf %27, %29 : vector<16x64xf32>
    %c0_28 = arith.constant 0 : index
    %c1_29 = arith.constant 1 : index
    %c0_30 = arith.constant 0 : index
    %c0_31 = arith.constant 0 : index
    %31 = vector.load %arg5[%c0_28, %c1_29, %c0_30, %c0_31] : memref<1x5x16x64xf32, #tpu.memory_space<vmem>>, vector<1x1x16x64xf32>
    %32 = vector.shape_cast %31 : vector<1x1x16x64xf32> to vector<16x64xf32>
    %33 = vector.shape_cast %30 : vector<16x64xf32> to vector<1x1x16x64xf32>
    tpu.vector_store %arg5[%c0_28, %c1_29, %c0_30, %c0_31], %33 {strides = array<i32>} : memref<1x5x16x64xf32, #tpu.memory_space<vmem>>, vector<1x1x16x64xf32>,
    %c0_32 = arith.constant 0 : index
    %c0_33 = arith.constant 0 : index
    %c0_34 = arith.constant 0 : index
    %c0_35 = arith.constant 0 : index
    %34 = vector.load %arg2[%c0_32, %c0_33, %c0_34, %c0_35] : memref<1x2x16x64xf32, #tpu.memory_space<vmem>>, vector<1x1x16x64xf32>
    %35 = vector.shape_cast %34 : vector<1x1x16x64xf32> to vector<16x64xf32>
    %c0_36 = arith.constant 0 : index
    %c2 = arith.constant 2 : index
    %36 = memref.load %arg3[%c0_36, %c2] : memref<2x5xf32, #tpu.memory_space<smem>>
    %37 = vector.broadcast %36 : f32 to vector<16x64xf32>
    %38 = arith.mulf %35, %37 : vector<16x64xf32>
    %c0_37 = arith.constant 0 : index
    %c1_38 = arith.constant 1 : index
    %c0_39 = arith.constant 0 : index
    %c0_40 = arith.constant 0 : index
    %39 = vector.load %arg2[%c0_37, %c1_38, %c0_39, %c0_40] : memref<1x2x16x64xf32, #tpu.memory_space<vmem>>, vector<1x1x16x64xf32>
    %40 = vector.shape_cast %39 : vector<1x1x16x64xf32> to vector<16x64xf32>
    %c1_41 = arith.constant 1 : index
    %c2_42 = arith.constant 2 : index
    %41 = memref.load %arg3[%c1_41, %c2_42] : memref<2x5xf32, #tpu.memory_space<smem>>
    %42 = vector.broadcast %41 : f32 to vector<16x64xf32>
    %43 = arith.mulf %40, %42 : vector<16x64xf32>
    %44 = arith.addf %38, %43 : vector<16x64xf32>
    %c2_43 = arith.constant 2 : index
    %45 = memref.load %arg4[%c2_43] : memref<5xf32, #tpu.memory_space<smem>>
    %46 = vector.broadcast %45 : f32 to vector<16x64xf32>
    %47 = arith.addf %44, %46 : vector<16x64xf32>
    %c0_44 = arith.constant 0 : index
    %c2_45 = arith.constant 2 : index
    %c0_46 = arith.constant 0 : index
    %c0_47 = arith.constant 0 : index
    %48 = vector.load %arg5[%c0_44, %c2_45, %c0_46, %c0_47] : memref<1x5x16x64xf32, #tpu.memory_space<vmem>>, vector<1x1x16x64xf32>
    %49 = vector.shape_cast %48 : vector<1x1x16x64xf32> to vector<16x64xf32>
    %50 = vector.shape_cast %47 : vector<16x64xf32> to vector<1x1x16x64xf32>
    tpu.vector_store %arg5[%c0_44, %c2_45, %c0_46, %c0_47], %50 {strides = array<i32>} : memref<1x5x16x64xf32, #tpu.memory_space<vmem>>, vector<1x1x16x64xf32>,
    %c0_48 = arith.constant 0 : index
    %c0_49 = arith.constant 0 : index
    %c0_50 = arith.constant 0 : index
    %c0_51 = arith.constant 0 : index
    %51 = vector.load %arg2[%c0_48, %c0_49, %c0_50, %c0_51] : memref<1x2x16x64xf32, #tpu.memory_space<vmem>>, vector<1x1x16x64xf32>
    %52 = vector.shape_cast %51 : vector<1x1x16x64xf32> to vector<16x64xf32>
    %c0_52 = arith.constant 0 : index
    %c3 = arith.constant 3 : index
    %53 = memref.load %arg3[%c0_52, %c3] : memref<2x5xf32, #tpu.memory_space<smem>>
    %54 = vector.broadcast %53 : f32 to vector<16x64xf32>
    %55 = arith.mulf %52, %54 : vector<16x64xf32>
    %c0_53 = arith.constant 0 : index
    %c1_54 = arith.constant 1 : index
    %c0_55 = arith.constant 0 : index
    %c0_56 = arith.constant 0 : index
    %56 = vector.load %arg2[%c0_53, %c1_54, %c0_55, %c0_56] : memref<1x2x16x64xf32, #tpu.memory_space<vmem>>, vector<1x1x16x64xf32>
    %57 = vector.shape_cast %56 : vector<1x1x16x64xf32> to vector<16x64xf32>
    %c1_57 = arith.constant 1 : index
    %c3_58 = arith.constant 3 : index
    %58 = memref.load %arg3[%c1_57, %c3_58] : memref<2x5xf32, #tpu.memory_space<smem>>
    %59 = vector.broadcast %58 : f32 to vector<16x64xf32>
    %60 = arith.mulf %57, %59 : vector<16x64xf32>
    %61 = arith.addf %55, %60 : vector<16x64xf32>
    %c3_59 = arith.constant 3 : index
    %62 = memref.load %arg4[%c3_59] : memref<5xf32, #tpu.memory_space<smem>>
    %63 = vector.broadcast %62 : f32 to vector<16x64xf32>
    %64 = arith.addf %61, %63 : vector<16x64xf32>
    %c0_60 = arith.constant 0 : index
    %c3_61 = arith.constant 3 : index
    %c0_62 = arith.constant 0 : index
    %c0_63 = arith.constant 0 : index
    %65 = vector.load %arg5[%c0_60, %c3_61, %c0_62, %c0_63] : memref<1x5x16x64xf32, #tpu.memory_space<vmem>>, vector<1x1x16x64xf32>
    %66 = vector.shape_cast %65 : vector<1x1x16x64xf32> to vector<16x64xf32>
    %67 = vector.shape_cast %64 : vector<16x64xf32> to vector<1x1x16x64xf32>
    tpu.vector_store %arg5[%c0_60, %c3_61, %c0_62, %c0_63], %67 {strides = array<i32>} : memref<1x5x16x64xf32, #tpu.memory_space<vmem>>, vector<1x1x16x64xf32>,
    %c0_64 = arith.constant 0 : index
    %c0_65 = arith.constant 0 : index
    %c0_66 = arith.constant 0 : index
    %c0_67 = arith.constant 0 : index
    %68 = vector.load %arg2[%c0_64, %c0_65, %c0_66, %c0_67] : memref<1x2x16x64xf32, #tpu.memory_space<vmem>>, vector<1x1x16x64xf32>
    %69 = vector.shape_cast %68 : vector<1x1x16x64xf32> to vector<16x64xf32>
    %c0_68 = arith.constant 0 : index
    %c4 = arith.constant 4 : index
    %70 = memref.load %arg3[%c0_68, %c4] : memref<2x5xf32, #tpu.memory_space<smem>>
    %71 = vector.broadcast %70 : f32 to vector<16x64xf32>
    %72 = arith.mulf %69, %71 : vector<16x64xf32>
    %c0_69 = arith.constant 0 : index
    %c1_70 = arith.constant 1 : index
    %c0_71 = arith.constant 0 : index
    %c0_72 = arith.constant 0 : index
    %73 = vector.load %arg2[%c0_69, %c1_70, %c0_71, %c0_72] : memref<1x2x16x64xf32, #tpu.memory_space<vmem>>, vector<1x1x16x64xf32>
    %74 = vector.shape_cast %73 : vector<1x1x16x64xf32> to vector<16x64xf32>
    %c1_73 = arith.constant 1 : index
    %c4_74 = arith.constant 4 : index
    %75 = memref.load %arg3[%c1_73, %c4_74] : memref<2x5xf32, #tpu.memory_space<smem>>
    %76 = vector.broadcast %75 : f32 to vector<16x64xf32>
    %77 = arith.mulf %74, %76 : vector<16x64xf32>
    %78 = arith.addf %72, %77 : vector<16x64xf32>
    %c4_75 = arith.constant 4 : index
    %79 = memref.load %arg4[%c4_75] : memref<5xf32, #tpu.memory_space<smem>>
    %80 = vector.broadcast %79 : f32 to vector<16x64xf32>
    %81 = arith.addf %78, %80 : vector<16x64xf32>
    %c0_76 = arith.constant 0 : index
    %c4_77 = arith.constant 4 : index
    %c0_78 = arith.constant 0 : index
    %c0_79 = arith.constant 0 : index
    %82 = vector.load %arg5[%c0_76, %c4_77, %c0_78, %c0_79] : memref<1x5x16x64xf32, #tpu.memory_space<vmem>>, vector<1x1x16x64xf32>
    %83 = vector.shape_cast %82 : vector<1x1x16x64xf32> to vector<16x64xf32>
    %84 = vector.shape_cast %81 : vector<16x64xf32> to vector<1x1x16x64xf32>
    tpu.vector_store %arg5[%c0_76, %c4_77, %c0_78, %c0_79], %84 {strides = array<i32>} : memref<1x5x16x64xf32, #tpu.memory_space<vmem>>, vector<1x1x16x64xf32>,
    return
  }
  func.func @transform_0(%arg0: i32, %arg1: i32) -> (i32, i32, i32, i32) {
    %c0_i32 = arith.constant 0 : i32
    %c0_i32_0 = arith.constant 0 : i32
    %c0_i32_1 = arith.constant 0 : i32
    return %arg0, %c0_i32, %arg1, %c0_i32_0 : i32, i32, i32, i32
  }
  func.func @transform_1(%arg0: i32, %arg1: i32) -> (i32, i32) {
    %c0_i32 = arith.constant 0 : i32
    %c0_i32_0 = arith.constant 0 : i32
    %c0_i32_1 = arith.constant 0 : i32
    return %c0_i32, %c0_i32_0 : i32, i32
  }
  func.func @transform_2(%arg0: i32, %arg1: i32) -> i32 {
    %c0_i32 = arith.constant 0 : i32
    %c0_i32_0 = arith.constant 0 : i32
    return %c0_i32 : i32
  }
  func.func @transform_3(%arg0: i32, %arg1: i32) -> (i32, i32, i32, i32) {
    %c0_i32 = arith.constant 0 : i32
    %c0_i32_0 = arith.constant 0 : i32
    %c0_i32_1 = arith.constant 0 : i32
    return %arg0, %c0_i32, %arg1, %c0_i32_0 : i32, i32, i32, i32
  }
}

module attributes {stable_mosaic.version = 11 : i64} {
  func.func @_matmul_kernel(%arg0: i32, %arg1: i32, %arg2: i32, %arg3: memref<80x64xf32, #tpu.memory_space<vmem>>, %arg4: memref<64x48xbf16, #tpu.memory_space<vmem>>, %arg5: memref<1x48xf32, #tpu.memory_space<vmem>>, %arg6: memref<80x48xf32, #tpu.memory_space<vmem>>, %arg7: memref<80x48xf32, #tpu.memory_space<vmem>>) attributes {dimension_semantics = [#tpu.dimension_semantics<parallel>, #tpu.dimension_semantics<parallel>, #tpu.dimension_semantics<arbitrary>], iteration_bounds = array<i64: 2, 1, 1>, scalar_prefetch = 0 : i64, scratch_operands = 1 : i64, tpu.core_type = #tpu.core_type<tc>, window_params = [{transform_indices = @transform_0, window_bounds = array<i64: 80, 64>}, {transform_indices = @transform_1, window_bounds = array<i64: 64, 48>}, {transform_indices = @transform_2, window_bounds = array<i64: 1, 48>}, {transform_indices = @transform_3, window_bounds = array<i64: 80, 48>}]} {
    %c0_i32 = arith.constant 0 : i32
    %0 = arith.cmpi eq, %arg2, %c0_i32 : i32
    %1 = arith.extui %0 : i1 to i32
    %c0_i32_0 = arith.constant 0 : i32
    %2 = arith.cmpi ne, %1, %c0_i32_0 : i32
    scf.if %2 {
      %cst_10 = arith.constant 0.000000e+00 : f32
      %13 = vector.broadcast %cst_10 : f32 to vector<80x48xf32>
      %c0_11 = arith.constant 0 : index
      %c0_12 = arith.constant 0 : index
      %14 = vector.load %arg7[%c0_11, %c0_12] : memref<80x48xf32, #tpu.memory_space<vmem>>, vector<80x48xf32>
      tpu.vector_store %arg7[%c0_11, %c0_12], %13 {strides = array<i32>} : memref<80x48xf32, #tpu.memory_space<vmem>>, vector<80x48xf32>,
    } else {
    }
    %c0 = arith.constant 0 : index
    %c0_1 = arith.constant 0 : index
    %3 = vector.load %arg3[%c0, %c0_1] : memref<80x64xf32, #tpu.memory_space<vmem>>, vector<80x64xf32>
    %4 = arith.truncf %3 : vector<80x64xf32> to vector<80x64xbf16>
    %c0_2 = arith.constant 0 : index
    %c0_3 = arith.constant 0 : index
    %5 = vector.load %arg7[%c0_2, %c0_3] : memref<80x48xf32, #tpu.memory_space<vmem>>, vector<80x48xf32>
    %c0_4 = arith.constant 0 : index
    %c0_5 = arith.constant 0 : index
    %6 = vector.load %arg4[%c0_4, %c0_5] : memref<64x48xbf16, #tpu.memory_space<vmem>>, vector<64x48xbf16>
    %cst = arith.constant dense<0.000000e+00> : vector<80x48xf32>
    %7 = tpu.matmul %4, %6, %cst {dimension_numbers = #tpu.dot_dimension_numbers<[1], [0], [0], [1], [0, 0, 1, 1], [], []>} : vector<80x64xbf16>, vector<64x48xbf16>, vector<80x48xf32> -> vector<80x48xf32>
    %8 = arith.addf %5, %7 : vector<80x48xf32>
    %c0_6 = arith.constant 0 : index
    %c0_7 = arith.constant 0 : index
    %9 = vector.load %arg7[%c0_6, %c0_7] : memref<80x48xf32, #tpu.memory_space<vmem>>, vector<80x48xf32>
    tpu.vector_store %arg7[%c0_6, %c0_7], %8 {strides = array<i32>} : memref<80x48xf32, #tpu.memory_space<vmem>>, vector<80x48xf32>,
    %c0_i32_8 = arith.constant 0 : i32
    %10 = arith.cmpi eq, %arg2, %c0_i32_8 : i32
    %11 = arith.extui %10 : i1 to i32
    %c0_i32_9 = arith.constant 0 : i32
    %12 = arith.cmpi ne, %11, %c0_i32_9 : i32
    scf.if %12 {
      %c0_10 = arith.constant 0 : index
      %c0_11 = arith.constant 0 : index
      %13 = vector.load %arg7[%c0_10, %c0_11] : memref<80x48xf32, #tpu.memory_space<vmem>>, vector<80x48xf32>
      %c0_12 = arith.constant 0 : index
      %c0_13 = arith.constant 0 : index
      %14 = vector.load %arg5[%c0_12, %c0_13] : memref<1x48xf32, #tpu.memory_space<vmem>>, vector<1x48xf32>
      %15 = vector.broadcast %14 : vector<1x48xf32> to vector<80x48xf32>
      %16 = arith.addf %13, %15 : vector<80x48xf32>
      %c0_14 = arith.constant 0 : index
      %c0_15 = arith.constant 0 : index
      %17 = vector.load %arg6[%c0_14, %c0_15] : memref<80x48xf32, #tpu.memory_space<vmem>>, vector<80x48xf32>
      tpu.vector_store %arg6[%c0_14, %c0_15], %16 {strides = array<i32>} : memref<80x48xf32, #tpu.memory_space<vmem>>, vector<80x48xf32>,
    } else {
    }
    return
  }
  func.func @transform_0(%arg0: i32, %arg1: i32, %arg2: i32) -> (i32, i32) {
    %c0_i32 = arith.constant 0 : i32
    return %arg0, %arg2 : i32, i32
  }
  func.func @transform_1(%arg0: i32, %arg1: i32, %arg2: i32) -> (i32, i32) {
    %c0_i32 = arith.constant 0 : i32
    return %arg2, %arg1 : i32, i32
  }
  func.func @transform_2(%arg0: i32, %arg1: i32, %arg2: i32) -> (i32, i32) {
    %c0_i32 = arith.constant 0 : i32
    %c0_i32_0 = arith.constant 0 : i32
    return %c0_i32, %arg1 : i32, i32
  }
  func.func @transform_3(%arg0: i32, %arg1: i32, %arg2: i32) -> (i32, i32) {
    %c0_i32 = arith.constant 0 : i32
    return %arg0, %arg1 : i32, i32
  }
}

</mosaic_0001>

<bundles_post_ra>
// kernel: _lambda_.17
= control target key start
LH: loop header
LB: loop body
LE: loop exit
PB: predicated region body
PF: predicated region fallthrough
CT: control target
= control target key end

     0   :  { %8 = vsyncpa [#allocation3], 0  ;;  %s703_s0 = inlined_call_operand.vmem [shape: f32[2,5,16,64], index: 0, kind: input, shape index: {}]   ;;  %s704_s1 = inlined_call_operand.vmem [shape: f32[5,2], index: 1, kind: input, shape index: {}]   ;;  %s705_s2 = inlined_call_operand.vmem [shape: f32[2], index: 2, kind: input, shape index: {}]   ;;  %s706_s3 = inlined_call_operand.vmem [shape: f32[2,2,16,64], index: 3, kind: output, shape index: {}]  }
   0x1   :  { %9 = vsyncpa [#allocation5], 0  ;;  %s613_s12 = smov 0   ;;  %s615_s13 = smov 0  }
   0x2   :  { %s617_s14 = smov 0  }
   0x3 LB: > { %s440_s15 = sadd.s32 4294967295, %s589_s14   ;;  %s27_s16 = sadd.s32 1, %s585_s13  ;;  %s589_s14 = sphi %s617_s14, %s15_s14   ;;  %s585_s13 = sphi %s615_s13, %s709_s13   ;;  %s581_s12 = sphi %s613_s12, %s708_s12  }
   0x4   : > { %p29_p0 = scmp.ge.s32.totalorder %s27_s16, 2  ;;  %p442_p1 = scmp.ge.s32.totalorder %s589_s14, 1 }
   0x5   : > { %p130_p2 = scmp.lt.s32.totalorder %s589_s14, 3  ;;  %p634_p4 = scmp.eq.s32.totalorder %s440_s15, 0 }
   0x6   : > { %s711_s16 = smov (%p29_p0, %s27_s16), 0  ;;  %s142_s20 = sshll.u32 %s704_s1, 4  ;;  %s143_s20 = int_to_ptr.vmem [resolvable:$true] %s142_s20 }
   0x7   : > { %p131_p3 = pnand %p442_p1, %p130_p2  ;;  %s152_s23 = sshll.u32 %s705_s2, 4  ;;  %s153_s23 = int_to_ptr.vmem [resolvable:$true] %s152_s23 }
   0x8   : > { %s591_s24 = smov [#allocation2]   ;;  %s592_s25 = smov [#allocation4]  }
   0x9   : > { %p492_p5 = pneg %p131_p3 }
   0xa   : > { %178 = sbr.rel (%p131_p3) target bundleno = 48 (0x30), region = 32 }
   0xb   : > { %p493_p6 = pnand %p634_p4, %p492_p5 }
   0xd   : > { %495 = dma.vmem_to_smem (!%p493_p6), %s143_s20, 128, %s591_s24, [#allocation3]  }
   0xe   : > { %498 = dma.vmem_to_smem (!%p493_p6), %s153_s23, 16, %s592_s25, [#allocation5]  }
   0xf   : > { %572 = dma.done.wait (%p634_p4), [#allocation3], 128  }
  0x10   : > { %574 = vsyncadd (%p634_p4), [#allocation3], 4294967168 }
  0x11   : > { %576 = dma.done.wait (%p634_p4), [#allocation5], 16  }
  0x12   : > { %578 = vsyncadd (%p634_p4), [#allocation5], 4294967280 }
  0x13   : > { %190 = sfence }
  0x14   : > { %p218_p7 = scmp.lt.s32.totalorder %s581_s12, 1  ;;  %s239_s26 = sld [smem:[#allocation2]]  ;;  %vm283_vm0 = vcmask 523264  }
  0x15   : > { %s454_s27 = sld [smem:[#allocation2 + $0x80]] }
  0x16   : > { %s713_s12 = smov (!%p218_p7, %s581_s12), 1  ;;  %s457_s28 = sld [smem:[#allocation2 + $0x100]] }
  0x17   : > { %s483_s29 = smul.u32 80, %s713_s12  ;;  %s659_s30 = sld [smem:[#allocation2 + $0x180]] }
  0x18   : > { %s664_s7 = sld [smem:[#allocation2 + $0x200]]  ;;  %s482_s18 = sshll.u32 %s713_s12, 5 }
  0x19   : > { %s225_s6 = scalar_lea.vmem %s703_s0, %s483_s29  ;;  %s666_s8 = sld [smem:[#allocation4]] }
  0x1a   : > { %v240_v0 = vstv %s239_s26  ;;  %v237_v1 = vld [vmem:[%s225_s6] sm:$0xff]  ;;  %v452_v2 = vld [vmem:[%s225_s6 + $0x10] sm:$0xff]  ;;  %v238_v7 = vld [vmem:[%s225_s6 + $0x8] sm:$0xff]  ;;  %s668_s9 = sld [smem:[#allocation2 + $0x1]]  ;;  %s235_s12 = scalar_lea.vmem %s706_s3, %s482_s18 }
  0x1b   : > { %v247_v3 = vstv %s454_s27  ;;  %v455_v4 = vld [vmem:[%s225_s6 + $0x20] sm:$0xff]  ;;  %v241_v5 = vmul.f32 %v240_v0, %v237_v1  ;;  %v458_v9 = vld [vmem:[%s225_s6 + $0x30] sm:$0xff]  ;;  %v242_v10 = vmul.f32 %v240_v0, %v238_v7  ;;  %v453_v11 = vld [vmem:[%s225_s6 + $0x18] sm:$0xff]  ;;  %s670_s10 = sld [smem:[#allocation2 + $0x81]] }
  0x1c   : > { %v248_v6 = vmul.f32 %v452_v2, %v247_v3  ;;  %v256_v8 = vstv %s457_s28  ;;  %v456_v12 = vld [vmem:[%s225_s6 + $0x28] sm:$0xff]  ;;  %v461_v15 = vld [vmem:[%s225_s6 + $0x40] sm:$0xff]  ;;  %v249_v16 = vmul.f32 %v453_v11, %v247_v3  ;;  %v459_v18 = vld [vmem:[%s225_s6 + $0x38] sm:$0xff]  ;;  %s470_s11 = sld [smem:[#allocation2 + $0x101]] }
  0x1d   : > { %v257_v14 = vmul.f32 %v455_v4, %v256_v8  ;;  %v258_v17 = vmul.f32 %v456_v12, %v256_v8  ;;  %v265_v19 = vstv %s659_s30  ;;  %v462_v20 = vld [vmem:[%s225_s6 + $0x48] sm:$0xff]  ;;  %s673_s15 = sld [smem:[#allocation2 + $0x181]] }
  0x1e   : > { %v250_v13 = vadd.f32 %v248_v6, %v241_v5  ;;  %v266_v22 = vmul.f32 %v458_v9, %v265_v19  ;;  %v274_v23 = vstv %s664_s7  ;;  %v251_v24 = vadd.f32 %v249_v16, %v242_v10  ;;  %s676_s17 = sld [smem:[#allocation2 + $0x201]] }
  0x1f   : > { %v275_v25 = vmul.f32 %v461_v15, %v274_v23  ;;  %v267_v26 = vmul.f32 %v459_v18, %v265_v19  ;;  %v276_v29 = vmul.f32 %v462_v20, %v274_v23  ;;  %v280_v31 = vstv %s666_s8  ;;  %s682_s19 = sld [smem:[#allocation4 + $0x1]] }
  0x20   : > { %v259_v21 = vadd.f32 %v257_v14, %v250_v13  ;;  %v260_v28 = vadd.f32 %v258_v17, %v251_v24  ;;  %v289_v30 = vstv %s668_s9 }
  0x21   : > { %v290_v32 = vmul.f32 %v289_v30, %v237_v1  ;;  %v295_v33 = vstv %s670_s10  ;;  %v291_v34 = vmul.f32 %v289_v30, %v238_v7 }
  0x22   : > { %v268_v27 = vadd.f32 %v266_v22, %v259_v21  ;;  %v269_v36 = vadd.f32 %v267_v26, %v260_v28  ;;  %v296_v37 = vmul.f32 %v452_v2, %v295_v33  ;;  %v303_v38 = vstv %s470_s11 }
  0x23   : > { %v304_v39 = vmul.f32 %v455_v4, %v303_v38  ;;  %v311_v40 = vstv %s673_s15  ;;  %v297_v41 = vmul.f32 %v453_v11, %v295_v33  ;;  %v305_v42 = vmul.f32 %v456_v12, %v303_v38 }
  0x24   : > { %v277_v35 = vadd.f32 %v275_v25, %v268_v27  ;;  %v278_v44 = vadd.f32 %v276_v29, %v269_v36  ;;  %v298_v45 = vadd.f32 %v296_v37, %v290_v32  ;;  %v312_v46 = vmul.f32 %v458_v9, %v311_v40 }
  0x25   : > { %v319_v47 = vstv %s676_s17  ;;  %v299_v48 = vadd.f32 %v297_v41, %v291_v34  ;;  %v313_v49 = vmul.f32 %v459_v18, %v311_v40  ;;  %v325_v56 = vstv %s682_s19 }
  0x26   : > { %v281_v43 = vadd.f32 %v280_v31, %v277_v35  ;;  %v282_v50 = vadd.f32 %v280_v31, %v278_v44  ;;  %v306_v51 = vadd.f32 %v304_v39, %v298_v45  ;;  %v320_v52 = vmul.f32 %v461_v15, %v319_v47 }
  0x27   : > { %v307_v53 = vadd.f32 %v305_v42, %v299_v48  ;;  %v321_v54 = vmul.f32 %v462_v20, %v319_v47 }
  0x28   : > { %284 = vst.msk [vmem:[%s235_s12] sm:$0xff] %vm283_vm0, %v281_v43  ;;  %v314_v55 = vadd.f32 %v312_v46, %v306_v51 }
  0x29   : > { %285 = vst.msk [vmem:[%s235_s12 + $0x8] sm:$0xff] %vm283_vm0, %v282_v50  ;;  %v315_v57 = vadd.f32 %v313_v49, %v307_v53 }
  0x2a   : > { %v322_v58 = vadd.f32 %v320_v52, %v314_v55 }
  0x2b   : > { %v323_v59 = vadd.f32 %v321_v54, %v315_v57 }
  0x2c   : > { %v326_v60 = vadd.f32 %v325_v56, %v322_v58 }
  0x2d   : > { %v327_v61 = vadd.f32 %v325_v56, %v323_v59 }
  0x2e   : > { %478 = vst.msk [vmem:[%s235_s12 + $0x10] sm:$0xff] %vm283_vm0, %v326_v60 }
  0x2f   : > { %479 = vst.msk [vmem:[%s235_s12 + $0x18] sm:$0xff] %vm283_vm0, %v327_v61 }
  0x30 PF: > { %s15_s14 = sadd.s32 1, %s589_s14   ;;  %s708_s12 = smov %s585_s13 }
  0x31   : > { %p12_p8 = scmp.ge.s32.totalorder %s15_s14, 4   ;;  %s709_s13 = smov %s711_s16 }
  0x33   :  { %14 = sbr.rel (!%p12_p8) target bundleno = 3 (0x3), region = 76 }
  0x38   :  { %361 = vsyncpa [#allocation3], 1 }
  0x39   :  { %363 = vsyncpa [#allocation3 + $0x1], 1 }
  0x3a   :  { %364 = vsyncpa [#allocation5], 1 }

// kernel: _lambda_.16
= control target key start
LH: loop header
LB: loop body
LE: loop exit
PB: predicated region body
PF: predicated region fallthrough
CT: control target
= control target key end

     0   :  { %s654_s12 = smov 0   ;;  %s656_s13 = smov 0   ;;  %s753_s0 = inlined_call_operand.vmem [shape: f32[160,48], index: 0, kind: input, shape index: {}]   ;;  %s754_s1 = inlined_call_operand.vmem [shape: bf16[48,64], index: 1, kind: input, shape index: {}]   ;;  %s755_s2 = inlined_call_operand.vmem [shape: f32[1,64], index: 2, kind: input, shape index: {}]   ;;  %s756_s3 = inlined_call_operand.vmem [shape: f32[160,64], index: 3, kind: output, shape index: {}]  }
   0x1   :  { %s658_s14 = smov 0  }
   0x2 LB: > { %s32_s15 = sadd.s32 1, %s627_s13  ;;  %p549_p0 = scmp.ge.s32.totalorder %s631_s14, 1  ;;  %s631_s14 = sphi %s658_s14, %s13_s14   ;;  %s627_s13 = sphi %s656_s13, %s758_s13   ;;  %s623_s12 = sphi %s654_s12, %s757_s12  }
   0x3   : > { %p34_p1 = scmp.ge.s32.totalorder %s32_s15, 2  ;;  %p188_p2 = scmp.lt.s32.totalorder %s631_s14, 3 }
   0x5   : > { %s760_s15 = smov (%p34_p1, %s32_s15), 0  ;;  %p189_p3 = pnand %p549_p0, %p188_p2 }
   0x6   : > { %s229_s18 = smul.u32 (!%p189_p3), 10, %s623_s12 }
   0x7   : > { %192 = sbr.rel (%p189_p3) target bundleno = 193 (0xc1), region = 32 }
   0x8   : > { %p230_p4 = scmp.lt.s32.totalorder (!%p189_p3), %s229_s18, 19 }
   0xc   : > { %v573_v0 = vld [vmem:[%s754_s1 + $0x10] sm:$0xff]  ;;  %vm264_vm0 = vcmask 523264   ;;  %v572_v1 = vld [vmem:[%s754_s1 + $0x8] sm:$0xff]  ;;  %v633_v2 = vmov 0.0   ;;  %s762_s18 = smov (!%p230_p4, %s229_s18), 19  ;;  %v571_v3 = vld [vmem:[%s754_s1] sm:$0xff] }
   0xd   : > { %575 = vmatpush.bf16.msra.mxu2 %v573_v0  ;;  %576 = vmatpush.bf16.msra.mxu3 %v573_v0  ;;  %269 = vst.msk [vmem:[#allocation2 + $0x20] sm:$0xff] %vm264_vm0, %v633_v2  ;;  %s550_s23 = sshll.u32 %s762_s18, 3  ;;  %vm324_vm1 = vcmask 392192   ;;  %v608_v35 = vld [vmem:[%s755_s2] ss:$0 sm:$0xff] }
   0xe   : > { %345 = vmatpush.bf16.msra.mxu0 %v573_v0  ;;  %574 = vmatpush.bf16.msra.mxu1 %v573_v0  ;;  %265 = vst.msk [vmem:[#allocation2] sm:$0xff] %vm264_vm0, %v633_v2  ;;  %s236_s26 = scalar_lea.vmem %s753_s0, %s550_s23  ;;  %s717_s4 = scalar_lea.vmem %s756_s3, %s550_s23 }
   0xf   : > { %266 = vst.msk [vmem:[#allocation2 + $0x8] sm:$0xff] %vm264_vm0, %v633_v2  ;;  %v279_v4 = vld [vmem:[%s236_s26 + $0x20] sm:$0xff]  ;;  %v280_v5 = vld [vmem:[%s236_s26 + $0x28] sm:$0xff]  ;;  %v277_v13 = vld [vmem:[%s236_s26 + $0x10] sm:$0xff] }
  0x10   : > { %267 = vst.msk [vmem:[#allocation2 + $0x10] sm:$0xff] %vm264_vm0, %v633_v2  ;;  %v283_v6 = vld [vmem:[%s236_s26 + $0x40] sm:$0xff]  ;;  %v287_v7 = vpack.c.bf16 %v280_v5, %v279_v4  ;;  %v284_v8 = vld [vmem:[%s236_s26 + $0x48] sm:$0xff]  ;;  %v278_v14 = vld [vmem:[%s236_s26 + $0x18] sm:$0xff] }
  0x11   : > { %578 = vmatpush.bf16.msra.mxu2 %v572_v1  ;;  %579 = vmatpush.bf16.msra.mxu3 %v572_v1  ;;  %268 = vst.msk [vmem:[#allocation2 + $0x18] sm:$0xff] %vm264_vm0, %v633_v2  ;;  %v275_v9 = vld [vmem:[%s236_s26] sm:$0xff]  ;;  %v276_v10 = vld [vmem:[%s236_s26 + $0x8] sm:$0xff]  ;;  %v289_v11 = vpack.c.bf16 %v284_v8, %v283_v6  ;;  %v286_v15 = vpack.c.bf16 %v278_v14, %v277_v13  ;;  %v281_v16 = vld [vmem:[%s236_s26 + $0x30] sm:$0xff] }
  0x12   : > { %346 = vmatpush.bf16.msra.mxu0 %v572_v1  ;;  %577 = vmatpush.bf16.msra.mxu1 %v572_v1  ;;  %270 = vst.msk [vmem:[#allocation2 + $0x28] sm:$0xff] %vm264_vm0, %v633_v2  ;;  %v285_v12 = vpack.c.bf16 %v276_v10, %v275_v9  ;;  %v282_v17 = vld [vmem:[%s236_s26 + $0x38] sm:$0xff] }
  0x13   : > { %271 = vst.msk [vmem:[#allocation2 + $0x30] sm:$0xff] %vm264_vm0, %v633_v2  ;;  %v288_v18 = vpack.c.bf16 %v282_v17, %v281_v16 }
  0x14   : > { %272 = vst.msk [vmem:[#allocation2 + $0x38] sm:$0xff] %vm264_vm0, %v633_v2  ;;  %v294_v25 = vld [vmem:[#allocation2 + $0x20] sm:$0xff] }
  0x15   : > { %581 = vmatpush.bf16.msra.mxu2 %v571_v3  ;;  %582 = vmatpush.bf16.msra.mxu3 %v571_v3  ;;  %273 = vst.msk [vmem:[#allocation2 + $0x40] sm:$0xff] %vm264_vm0, %v633_v2  ;;  %v290_v19 = vld [vmem:[#allocation2] sm:$0xff] }
  0x16   : > { %347 = vmatpush.bf16.msra.mxu0 %v571_v3  ;;  %580 = vmatpush.bf16.msra.mxu1 %v571_v3  ;;  %274 = vst.msk [vmem:[#allocation2 + $0x48] sm:$0xff] %vm264_vm0, %v633_v2  ;;  %v291_v31 = vld [vmem:[#allocation2 + $0x8] sm:$0xff] }
  0x17   : > { %v292_v20 = vld [vmem:[#allocation2 + $0x10] sm:$0xff] }
  0x18   : > { %566 = vmatmul.msk.bf16.vlgmr.msra.gmra.mxu2 %vm324_vm1, %v287_v7  ;;  %568 = vmatmul.msk.bf16.vlgmr.msra.gmra.mxu3 %vm324_vm1, %v289_v11  ;;  %v293_v32 = vld [vmem:[#allocation2 + $0x18] sm:$0xff] }
  0x19   : > { %564 = vmatmul.msk.bf16.vlgmr.msra.gmra.mxu0 %vm324_vm1, %v285_v12  ;;  %565 = vmatmul.msk.bf16.vlgmr.msra.gmra.mxu1 %vm324_vm1, %v286_v15  ;;  %v295_v41 = vld [vmem:[#allocation2 + $0x28] sm:$0xff] }
  0x1a   : > { %v296_v55 = vld [vmem:[#allocation2 + $0x30] sm:$0xff] }
  0x1b   : > { %v297_v63 = vld [vmem:[#allocation2 + $0x38] sm:$0xff] }
  0x1c   : > { %v298_v26 = vld [vmem:[#allocation2 + $0x40] sm:$0xff] }
  0x1d   : > { %v299_v42 = vld [vmem:[#allocation2 + $0x48] sm:$0xff] }
  0x28   : > { %567 = vmatmul.msk.bf16.gmra.mxu2 %vm324_vm1, %v288_v18 }
  0x96   : > { %v349_v21 = vpop.f32.mrf.mxu0  ;;  %v354_v22 = vpop.f32.mrf.mxu1 }
  0x97   : > { %v374_v23 = vadd.f32 %v349_v21, %v290_v19  ;;  %v376_v24 = vadd.f32 %v354_v22, %v292_v20 }
  0x99   : > { %385 = vst.msk [vmem:[#allocation2] sm:$0xff] %vm264_vm0, %v374_v23 }
  0x9a   : > { %387 = vst.msk [vmem:[#allocation2 + $0x10] sm:$0xff] %vm264_vm0, %v376_v24 }
  0x9b   : > { %v359_v27 = vpop.f32.mrf.mxu2  ;;  %v369_v28 = vpop.f32.mrf.mxu3 }
  0x9c   : > { %v378_v29 = vadd.f32 %v359_v27, %v294_v25  ;;  %v382_v30 = vadd.f32 %v369_v28, %v298_v26 }
  0x9e   : > { %389 = vst.msk [vmem:[#allocation2 + $0x20] sm:$0xff] %vm264_vm0, %v378_v29  ;;  %v351_v33 = vpop.f32.mrf.mxu0  ;;  %v356_v34 = vpop.f32.mrf.mxu1 }
  0x9f   : > { %393 = vst.msk [vmem:[#allocation2 + $0x40] sm:$0xff] %vm264_vm0, %v382_v30  ;;  %v375_v36 = vadd.f32 %v351_v33, %v291_v31  ;;  %v377_v37 = vadd.f32 %v356_v34, %v293_v32 }
  0xa0   : > { %v398_v38 = vld [vmem:[#allocation2] sm:$0xff] }
  0xa1   : > { %v412_v39 = vadd.f32 %v608_v35, %v398_v38  ;;  %v400_v40 = vld [vmem:[#allocation2 + $0x10] sm:$0xff]  ;;  %386 = vst.msk [vmem:[#allocation2 + $0x8] sm:$0xff] %vm264_vm0, %v375_v36 }
  0xa2   : > { %v414_v43 = vadd.f32 %v608_v35, %v400_v40  ;;  %388 = vst.msk [vmem:[#allocation2 + $0x18] sm:$0xff] %vm264_vm0, %v377_v37 }
  0xa3   : > { %422 = vst.msk [vmem:[%s717_s4] sm:$0xff] %vm264_vm0, %v412_v39  ;;  %v361_v44 = vpop.f32.mrf.mxu2  ;;  %v371_v45 = vpop.f32.mrf.mxu3 }
  0xa4   : > { %424 = vst.msk [vmem:[%s717_s4 + $0x10] sm:$0xff] %vm264_vm0, %v414_v43  ;;  %v379_v46 = vadd.f32 %v361_v44, %v295_v41  ;;  %v383_v47 = vadd.f32 %v371_v45, %v299_v42 }
  0xa5   : > { %v402_v48 = vld [vmem:[#allocation2 + $0x20] sm:$0xff] }
  0xa6   : > { %v416_v49 = vadd.f32 %v608_v35, %v402_v48  ;;  %390 = vst.msk [vmem:[#allocation2 + $0x28] sm:$0xff] %vm264_vm0, %v379_v46  ;;  %v406_v50 = vld [vmem:[#allocation2 + $0x40] sm:$0xff] }
  0xa7   : > { %v420_v51 = vadd.f32 %v608_v35, %v406_v50  ;;  %394 = vst.msk [vmem:[#allocation2 + $0x48] sm:$0xff] %vm264_vm0, %v383_v47 }
  0xa8   : > { %426 = vst.msk [vmem:[%s717_s4 + $0x20] sm:$0xff] %vm264_vm0, %v416_v49  ;;  %v399_v52 = vld [vmem:[#allocation2 + $0x8] sm:$0xff] }
  0xa9   : > { %430 = vst.msk [vmem:[%s717_s4 + $0x40] sm:$0xff] %vm264_vm0, %v420_v51  ;;  %v413_v53 = vadd.f32 %v608_v35, %v399_v52  ;;  %v401_v54 = vld [vmem:[#allocation2 + $0x18] sm:$0xff] }
  0xaa   : > { %v415_v56 = vadd.f32 %v608_v35, %v401_v54 }
  0xab   : > { %423 = vst.msk [vmem:[%s717_s4 + $0x8] sm:$0xff] %vm264_vm0, %v413_v53  ;;  %v364_v57 = vpop.f32.mrf.mxu2 }
  0xac   : > { %425 = vst.msk [vmem:[%s717_s4 + $0x18] sm:$0xff] %vm264_vm0, %v415_v56  ;;  %v380_v58 = vadd.f32 %v364_v57, %v296_v55 }
  0xad   : > { %v403_v59 = vld [vmem:[#allocation2 + $0x28] sm:$0xff] }
  0xae   : > { %v417_v60 = vadd.f32 %v608_v35, %v403_v59  ;;  %391 = vst.msk [vmem:[#allocation2 + $0x30] sm:$0xff] %vm264_vm0, %v380_v58  ;;  %v407_v61 = vld [vmem:[#allocation2 + $0x48] sm:$0xff] }
  0xaf   : > { %v421_v62 = vadd.f32 %v608_v35, %v407_v61 }
  0xb0   : > { %427 = vst.msk [vmem:[%s717_s4 + $0x28] sm:$0xff] %vm264_vm0, %v417_v60 }
  0xb1   : > { %431 = vst.msk [vmem:[%s717_s4 + $0x48] sm:$0xff] %vm264_vm0, %v421_v62 }
  0xb3   : > { %v366_v0 = vpop.f32.mrf.mxu2 }
  0xb4   : > { %v381_v1 = vadd.f32 %v366_v0, %v297_v63 }
  0xb5   : > { %v404_v2 = vld [vmem:[#allocation2 + $0x30] sm:$0xff] }
  0xb6   : > { %v418_v3 = vadd.f32 %v608_v35, %v404_v2  ;;  %392 = vst.msk [vmem:[#allocation2 + $0x38] sm:$0xff] %vm264_vm0, %v381_v1 }
  0xb8   : > { %428 = vst.msk [vmem:[%s717_s4 + $0x30] sm:$0xff] %vm264_vm0, %v418_v3 }
  0xbd   : > { %v405_v4 = vld [vmem:[#allocation2 + $0x38] sm:$0xff] }
  0xbe   : > { %v419_v5 = vadd.f32 %v608_v35, %v405_v4 }
  0xc0   : > { %429 = vst.msk [vmem:[%s717_s4 + $0x38] sm:$0xff] %vm264_vm0, %v419_v5 }
  0xc1 PF: > { %s13_s14 = sadd.s32 1, %s631_s14   ;;  %s757_s12 = smov %s627_s13 }
  0xc2   : > { %p10_p5 = scmp.ge.s32.totalorder %s13_s14, 4   ;;  %s758_s13 = smov %s760_s15 }
  0xc4   :  { %12 = sbr.rel (!%p10_p5) target bundleno = 2 (0x2), region = 76 }

// kernel: _lambda_.18
= control target key start
LH: loop header
LB: loop body
LE: loop exit
PB: predicated region body
PF: predicated region fallthrough
CT: control target
= control target key end

     0   :  { %s1963_s12 = smov 0   ;;  %s1965_s13 = smov 0   ;;  %s2462_s0 = inlined_call_operand.vmem [shape: f32[2,64], index: 0, kind: input, shape index: {}]   ;;  %s2463_s1 = inlined_call_operand.vmem [shape: bf16[64,384], index: 1, kind: input, shape index: {}]   ;;  %s2464_s2 = inlined_call_operand.vmem [shape: f32[1,384], index: 2, kind: input, shape index: {}]   ;;  %s2465_s3 = inlined_call_operand.vmem [shape: f32[2,384], index: 3, kind: output, shape index: {}]  }
   0x1   :  { %s1967_s14 = smov 0   ;;  %s1969_s15 = smov 0  }
   0x2   :  { %s1971_s16 = smov 0  }
   0x3 LB: > { %s28_s17 = sadd.s32 1, %s1836_s15  ;;  %s1252_s18 = sadd.s32 4294967295, %s1840_s16   ;;  %s1840_s16 = sphi %s1971_s16, %s13_s16   ;;  %s1836_s15 = sphi %s1969_s15, %s2488_s15   ;;  %s1832_s14 = sphi %s1967_s14, %s2487_s14   ;;  %s1828_s13 = sphi %s1965_s13, %s2486_s13   ;;  %s1824_s12 = sphi %s1963_s12, %s2485_s12  }
   0x4   : > { %p30_p0 = scmp.ge.s32.totalorder %s28_s17, 2  ;;  %p76_p1 = scmp.ne.s32.totalorder %s1828_s13, %s1824_s12 }
   0x5   : > { %p77_p2 = scmp.eq.s32.totalorder %s1840_s16, 0  ;;  %p134_p4 = scmp.eq.s32.totalorder %s1252_s18, 1 }
   0x6   : > { %s2490_s17 = smov (%p30_p0, %s28_s17), 0  ;;  %s69_s20 = sadd.s32 1, %s1828_s13 }
   0x7   : > { %p78_p3 = por %p77_p2, %p76_p1  ;;  %s65_s19 = ssub.s32 %s1836_s15, %s2490_s17 }
   0x8   : > { %p67_p5 = scmp.eq.s32.totalorder %s65_s19, 0  ;;  %p1998_p6 = por %p134_p4, %p76_p1 }
   0x9   : > { %p1256_p7 = scmp.ge.s32.totalorder %s1840_s16, 2 }
   0xa   : > { %s2003_s22 = scalar_select %p67_p5, %s1828_s13, %s69_s20  }
   0xb   : > { %166 = sbr.rel (%p1256_p7) target bundleno = 107 (0x6b), region = 20 }
  0x10   : > { %169 = sbr.rel (!%p78_p3) target bundleno = 107 (0x6b), region = 24  ;;  %s171_s23 = sand.u32 (%p78_p3), 1, %s1828_s13  }
  0x11   : > { %s1258_s24 = sshll.u32 (%p78_p3), %s1836_s15, 1  ;;  %s1257_s25 = sshll.u32 (%p78_p3), %s171_s23, 6 }
  0x12   : > { %s176_s26 = ssub.s32 (%p78_p3), 3, %s1258_s24  ;;  %s1355_s27 = sshll.u32 (%p78_p3), %s1836_s15, 3 }
  0x13   : > { %p177_p8 = scmp.lt.s32.totalorder (%p78_p3), %s176_s26, 2  ;;  %s2012_s30 = scalar_lea.vmem (%p78_p3), %s2463_s1, %s1355_s27  }
  0x14   : > { %s2016_s6 = scalar_lea.vmem (%p78_p3), [#allocation3], %s1257_s25  }
  0x15   : > { %s2492_s26 = smov (!%p177_p8, %s176_s26), 2 }
  0x16   : > { %s1259_s4 = sshll.u32 %s2492_s26, 5  ;;  %s2014_s5 = sshll.u32 %s2492_s26, 2 }
  0x17   : > { %p1263_p9 = scmp.eq.s32.totalorder %s1259_s4, 0 }
  0x18   : > { %p189_p10 = scmp.lt.u32.totalorder (!%p1263_p9), %s2014_s5, 8 }
  0x19   : > { %188 = sbr.rel (%p1263_p9) target bundleno = 107 (0x6b), region = 28 }
  0x1e   : > { %192 = sbr.rel (%p189_p10) target bundleno = 91 (0x5b), region = 32  ;;  %s2020_s7 = sand.u32 (!%p189_p10), 7, %s2014_s5  }
  0x1f   : > { %p223_p11 = scmp.eq.s32.totalorder (!%p189_p10), %s2020_s7, 0  ;;  %p1264_p12 = scmp.ne.s32.totalorder (!%p189_p10), %s2020_s7, 0 }
  0x23   : > { %226 = sbr.rel (%p1264_p12) target bundleno = 56 (0x38), region = 47  ;;  %s227_s8 = sshrl.u32 (!%p1264_p12), %s2014_s5, 3 }
  0x24   : > { %s228_s9 = sshrl.u32 (!%p1264_p12), %s227_s8, 2  ;;  %s2025_s10 = sand.u32 (!%p1264_p12), 3, %s227_s8  }
  0x25   : > { %s1356_s11 = sshll.u32 (!%p1264_p12), %s228_s9, 5  ;;  %p1271_p13 = scmp.le.s32.totalorder (!%p1264_p12), %s2025_s10, 0 }
  0x26   : > { %s2028_s18 = scalar_lea.vmem (!%p1264_p12), %s2012_s30, %s1356_s11   ;;  %s2031_s19 = scalar_lea.vmem (!%p1264_p12), %s2016_s6, %s1356_s11 [#allocation3]  }
  0x28   : > { %1112 = sbr.rel (%p1271_p13) target bundleno = 56 (0x38), region = 254  ;;  %s2467_s20 = smov (!%p1271_p13), %s2031_s19 }
  0x29   : > { %s2468_s23 = smov (!%p1271_p13), %s2028_s18  ;;  %s2040_s24 = smov (!%p1271_p13), 0  }
  0x2a   : > { %s2042_s25 = smov (!%p1271_p13), 0  }
  0x2d LB: >> { %v325_v0 = vld [vmem:[%s1848_s23] sm:$0xff]  ;;  %v327_v1 = vld [vmem:[%s1848_s23 + $0xc] sm:$0xff]  ;;  %v329_v2 = vld [vmem:[%s1848_s23 + $0x18] sm:$0xff]  ;;  %s341_s26 = sadd.s32 1, %s1852_s24  ;;  %s319_s25 = sadd.s32 1, %s1856_s25   ;;  %s1856_s25 = sphi %s2042_s25, %s319_s25   ;;  %s1852_s24 = sphi %s2040_s24, %s2470_s24   ;;  %s1848_s23 = sphi %s2468_s23, %s346_s23   ;;  %s1844_s20 = sphi %s2467_s20, %s2469_s20  }
  0x2e   : >> { %326 = vst [vmem:[%s1844_s20] sm:$0xff] %v325_v0  ;;  %v331_v3 = vld [vmem:[%s1848_s23 + $0x24] sm:$0xff]  ;;  %p342_p0 = scmp.ge.s32.totalorder %s341_s26, %s2025_s10  ;;  %v333_v4 = vld [vmem:[%s1848_s23 + $0x30] sm:$0xff]  ;;  %v335_v5 = vld [vmem:[%s1848_s23 + $0x3c] sm:$0xff]  ;;  %p318_p1 = scmp.ge.s32.totalorder %s319_s25, %s2025_s10 }
  0x2f   : >> { %328 = vst [vmem:[%s1844_s20 + $0x8] sm:$0xff] %v327_v1  ;;  %v337_v6 = vld [vmem:[%s1848_s23 + $0x48] sm:$0xff]  ;;  %v339_v7 = vld [vmem:[%s1848_s23 + $0x54] sm:$0xff] }
  0x30   : >> { %330 = vst [vmem:[%s1844_s20 + $0x10] sm:$0xff] %v329_v2  ;;  %s2494_s26 = smov (%p342_p0, %s341_s26), 0 }
  0x31   : >> { %332 = vst [vmem:[%s1844_s20 + $0x18] sm:$0xff] %v331_v3  ;;  %s1272_s27 = sshll.u32 %s2494_s26, 3  ;;  %s2470_s24 = smov %s2494_s26 }
  0x32   : >> { %334 = vst [vmem:[%s1844_s20 + $0x20] sm:$0xff] %v333_v4  ;;  %s346_s23 = scalar_lea.vmem %s2028_s18, %s1272_s27   ;;  %s347_s28 = scalar_lea.vmem %s2031_s19, %s1272_s27 [#allocation3]  }
  0x33   : >> { %336 = vst [vmem:[%s1844_s20 + $0x28] sm:$0xff] %v335_v5  ;;  %321 = sbr.rel (!%p318_p1) target bundleno = 45 (0x2d), region = 260 }
  0x34   : >> { %338 = vst [vmem:[%s1844_s20 + $0x30] sm:$0xff] %v337_v6 }
  0x35   : >> { %340 = vst [vmem:[%s1844_s20 + $0x38] sm:$0xff] %v339_v7  ;;  %s2469_s20 = smov %s347_s28 }
  0x38 PF: > { %350 = sbr.rel (%p223_p11) target bundleno = 91 (0x5b), region = 65  ;;  %s352_s29 = ssub.s32 (!%p223_p11), %s2014_s5, %s2020_s7 }
  0x39   : > { %s356_s4 = sshrl.u32 (!%p223_p11), %s2014_s5, 3  ;;  %s2066_s8 = scalar_lea.vmem (!%p223_p11), %s2012_s30, %s352_s29 }
  0x3a   : > { %s2069_s9 = scalar_lea.vmem (!%p223_p11), %s2016_s6, %s352_s29 [#allocation3]  ;;  %s357_s11 = sshrl.u32 (!%p223_p11), %s356_s4, 2 }
  0x3b   : > { %s2071_s25 = sand.u32 (!%p223_p11), 3, %s356_s4   ;;  %s1358_s10 = sshll.u32 (!%p223_p11), %s357_s11, 5 }
  0x3c   : > { %s2074_s18 = scalar_lea.vmem (!%p223_p11), %s2012_s30, %s1358_s10   ;;  %s2077_s19 = scalar_lea.vmem (!%p223_p11), %s2016_s6, %s1358_s10 [#allocation3]  }
  0x3d   : > { %p1280_p2 = scmp.le.s32.totalorder %s2071_s25, 0 }
  0x3e   : > { %s2471_s20 = smov (!%p1280_p2), %s2077_s19  ;;  %s2472_s23 = smov (!%p1280_p2), %s2074_s18 }
  0x3f   : > { %1140 = sbr.rel (%p1280_p2) target bundleno = 79 (0x4f), region = 276  ;;  %s2086_s24 = smov (!%p1280_p2), 0  }
  0x40   : > { %s2088_s26 = smov (!%p1280_p2), 0  }
  0x44 LB: >> { %v454_v8 = vld [vmem:[%s1864_s23] sm:$0xff]  ;;  %v456_v9 = vld [vmem:[%s1864_s23 + $0xc] sm:$0xff]  ;;  %v458_v10 = vld [vmem:[%s1864_s23 + $0x18] sm:$0xff]  ;;  %s470_s27 = sadd.s32 1, %s1868_s24  ;;  %s448_s26 = sadd.s32 1, %s1872_s26   ;;  %s1872_s26 = sphi %s2088_s26, %s448_s26   ;;  %s1868_s24 = sphi %s2086_s24, %s2474_s24   ;;  %s1864_s23 = sphi %s2472_s23, %s475_s23   ;;  %s1860_s20 = sphi %s2471_s20, %s2473_s20  }
  0x45   : >> { %455 = vst [vmem:[%s1860_s20] sm:$0xff] %v454_v8  ;;  %v460_v11 = vld [vmem:[%s1864_s23 + $0x24] sm:$0xff]  ;;  %p471_p3 = scmp.ge.s32.totalorder %s470_s27, %s2071_s25  ;;  %v462_v12 = vld [vmem:[%s1864_s23 + $0x30] sm:$0xff]  ;;  %v464_v13 = vld [vmem:[%s1864_s23 + $0x3c] sm:$0xff]  ;;  %p447_p4 = scmp.ge.s32.totalorder %s448_s26, %s2071_s25 }
  0x46   : >> { %457 = vst [vmem:[%s1860_s20 + $0x8] sm:$0xff] %v456_v9  ;;  %v466_v14 = vld [vmem:[%s1864_s23 + $0x48] sm:$0xff]  ;;  %v468_v15 = vld [vmem:[%s1864_s23 + $0x54] sm:$0xff] }
  0x47   : >> { %459 = vst [vmem:[%s1860_s20 + $0x10] sm:$0xff] %v458_v10  ;;  %s2496_s27 = smov (%p471_p3, %s470_s27), 0 }
  0x48   : >> { %461 = vst [vmem:[%s1860_s20 + $0x18] sm:$0xff] %v460_v11  ;;  %s1281_s28 = sshll.u32 %s2496_s27, 3  ;;  %s2474_s24 = smov %s2496_s27 }
  0x49   : >> { %463 = vst [vmem:[%s1860_s20 + $0x20] sm:$0xff] %v462_v12  ;;  %s475_s23 = scalar_lea.vmem %s2074_s18, %s1281_s28   ;;  %s476_s29 = scalar_lea.vmem %s2077_s19, %s1281_s28 [#allocation3]  }
  0x4a   : >> { %465 = vst [vmem:[%s1860_s20 + $0x28] sm:$0xff] %v464_v13  ;;  %450 = sbr.rel (!%p447_p4) target bundleno = 68 (0x44), region = 282 }
  0x4b   : >> { %467 = vst [vmem:[%s1860_s20 + $0x30] sm:$0xff] %v466_v14 }
  0x4c   : >> { %469 = vst [vmem:[%s1860_s20 + $0x38] sm:$0xff] %v468_v15  ;;  %s2473_s20 = smov %s476_s29 }
  0x4f PF: > { %s1938_s4 = smov 1  }
  0x50   : > { %s477_s11 = sshll.u32 %s1938_s4, %s2020_s7 }
  0x51   : > { %s1283_s10 = sadd.s32 4294967295, %s477_s11 }
  0x52   : > { %v487_v16 = vld [vmem:[%s2066_s8] sm:%s1283_s10]  ;;  %v489_v17 = vld [vmem:[%s2066_s8 + $0xc] sm:%s1283_s10] }
  0x53   : > { %488 = vst [vmem:[%s2069_s9] sm:%s1283_s10] %v487_v16  ;;  %v491_v18 = vld [vmem:[%s2066_s8 + $0x18] sm:%s1283_s10] }
  0x54   : > { %490 = vst [vmem:[%s2069_s9 + $0x8] sm:%s1283_s10] %v489_v17  ;;  %v493_v19 = vld [vmem:[%s2066_s8 + $0x24] sm:%s1283_s10] }
  0x55   : > { %492 = vst [vmem:[%s2069_s9 + $0x10] sm:%s1283_s10] %v491_v18  ;;  %v495_v20 = vld [vmem:[%s2066_s8 + $0x30] sm:%s1283_s10] }
  0x56   : > { %494 = vst [vmem:[%s2069_s9 + $0x18] sm:%s1283_s10] %v493_v19  ;;  %v497_v21 = vld [vmem:[%s2066_s8 + $0x3c] sm:%s1283_s10] }
  0x57   : > { %496 = vst [vmem:[%s2069_s9 + $0x20] sm:%s1283_s10] %v495_v20  ;;  %v499_v22 = vld [vmem:[%s2066_s8 + $0x48] sm:%s1283_s10] }
  0x58   : > { %498 = vst [vmem:[%s2069_s9 + $0x28] sm:%s1283_s10] %v497_v21  ;;  %v501_v23 = vld [vmem:[%s2066_s8 + $0x54] sm:%s1283_s10] }
  0x59   : > { %500 = vst [vmem:[%s2069_s9 + $0x30] sm:%s1283_s10] %v499_v22 }
  0x5a   : > { %502 = vst [vmem:[%s2069_s9 + $0x38] sm:%s1283_s10] %v501_v23 }
  0x5b PF: > { %p1284_p5 = scmp.ge.u32.totalorder %s2014_s5, 8 }
  0x5c   : > { %s1939_s7 = smov (!%p1284_p5), 1  }
  0x5d   : > { %195 = sbr.rel (%p1284_p5) target bundleno = 107 (0x6b), region = 36  ;;  %s196_s8 = sshll.u32 (!%p1284_p5), %s1939_s7, %s2014_s5 }
  0x5e   : > { %s1285_s9 = sadd.s32 (!%p1284_p5), 4294967295, %s196_s8 }
  0x62   : > { %v206_v24 = vld [vmem:[%s2012_s30] sm:%s1285_s9]  ;;  %v208_v25 = vld [vmem:[%s2012_s30 + $0xc] sm:%s1285_s9] }
  0x63   : > { %207 = vst [vmem:[%s2016_s6] sm:%s1285_s9] %v206_v24  ;;  %v210_v26 = vld [vmem:[%s2012_s30 + $0x18] sm:%s1285_s9] }
  0x64   : > { %209 = vst [vmem:[%s2016_s6 + $0x8] sm:%s1285_s9] %v208_v25  ;;  %v212_v27 = vld [vmem:[%s2012_s30 + $0x24] sm:%s1285_s9] }
  0x65   : > { %211 = vst [vmem:[%s2016_s6 + $0x10] sm:%s1285_s9] %v210_v26  ;;  %v214_v28 = vld [vmem:[%s2012_s30 + $0x30] sm:%s1285_s9] }
  0x66   : > { %213 = vst [vmem:[%s2016_s6 + $0x18] sm:%s1285_s9] %v212_v27  ;;  %v216_v29 = vld [vmem:[%s2012_s30 + $0x3c] sm:%s1285_s9] }
  0x67   : > { %215 = vst [vmem:[%s2016_s6 + $0x20] sm:%s1285_s9] %v214_v28  ;;  %v218_v30 = vld [vmem:[%s2012_s30 + $0x48] sm:%s1285_s9] }
  0x68   : > { %217 = vst [vmem:[%s2016_s6 + $0x28] sm:%s1285_s9] %v216_v29  ;;  %v220_v31 = vld [vmem:[%s2012_s30 + $0x54] sm:%s1285_s9] }
  0x69   : > { %219 = vst [vmem:[%s2016_s6 + $0x30] sm:%s1285_s9] %v218_v30 }
  0x6a   : > { %221 = vst [vmem:[%s2016_s6 + $0x38] sm:%s1285_s9] %v220_v31 }
  0x6b PF: > { %p1286_p7 = scmp.ge.s32.totalorder %s1840_s16, 1  ;;  %p519_p8 = scmp.lt.s32.totalorder %s1840_s16, 3 }
  0x6d   : > { %p520_p9 = pnand %p1286_p7, %p519_p8 }
  0x6e   : > { %s526_s5 = sand.u32 (!%p520_p9), 1, %s1824_s12   ;;  %s2150_s19 = sshll.u32 (!%p520_p9), %s1832_s14, 1 }
  0x6f   : > { %523 = sbr.rel (%p520_p9) target bundleno = 425 (0x1a9), region = 94  ;;  %s1287_s25 = sshll.u32 (!%p520_p9), %s526_s5, 6 }
  0x70   : > { %s528_s18 = scalar_lea.vmem (!%p520_p9), [#allocation3], %s1287_s25  ;;  %p579_p10 = scmp.lt.s32.totalorder (!%p520_p9), %s2150_s19, 2 }
  0x71   : > { %s1288_s27 = sshll.u32 (!%p520_p9), %s526_s5, 2 }
  0x72   : > { %s2159_s28 = scalar_lea.vmem (!%p520_p9), [#allocation4], %s1288_s27  }
  0x74   : > { %v1316_v32 = vld [vmem:[%s528_s18 + $0x30] sm:$0xf]  ;;  %v1367_v33 = vld [vmem:[%s528_s18 + $0x34] sm:$0xf0]  ;;  %v1366_v34 = vld [vmem:[%s528_s18 + $0x34] sm:$0xf] }
  0x75   : > { %v1317_v35 = vor.u32 %v1367_v33, %v1316_v32  ;;  %v1318_v36 = vld [vmem:[%s528_s18 + $0x38] sm:$0xf0]  ;;  %v1308_v37 = vld [vmem:[%s528_s18 + $0x20] sm:$0xf]  ;;  %v1365_v38 = vld [vmem:[%s528_s18 + $0x24] sm:$0xf0] }
  0x76   : > { %v1321_v39 = vor.u32 %v1366_v34, %v1318_v36  ;;  %v1364_v40 = vld [vmem:[%s528_s18 + $0x24] sm:$0xf]  ;;  %v1310_v41 = vld [vmem:[%s528_s18 + $0x28] sm:$0xf0]  ;;  %v1309_v42 = vor.u32 %v1365_v38, %v1308_v37  ;;  %v1300_v44 = vld [vmem:[%s528_s18 + $0x10] sm:$0xf] }
  0x77   : > { %656 = vmatpush.bf16.msra.mxu0 %v1317_v35  ;;  %v1313_v43 = vor.u32 %v1364_v40, %v1310_v41  ;;  %v1363_v45 = vld [vmem:[%s528_s18 + $0x14] sm:$0xf0]  ;;  %v1362_v46 = vld [vmem:[%s528_s18 + $0x14] sm:$0xf]  ;;  %v1302_v47 = vld [vmem:[%s528_s18 + $0x18] sm:$0xf0] }
  0x78   : > { %669 = vmatpush.bf16.msra.mxu1 %v1321_v39  ;;  %v1301_v48 = vor.u32 %v1363_v45, %v1300_v44  ;;  %v1305_v49 = vor.u32 %v1362_v46, %v1302_v47  ;;  %v1292_v50 = vld [vmem:[%s528_s18] sm:$0xf]  ;;  %v1361_v51 = vld [vmem:[%s528_s18 + $0x4] sm:$0xf0]  ;;  %v1360_v52 = vld [vmem:[%s528_s18 + $0x4] sm:$0xf] }
  0x79   : > { %v1294_v53 = vld [vmem:[%s528_s18 + $0x8] sm:$0xf0]  ;;  %v1293_v54 = vor.u32 %v1361_v51, %v1292_v50  ;;  %v597_v55 = vld [vmem:[%s2462_s0] sm:$0x3]  ;;  %vm648_vm0 = vcmask 523264   ;;  %v1940_v58 = vmov 0.0  }
  0x7a   : > { %v1297_v56 = vor.u32 %v1360_v52, %v1294_v53  ;;  %v598_v57 = vpack.c.bf16 %v597_v55, %v597_v55  ;;  %596 = vst [vmem:[#allocation2] sm:$0xf] %v1940_v58  ;;  %s580_s20 = scalar_select %p579_p10, %s2150_s19, 2  ;;  %vm681_vm1 = vcmask 1041408  }
  0x7b   : > { %657 = vmatpush.bf16.msra.mxu0 %v1309_v42  ;;  %s707_s29 = ssub.s32 (%p1998_p6), 3, %s2150_s19  ;;  %s1368_s4 = sshll.u32 (%p1998_p6), %s1832_s14, 2 }
  0x7c   : > { %670 = vmatpush.bf16.msra.mxu1 %v1313_v43  ;;  %s581_s26 = scalar_lea.vmem %s2464_s2, %s580_s20  ;;  %p708_p11 = scmp.lt.s32.totalorder (%p1998_p6), %s707_s29, 2 }
  0x7d   : > { %v690_v61 = vld [vmem:[%s581_s26] sm:$0x3]  ;;  %s2169_s12 = scalar_lea.vmem (%p1998_p6), %s2465_s3, %s1368_s4  }
  0x7e   : > { %v693_v1 = vperm.slane %v690_v61, 1  ;;  %v692_v3 = vperm.slane %v690_v61, 0 }
  0x7f   : > { %658 = vmatpush.bf16.msra.mxu0 %v1301_v48 }
  0x80   : > { %671 = vmatpush.bf16.msra.mxu1 %v1305_v49  ;;  %v694_v4 = vrot.slane %v693_v1, 6 }
  0x81   : > { %v599_v62 = vld [vmem:[#allocation2] sm:$0xf] }
  0x82   : > { %v695_v7 = vsel %vm681_vm1, %v692_v3, %v694_v4 }
  0x83   : > { %659 = vmatpush.bf16.msra.mxu0 %v1293_v54 }
  0x84   : > { %672 = vmatpush.bf16.msra.mxu1 %v1297_v56 }
  0x86   : > { %1322 = vmatmul.msk.bf16.vlgmr.msra.gmra.mxu0 %vm648_vm0, %v598_v57 }
  0x87   : > { %1323 = vmatmul.msk.bf16.vlgmr.msra.gmra.mxu1 %vm648_vm0, %v598_v57 }
 0x103   : > { %v661_v59 = vpop.f32.mrf.mxu0 }
 0x104   : > { %v674_v60 = vpop.f32.mrf.mxu1 }
 0x105   : > { %v680_v63 = vrot.slane %v674_v60, 6 }
 0x107   : > { %v682_v0 = vsel %vm681_vm1, %v661_v59, %v680_v63 }
 0x108   : > { %v684_v2 = vadd.f32 %v682_v0, %v599_v62 }
 0x10a   : > { %685 = vst [vmem:[#allocation2] sm:$0xf] %v684_v2 }
 0x10b   : > { %v663_v5 = vpop.f32.mrf.mxu0 }
 0x10c   : > { %v676_v6 = vpop.f32.mrf.mxu1 }
 0x110   : > { %705 = sbr.rel (!%p1998_p6) target bundleno = 425 (0x1a9), region = 110 }
 0x111   : > { %v689_v8 = vld [vmem:[#allocation2] sm:$0xf] }
 0x112   : > { %v697_v9 = vadd.f32 %v695_v7, %v689_v8 }
 0x114   : > { %698 = vst [vmem:[%s2159_s28] sm:$0xf] %v697_v9 }
 0x115   : > { %s2498_s29 = smov (!%p708_p11, %s707_s29), 2 }
 0x116   : > { %s2171_s7 = sshll.u32 %s2498_s29, 1 }
 0x117   : > { %p1330_p12 = scmp.eq.s32.totalorder %s2171_s7, 0 }
 0x118   : > { %p720_p13 = scmp.lt.u32.totalorder (!%p1330_p12), %s2171_s7, 8 }
 0x119   : > { %719 = sbr.rel (%p1330_p12) target bundleno = 425 (0x1a9), region = 114 }
 0x11e   : > { %723 = sbr.rel (%p720_p13) target bundleno = 416 (0x1a0), region = 118  ;;  %s2176_s21 = sand.u32 (!%p720_p13), 7, %s2171_s7  }
 0x11f   : > { %p740_p6 = scmp.eq.s32.totalorder (!%p720_p13), %s2176_s21, 0  ;;  %p1331_p0 = scmp.ne.s32.totalorder (!%p720_p13), %s2176_s21, 0 }
 0x123   : > { %743 = sbr.rel (%p1331_p0) target bundleno = 351 (0x15f), region = 133  ;;  %s744_s14 = sshrl.u32 (!%p1331_p0), %s2171_s7, 3 }
 0x124   : > { %s2183_s8 = sshrl.u32 (!%p1331_p0), %s744_s14, 5 }
 0x125   : > { %p1332_p1 = scmp.le.s32.totalorder (!%p1331_p0), %s2183_s8, 0 }
 0x128   : > { %1154 = sbr.rel (%p1332_p1) target bundleno = 334 (0x14e), region = 287  ;;  %s2475_s9 = smov (!%p1332_p1), %s2169_s12 }
 0x129   : > { %s2476_s5 = smov (!%p1332_p1), %s2159_s28  ;;  %s2192_s25 = smov (!%p1332_p1), 0  }
 0x12a   : > { %s2194_s18 = smov (!%p1332_p1), 0  }
 0x12d LB: >> { %v755_v10 = vld [vmem:[%s1880_s5] sm:$0xff]  ;;  %v757_v11 = vld [vmem:[%s1880_s5 + $0x8] sm:$0xff]  ;;  %v759_v12 = vld [vmem:[%s1880_s5 + $0x10] sm:$0xff]  ;;  %s819_s30 = sadd.s32 1, %s1884_s25  ;;  %s749_s18 = sadd.s32 1, %s1888_s18   ;;  %s1888_s18 = sphi %s2194_s18, %s749_s18   ;;  %s1884_s25 = sphi %s2192_s25, %s2479_s25   ;;  %s1880_s5 = sphi %s2476_s5, %s2478_s5   ;;  %s1876_s9 = sphi %s2475_s9, %s2477_s9  }
 0x12e   : >> { %756 = vst [vmem:[%s1876_s9] sm:$0xff] %v755_v10  ;;  %v761_v13 = vld [vmem:[%s1880_s5 + $0x18] sm:$0xff]  ;;  %p820_p2 = scmp.ge.s32.totalorder %s819_s30, %s2183_s8  ;;  %v763_v14 = vld [vmem:[%s1880_s5 + $0x20] sm:$0xff]  ;;  %v765_v15 = vld [vmem:[%s1880_s5 + $0x28] sm:$0xff]  ;;  %p748_p3 = scmp.ge.s32.totalorder %s749_s18, %s2183_s8 }
 0x12f   : >> { %758 = vst [vmem:[%s1876_s9 + $0x8] sm:$0xff] %v757_v11  ;;  %v767_v16 = vld [vmem:[%s1880_s5 + $0x30] sm:$0xff]  ;;  %v769_v17 = vld [vmem:[%s1880_s5 + $0x38] sm:$0xff]  ;;  %v771_v18 = vld [vmem:[%s1880_s5 + $0x40] sm:$0xff] }
 0x130   : >> { %760 = vst [vmem:[%s1876_s9 + $0x10] sm:$0xff] %v759_v12  ;;  %s2500_s30 = smov (%p820_p2, %s819_s30), 0  ;;  %v773_v19 = vld [vmem:[%s1880_s5 + $0x48] sm:$0xff]  ;;  %v775_v20 = vld [vmem:[%s1880_s5 + $0x50] sm:$0xff]  ;;  %v777_v21 = vld [vmem:[%s1880_s5 + $0x58] sm:$0xff] }
 0x131   : >> { %762 = vst [vmem:[%s1876_s9 + $0x18] sm:$0xff] %v761_v13  ;;  %s1333_s6 = sshll.u32 %s2500_s30, 8  ;;  %v779_v22 = vld [vmem:[%s1880_s5 + $0x60] sm:$0xff]  ;;  %v781_v23 = vld [vmem:[%s1880_s5 + $0x68] sm:$0xff]  ;;  %v783_v24 = vld [vmem:[%s1880_s5 + $0x70] sm:$0xff]  ;;  %s2479_s25 = smov %s2500_s30 }
 0x132   : >> { %764 = vst [vmem:[%s1876_s9 + $0x20] sm:$0xff] %v763_v14  ;;  %s2226_s19 = scalar_lea.vmem %s2159_s28, %s1333_s6 [#allocation4]   ;;  %s2229_s20 = scalar_lea.vmem %s2169_s12, %s1333_s6   ;;  %v785_v25 = vld [vmem:[%s1880_s5 + $0x78] sm:$0xff]  ;;  %v787_v26 = vld [vmem:[%s1880_s5 + $0x80] sm:$0xff]  ;;  %v789_v27 = vld [vmem:[%s1880_s5 + $0x88] sm:$0xff] }
 0x133   : >> { %766 = vst [vmem:[%s1876_s9 + $0x28] sm:$0xff] %v765_v15  ;;  %v791_v28 = vld [vmem:[%s1880_s5 + $0x90] sm:$0xff]  ;;  %v793_v29 = vld [vmem:[%s1880_s5 + $0x98] sm:$0xff]  ;;  %v795_v30 = vld [vmem:[%s1880_s5 + $0xa0] sm:$0xff] }
 0x134   : >> { %768 = vst [vmem:[%s1876_s9 + $0x30] sm:$0xff] %v767_v16  ;;  %v797_v31 = vld [vmem:[%s1880_s5 + $0xa8] sm:$0xff]  ;;  %v799_v32 = vld [vmem:[%s1880_s5 + $0xb0] sm:$0xff]  ;;  %v801_v33 = vld [vmem:[%s1880_s5 + $0xb8] sm:$0xff] }
 0x135   : >> { %770 = vst [vmem:[%s1876_s9 + $0x38] sm:$0xff] %v769_v17  ;;  %v803_v34 = vld [vmem:[%s1880_s5 + $0xc0] sm:$0xff]  ;;  %v805_v35 = vld [vmem:[%s1880_s5 + $0xc8] sm:$0xff]  ;;  %v807_v36 = vld [vmem:[%s1880_s5 + $0xd0] sm:$0xff] }
 0x136   : >> { %772 = vst [vmem:[%s1876_s9 + $0x40] sm:$0xff] %v771_v18  ;;  %v809_v37 = vld [vmem:[%s1880_s5 + $0xd8] sm:$0xff]  ;;  %v811_v38 = vld [vmem:[%s1880_s5 + $0xe0] sm:$0xff]  ;;  %v813_v39 = vld [vmem:[%s1880_s5 + $0xe8] sm:$0xff] }
 0x137   : >> { %774 = vst [vmem:[%s1876_s9 + $0x48] sm:$0xff] %v773_v19  ;;  %v815_v40 = vld [vmem:[%s1880_s5 + $0xf0] sm:$0xff]  ;;  %v817_v41 = vld [vmem:[%s1880_s5 + $0xf8] sm:$0xff]  ;;  %s2478_s5 = smov %s2226_s19 }
 0x138   : >> { %776 = vst [vmem:[%s1876_s9 + $0x50] sm:$0xff] %v775_v20 }
 0x139   : >> { %778 = vst [vmem:[%s1876_s9 + $0x58] sm:$0xff] %v777_v21 }
 0x13a   : >> { %780 = vst [vmem:[%s1876_s9 + $0x60] sm:$0xff] %v779_v22 }
 0x13b   : >> { %782 = vst [vmem:[%s1876_s9 + $0x68] sm:$0xff] %v781_v23 }
 0x13c   : >> { %784 = vst [vmem:[%s1876_s9 + $0x70] sm:$0xff] %v783_v24 }
 0x13d   : >> { %786 = vst [vmem:[%s1876_s9 + $0x78] sm:$0xff] %v785_v25 }
 0x13e   : >> { %788 = vst [vmem:[%s1876_s9 + $0x80] sm:$0xff] %v787_v26 }
 0x13f   : >> { %790 = vst [vmem:[%s1876_s9 + $0x88] sm:$0xff] %v789_v27 }
 0x140   : >> { %792 = vst [vmem:[%s1876_s9 + $0x90] sm:$0xff] %v791_v28 }
 0x141   : >> { %794 = vst [vmem:[%s1876_s9 + $0x98] sm:$0xff] %v793_v29 }
 0x142   : >> { %796 = vst [vmem:[%s1876_s9 + $0xa0] sm:$0xff] %v795_v30 }
 0x143   : >> { %798 = vst [vmem:[%s1876_s9 + $0xa8] sm:$0xff] %v797_v31 }
 0x144   : >> { %800 = vst [vmem:[%s1876_s9 + $0xb0] sm:$0xff] %v799_v32 }
 0x145   : >> { %802 = vst [vmem:[%s1876_s9 + $0xb8] sm:$0xff] %v801_v33 }
 0x146   : >> { %804 = vst [vmem:[%s1876_s9 + $0xc0] sm:$0xff] %v803_v34 }
 0x147   : >> { %806 = vst [vmem:[%s1876_s9 + $0xc8] sm:$0xff] %v805_v35 }
 0x148   : >> { %808 = vst [vmem:[%s1876_s9 + $0xd0] sm:$0xff] %v807_v36 }
 0x149   : >> { %810 = vst [vmem:[%s1876_s9 + $0xd8] sm:$0xff] %v809_v37  ;;  %751 = sbr.rel (!%p748_p3) target bundleno = 301 (0x12d), region = 293 }
 0x14a   : >> { %812 = vst [vmem:[%s1876_s9 + $0xe0] sm:$0xff] %v811_v38 }
 0x14b   : >> { %814 = vst [vmem:[%s1876_s9 + $0xe8] sm:$0xff] %v813_v39 }
 0x14c   : >> { %816 = vst [vmem:[%s1876_s9 + $0xf0] sm:$0xff] %v815_v40 }
 0x14d   : >> { %818 = vst [vmem:[%s1876_s9 + $0xf8] sm:$0xff] %v817_v41  ;;  %s2477_s9 = smov %s2229_s20 }
 0x14e PF: > { %s2295_s23 = sand.u32 31, %s744_s14   ;;  %s1369_s24 = sshll.u32 %s2183_s8, 8 }
 0x14f   : > { %s830_s26 = scalar_lea.vmem %s2159_s28, %s1369_s24 [#allocation4]   ;;  %s832_s27 = scalar_lea.vmem %s2169_s12, %s1369_s24  }
 0x150   : > { %p1338_p4 = scmp.le.s32.totalorder %s2295_s23, 0 }
 0x151   : > { %s1890_s29 = smov (!%p1338_p4), %s832_s27   ;;  %s1894_s4 = smov (!%p1338_p4), %s830_s26  }
 0x152   : > { %1168 = sbr.rel (%p1338_p4) target bundleno = 351 (0x15f), region = 298  ;;  %s1898_s11 = smov (!%p1338_p4), 0  }
 0x153   : > { %s1902_s10 = smov (!%p1338_p4), 0  }
 0x157 LB: >> { %v842_v42 = vld [vmem:[%s1896_s4] sm:$0xff]  ;;  %s844_s14 = sadd.s32 1, %s1900_s11  ;;  %s836_s10 = sadd.s32 1, %s1904_s10   ;;  %s1904_s10 = sphi %s1902_s10, %s836_s10   ;;  %s1900_s11 = sphi %s1898_s11, %s1899_s11   ;;  %s1896_s4 = sphi %s1894_s4, %s849_s4   ;;  %s1892_s29 = sphi %s1890_s29, %s850_s29  }
 0x158   : >> { %843 = vst [vmem:[%s1892_s29] sm:$0xff] %v842_v42  ;;  %p845_p5 = scmp.ge.s32.totalorder %s844_s14, %s2295_s23  ;;  %p835_p7 = scmp.ge.s32.totalorder %s836_s10, %s2295_s23 }
 0x15a   : >> { %s2502_s14 = smov (%p845_p5, %s844_s14), 0  ;;  %838 = sbr.rel (!%p835_p7) target bundleno = 343 (0x157), region = 304 }
 0x15b   : >> { %s1339_s8 = sshll.u32 %s2502_s14, 3  ;;  %s1899_s11 = smov %s2502_s14  }
 0x15c   : >> { %s849_s4 = scalar_lea.vmem %s830_s26, %s1339_s8 [#allocation4]   ;;  %s850_s29 = scalar_lea.vmem %s832_s27, %s1339_s8  }
 0x15f PF: > { %853 = sbr.rel (%p740_p6) target bundleno = 416 (0x1a0), region = 151  ;;  %s2307_s9 = ssub.s32 (!%p740_p6), %s2171_s7, %s2176_s21 }
 0x160   : > { %s859_s5 = sshrl.u32 (!%p740_p6), %s2171_s7, 3  ;;  %s856_s25 = scalar_lea.vmem (!%p740_p6), %s2159_s28, %s2307_s9 [#allocation4] }
 0x161   : > { %s858_s18 = scalar_lea.vmem (!%p740_p6), %s2169_s12, %s2307_s9  ;;  %s2316_s30 = sshrl.u32 (!%p740_p6), %s859_s5, 5 }
 0x162   : > { %p1341_p8 = scmp.le.s32.totalorder (!%p740_p6), %s2316_s30, 0 }
 0x164   : > { %1182 = sbr.rel (%p1341_p8) target bundleno = 394 (0x18a), region = 309  ;;  %s2480_s6 = smov (!%p1341_p8), %s2169_s12 }
 0x165   : > { %s2481_s19 = smov (!%p1341_p8), %s2159_s28  ;;  %s2325_s20 = smov (!%p1341_p8), 0  }
 0x166   : > { %s2327_s23 = smov (!%p1341_p8), 0  }
 0x169 LB: >> { %v870_v43 = vld [vmem:[%s1912_s19] sm:$0xff]  ;;  %v872_v44 = vld [vmem:[%s1912_s19 + $0x8] sm:$0xff]  ;;  %v874_v45 = vld [vmem:[%s1912_s19 + $0x10] sm:$0xff]  ;;  %s934_s24 = sadd.s32 1, %s1916_s20  ;;  %s864_s23 = sadd.s32 1, %s1920_s23   ;;  %s1920_s23 = sphi %s2327_s23, %s864_s23   ;;  %s1916_s20 = sphi %s2325_s20, %s2484_s20   ;;  %s1912_s19 = sphi %s2481_s19, %s2483_s19   ;;  %s1908_s6 = sphi %s2480_s6, %s2482_s6  }
 0x16a   : >> { %871 = vst [vmem:[%s1908_s6] sm:$0xff] %v870_v43  ;;  %v876_v46 = vld [vmem:[%s1912_s19 + $0x18] sm:$0xff]  ;;  %p935_p9 = scmp.ge.s32.totalorder %s934_s24, %s2316_s30  ;;  %v878_v47 = vld [vmem:[%s1912_s19 + $0x20] sm:$0xff]  ;;  %v880_v48 = vld [vmem:[%s1912_s19 + $0x28] sm:$0xff]  ;;  %p863_p10 = scmp.ge.s32.totalorder %s864_s23, %s2316_s30 }
 0x16b   : >> { %873 = vst [vmem:[%s1908_s6 + $0x8] sm:$0xff] %v872_v44  ;;  %v882_v49 = vld [vmem:[%s1912_s19 + $0x30] sm:$0xff]  ;;  %v884_v50 = vld [vmem:[%s1912_s19 + $0x38] sm:$0xff]  ;;  %v886_v51 = vld [vmem:[%s1912_s19 + $0x40] sm:$0xff] }
 0x16c   : >> { %875 = vst [vmem:[%s1908_s6 + $0x10] sm:$0xff] %v874_v45  ;;  %s2504_s24 = smov (%p935_p9, %s934_s24), 0  ;;  %v888_v52 = vld [vmem:[%s1912_s19 + $0x48] sm:$0xff]  ;;  %v890_v53 = vld [vmem:[%s1912_s19 + $0x50] sm:$0xff]  ;;  %v892_v54 = vld [vmem:[%s1912_s19 + $0x58] sm:$0xff] }
 0x16d   : >> { %877 = vst [vmem:[%s1908_s6 + $0x18] sm:$0xff] %v876_v46  ;;  %s1342_s26 = sshll.u32 %s2504_s24, 8  ;;  %v894_v55 = vld [vmem:[%s1912_s19 + $0x60] sm:$0xff]  ;;  %v896_v56 = vld [vmem:[%s1912_s19 + $0x68] sm:$0xff]  ;;  %v898_v57 = vld [vmem:[%s1912_s19 + $0x70] sm:$0xff]  ;;  %s2484_s20 = smov %s2504_s24 }
 0x16e   : >> { %879 = vst [vmem:[%s1908_s6 + $0x20] sm:$0xff] %v878_v47  ;;  %s2359_s27 = scalar_lea.vmem %s2159_s28, %s1342_s26 [#allocation4]   ;;  %s2362_s29 = scalar_lea.vmem %s2169_s12, %s1342_s26   ;;  %v900_v58 = vld [vmem:[%s1912_s19 + $0x78] sm:$0xff]  ;;  %v902_v59 = vld [vmem:[%s1912_s19 + $0x80] sm:$0xff]  ;;  %v904_v60 = vld [vmem:[%s1912_s19 + $0x88] sm:$0xff] }
 0x16f   : >> { %881 = vst [vmem:[%s1908_s6 + $0x28] sm:$0xff] %v880_v48  ;;  %v906_v61 = vld [vmem:[%s1912_s19 + $0x90] sm:$0xff]  ;;  %v908_v62 = vld [vmem:[%s1912_s19 + $0x98] sm:$0xff]  ;;  %v910_v63 = vld [vmem:[%s1912_s19 + $0xa0] sm:$0xff] }
 0x170   : >> { %883 = vst [vmem:[%s1908_s6 + $0x30] sm:$0xff] %v882_v49  ;;  %v912_v0 = vld [vmem:[%s1912_s19 + $0xa8] sm:$0xff]  ;;  %v914_v1 = vld [vmem:[%s1912_s19 + $0xb0] sm:$0xff]  ;;  %v916_v2 = vld [vmem:[%s1912_s19 + $0xb8] sm:$0xff] }
 0x171   : >> { %885 = vst [vmem:[%s1908_s6 + $0x38] sm:$0xff] %v884_v50  ;;  %v918_v3 = vld [vmem:[%s1912_s19 + $0xc0] sm:$0xff]  ;;  %v920_v4 = vld [vmem:[%s1912_s19 + $0xc8] sm:$0xff]  ;;  %v922_v5 = vld [vmem:[%s1912_s19 + $0xd0] sm:$0xff] }
 0x172   : >> { %887 = vst [vmem:[%s1908_s6 + $0x40] sm:$0xff] %v886_v51  ;;  %v924_v6 = vld [vmem:[%s1912_s19 + $0xd8] sm:$0xff]  ;;  %v926_v7 = vld [vmem:[%s1912_s19 + $0xe0] sm:$0xff]  ;;  %v928_v8 = vld [vmem:[%s1912_s19 + $0xe8] sm:$0xff] }
 0x173   : >> { %889 = vst [vmem:[%s1908_s6 + $0x48] sm:$0xff] %v888_v52  ;;  %v930_v9 = vld [vmem:[%s1912_s19 + $0xf0] sm:$0xff]  ;;  %v932_v10 = vld [vmem:[%s1912_s19 + $0xf8] sm:$0xff]  ;;  %s2483_s19 = smov %s2359_s27 }
 0x174   : >> { %891 = vst [vmem:[%s1908_s6 + $0x50] sm:$0xff] %v890_v53 }
 0x175   : >> { %893 = vst [vmem:[%s1908_s6 + $0x58] sm:$0xff] %v892_v54 }
 0x176   : >> { %895 = vst [vmem:[%s1908_s6 + $0x60] sm:$0xff] %v894_v55 }
 0x177   : >> { %897 = vst [vmem:[%s1908_s6 + $0x68] sm:$0xff] %v896_v56 }
 0x178   : >> { %899 = vst [vmem:[%s1908_s6 + $0x70] sm:$0xff] %v898_v57 }
 0x179   : >> { %901 = vst [vmem:[%s1908_s6 + $0x78] sm:$0xff] %v900_v58 }
 0x17a   : >> { %903 = vst [vmem:[%s1908_s6 + $0x80] sm:$0xff] %v902_v59 }
 0x17b   : >> { %905 = vst [vmem:[%s1908_s6 + $0x88] sm:$0xff] %v904_v60 }
 0x17c   : >> { %907 = vst [vmem:[%s1908_s6 + $0x90] sm:$0xff] %v906_v61 }
 0x17d   : >> { %909 = vst [vmem:[%s1908_s6 + $0x98] sm:$0xff] %v908_v62 }
 0x17e   : >> { %911 = vst [vmem:[%s1908_s6 + $0xa0] sm:$0xff] %v910_v63 }
 0x17f   : >> { %913 = vst [vmem:[%s1908_s6 + $0xa8] sm:$0xff] %v912_v0 }
 0x180   : >> { %915 = vst [vmem:[%s1908_s6 + $0xb0] sm:$0xff] %v914_v1 }
 0x181   : >> { %917 = vst [vmem:[%s1908_s6 + $0xb8] sm:$0xff] %v916_v2 }
 0x182   : >> { %919 = vst [vmem:[%s1908_s6 + $0xc0] sm:$0xff] %v918_v3 }
 0x183   : >> { %921 = vst [vmem:[%s1908_s6 + $0xc8] sm:$0xff] %v920_v4 }
 0x184   : >> { %923 = vst [vmem:[%s1908_s6 + $0xd0] sm:$0xff] %v922_v5 }
 0x185   : >> { %925 = vst [vmem:[%s1908_s6 + $0xd8] sm:$0xff] %v924_v6  ;;  %866 = sbr.rel (!%p863_p10) target bundleno = 361 (0x169), region = 315 }
 0x186   : >> { %927 = vst [vmem:[%s1908_s6 + $0xe0] sm:$0xff] %v926_v7 }
 0x187   : >> { %929 = vst [vmem:[%s1908_s6 + $0xe8] sm:$0xff] %v928_v8 }
 0x188   : >> { %931 = vst [vmem:[%s1908_s6 + $0xf0] sm:$0xff] %v930_v9 }
 0x189   : >> { %933 = vst [vmem:[%s1908_s6 + $0xf8] sm:$0xff] %v932_v10  ;;  %s2482_s6 = smov %s2362_s29 }
 0x18a PF: > { %s2428_s4 = sand.u32 31, %s859_s5   ;;  %s1371_s11 = sshll.u32 %s2316_s30, 8 }
 0x18b   : > { %s945_s10 = scalar_lea.vmem %s2159_s28, %s1371_s11 [#allocation4]   ;;  %s947_s14 = scalar_lea.vmem %s2169_s12, %s1371_s11  }
 0x18c   : > { %p1347_p11 = scmp.le.s32.totalorder %s2428_s4, 0 }
 0x18d   : > { %s1922_s8 = smov (!%p1347_p11), %s947_s14   ;;  %s1926_s26 = smov (!%p1347_p11), %s945_s10  }
 0x18e   : > { %1196 = sbr.rel (%p1347_p11) target bundleno = 411 (0x19b), region = 320  ;;  %s1930_s24 = smov (!%p1347_p11), 0  }
 0x18f   : > { %s1934_s27 = smov (!%p1347_p11), 0  }
 0x193 LB: >> { %v957_v11 = vld [vmem:[%s1928_s26] sm:$0xff]  ;;  %s959_s5 = sadd.s32 1, %s1932_s24  ;;  %s951_s27 = sadd.s32 1, %s1936_s27   ;;  %s1936_s27 = sphi %s1934_s27, %s951_s27   ;;  %s1932_s24 = sphi %s1930_s24, %s1931_s24   ;;  %s1928_s26 = sphi %s1926_s26, %s964_s26   ;;  %s1924_s8 = sphi %s1922_s8, %s965_s8  }
 0x194   : >> { %958 = vst [vmem:[%s1924_s8] sm:$0xff] %v957_v11  ;;  %p960_p12 = scmp.ge.s32.totalorder %s959_s5, %s2428_s4  ;;  %p950_p13 = scmp.ge.s32.totalorder %s951_s27, %s2428_s4 }
 0x196   : >> { %s2506_s5 = smov (%p960_p12, %s959_s5), 0  ;;  %953 = sbr.rel (!%p950_p13) target bundleno = 403 (0x193), region = 326 }
 0x197   : >> { %s1348_s30 = sshll.u32 %s2506_s5, 3  ;;  %s1931_s24 = smov %s2506_s5  }
 0x198   : >> { %s964_s26 = scalar_lea.vmem %s945_s10, %s1348_s30 [#allocation4]   ;;  %s965_s8 = scalar_lea.vmem %s947_s14, %s1348_s30  }
 0x19b PF: > { %s1941_s6 = smov 1  }
 0x19c   : > { %s966_s19 = sshll.u32 %s1941_s6, %s2176_s21 }
 0x19d   : > { %s1350_s20 = sadd.s32 4294967295, %s966_s19 }
 0x19e   : > { %v976_v12 = vld [vmem:[%s856_s25] sm:%s1350_s20] }
 0x19f   : > { %977 = vst [vmem:[%s858_s18] sm:%s1350_s20] %v976_v12 }
 0x1a0 PF: > { %p1351_p6 = scmp.ge.u32.totalorder %s2171_s7, 8 }
 0x1a1   : > { %s1942_s23 = smov (!%p1351_p6), 1  }
 0x1a2   : > { %726 = sbr.rel (%p1351_p6) target bundleno = 425 (0x1a9), region = 122  ;;  %s727_s29 = sshll.u32 (!%p1351_p6), %s1942_s23, %s2171_s7 }
 0x1a3   : > { %s1352_s4 = sadd.s32 (!%p1351_p6), 4294967295, %s727_s29 }
 0x1a7   : > { %v737_v13 = vld [vmem:[%s2159_s28] sm:%s1352_s4] }
 0x1a8   : > { %738 = vst [vmem:[%s2169_s12] sm:%s1352_s4] %v737_v13 }
 0x1a9 PF: > { %s13_s16 = sadd.s32 1, %s1840_s16   ;;  %s2485_s12 = smov %s1828_s13 }
 0x1aa   : > { %p10_p0 = scmp.ge.s32.totalorder %s13_s16, 4   ;;  %s2486_s13 = smov %s2003_s22 }
 0x1ab   : > { %s2487_s14 = smov %s1836_s15  ;;  %s2488_s15 = smov %s2490_s17 }
 0x1ac   :  { %12 = sbr.rel (!%p10_p0) target bundleno = 3 (0x3), region = 337 }

// kernel: _lambda_.19
= control target key start
LH: loop header
LB: loop body
LE: loop exit
PB: predicated region body
PF: predicated region fallthrough
CT: control target
= control target key end

     0   :  { %s930_s18 = smov 0   ;;  %s932_s19 = smov 0   ;;  %s1107_s0 = inlined_call_operand.vmem [shape: f32[2,32,64], index: 0, kind: input, shape index: {}]   ;;  %s1108_s1 = inlined_call_operand.vmem [shape: f32[2,1,64], index: 1, kind: input, shape index: {}]   ;;  %s1109_s2 = inlined_call_operand.vmem [shape: f32[2,1,64], index: 2, kind: input, shape index: {}]   ;;  %s1110_s3 = inlined_call_operand.vmem [shape: bf16[64,192], index: 3, kind: input, shape index: {}]   ;;  %s1111_s4 = inlined_call_operand.vmem [shape: f32[1,192], index: 4, kind: input, shape index: {}]   ;;  %s1112_s5 = inlined_call_operand.vmem [shape: bf16[2,32,192], index: 5, kind: output, shape index: {}]  }
   0x1   :  { %s934_s20 = smov 0  }
   0x2 LB: > { %s34_s21 = sadd.s32 1, %s893_s19  ;;  %p768_p0 = scmp.ge.s32.totalorder %s897_s20, 1  ;;  %s897_s20 = sphi %s934_s20, %s15_s20   ;;  %s893_s19 = sphi %s932_s19, %s1116_s19   ;;  %s889_s18 = sphi %s930_s18, %s1115_s18  }
   0x3   : > { %p36_p1 = scmp.ge.s32.totalorder %s34_s21, 2  ;;  %p254_p2 = scmp.lt.s32.totalorder %s897_s20, 3 }
   0x5   : > { %s1118_s21 = smov (%p36_p1, %s34_s21), 0  ;;  %p255_p3 = pnand %p768_p0, %p254_p2 }
   0x6   : > { %p311_p4 = scmp.lt.s32.totalorder (!%p255_p3), %s889_s18, 1 }
   0x7   : > { %258 = sbr.rel (%p255_p3) target bundleno = 447 (0x1bf), region = 40 }
   0xc   : > { %s1120_s18 = smov (!%p311_p4, %s889_s18), 1  ;;  %vm362_vm0 = vcmask 523264   ;;  %v899_v8 = vmov 64.0   ;;  %v807_v35 = vld [vmem:[%s1110_s3 + $0x30] sm:$0xf]  ;;  %vm479_vm11 = vcmask 519168  }
   0xd   : > { %s819_s22 = sshll.u32 %s1120_s18, 5  ;;  %s322_s25 = scalar_lea.vmem %s1108_s1, %s1120_s18  ;;  %865 = vrcp.f32 %v899_v8  ;;  %v830_v36 = vld [vmem:[%s1110_s3 + $0x34] sm:$0xf0]  ;;  %v829_v37 = vld [vmem:[%s1110_s3 + $0x34] sm:$0xf]  ;;  %vm601_vm15 = vcmask 1043456  }
   0xe   : > { %s318_s28 = scalar_lea.vmem %s1107_s0, %s819_s22  ;;  %v808_v40 = vor.u32 %v830_v36, %v807_v35  ;;  %v809_v41 = vld [vmem:[%s1110_s3 + $0x38] sm:$0xf0]  ;;  %v799_v47 = vld [vmem:[%s1110_s3 + $0x20] sm:$0xf]  ;;  %v828_v48 = vld [vmem:[%s1110_s3 + $0x24] sm:$0xf0]  ;;  %s325_s24 = scalar_lea.vmem %s1109_s2, %s1120_s18 }
   0xf   : > { %v360_v0 = vld [vmem:[%s318_s28 + $0x10] sm:$0xff]  ;;  %v358_v1 = vld [vmem:[%s318_s28] sm:$0xff]  ;;  %v361_v4 = vld [vmem:[%s318_s28 + $0x18] sm:$0xff]  ;;  %v812_v44 = vor.u32 %v829_v37, %v809_v41  ;;  %v800_v51 = vor.u32 %v828_v48, %v799_v47  ;;  %s350_s6 = scalar_lea.vmem %s1112_s5, %s819_s22 }
  0x10   : > { %v369_v2 = vsel %vm362_vm0, %v360_v0, 0.0  ;;  %v363_v3 = vsel %vm362_vm0, %v358_v1, 0.0  ;;  %v359_v5 = vld [vmem:[%s318_s28 + $0x8] sm:$0xff]  ;;  %v372_v6 = vsel %vm362_vm0, %v361_v4, 0.0  ;;  %563 = vmatpush.bf16.msra.mxu0 %v808_v40  ;;  %831 = vmatpush.bf16.msra.mxu2 %v808_v40  ;;  %v827_v49 = vld [vmem:[%s1110_s3 + $0x24] sm:$0xf] }
  0x11   : > { %370 = vadd.xlane.f32.xlu0 %v369_v2  ;;  %364 = vadd.xlane.f32.xlu1 %v363_v3  ;;  %v366_v7 = vsel %vm362_vm0, %v359_v5, 0.0  ;;  %v801_v50 = vld [vmem:[%s1110_s3 + $0x28] sm:$0xf0]  ;;  %v791_v53 = vld [vmem:[%s1110_s3 + $0x10] sm:$0xf] }
  0x12   : > { %582 = vmatpush.bf16.msra.mxu1 %v812_v44  ;;  %835 = vmatpush.bf16.msra.mxu3 %v812_v44  ;;  %v804_v52 = vor.u32 %v827_v49, %v801_v50  ;;  %v826_v54 = vld [vmem:[%s1110_s3 + $0x14] sm:$0xf0]  ;;  %v825_v55 = vld [vmem:[%s1110_s3 + $0x14] sm:$0xf]  ;;  %v793_v59 = vld [vmem:[%s1110_s3 + $0x18] sm:$0xf0] }
  0x13   : > { %v866_v9 = vpop.eup %865  ;;  %v792_v58 = vor.u32 %v826_v54, %v791_v53  ;;  %v783_v60 = vld [vmem:[%s1110_s3] sm:$0xf]  ;;  %v824_v61 = vld [vmem:[%s1110_s3 + $0x4] sm:$0xf0]  ;;  %v785_v2 = vld [vmem:[%s1110_s3 + $0x8] sm:$0xf0] }
  0x14   : > { %v376_v10 = vmul.f32 64.0, %v866_v9  ;;  %vm380_vm1 = vweird.f32 %v866_v9  ;;  %564 = vmatpush.bf16.msra.mxu0 %v800_v51  ;;  %832 = vmatpush.bf16.msra.mxu2 %v800_v51 }
  0x16   : > { %v377_v11 = vsub.f32 1.0, %v376_v10  ;;  %583 = vmatpush.bf16.msra.mxu1 %v804_v52  ;;  %836 = vmatpush.bf16.msra.mxu3 %v804_v52 }
  0x18   : > { %v378_v12 = vmul.f32 %v866_v9, %v377_v11  ;;  %565 = vmatpush.bf16.msra.mxu0 %v792_v58  ;;  %833 = vmatpush.bf16.msra.mxu2 %v792_v58  ;;  %v458_v11 = vld [vmem:[%s325_s24] sm:$0x1] }
  0x19   : > { %373 = vadd.xlane.f32.xlu0 %v372_v6  ;;  %367 = vadd.xlane.f32.xlu1 %v366_v7  ;;  %v784_v6 = vor.u32 %v824_v61, %v783_v60 }
  0x1a   : > { %v379_v13 = vadd.f32 %v866_v9, %v378_v12 }
  0x1c   : > { %v964_v14 = vsel %vm380_vm1, %v866_v9, %v379_v13  ;;  %566 = vmatpush.bf16.msra.mxu0 %v784_v6  ;;  %834 = vmatpush.bf16.msra.mxu2 %v784_v6  ;;  %vm602_vm1 = vcmask 523268  }
  0x84   : > { %v371_v15 = vpop.xlane.xlu0 %370  ;;  %v365_v16 = vpop.xlane.xlu1 %364 }
  0x85   : > { %v384_v17 = vmul.f32 %v964_v14, %v371_v15  ;;  %v382_v18 = vmul.f32 %v964_v14, %v365_v16  ;;  %v459_v15 = vadd.f32 1.0, %v458_v11 }
  0x87   : > { %v968_v19 = vsub.f32 %v360_v0, %v384_v17  ;;  %v970_v20 = vsub.f32 %v358_v1, %v382_v18  ;;  %v796_v0 = vor.u32 %v825_v55, %v793_v59  ;;  %v823_v1 = vld [vmem:[%s1110_s3 + $0x4] sm:$0xf] }
  0x88   : > { %v788_v9 = vor.u32 %v823_v1, %v785_v2 }
  0x89   : > { %v392_v21 = vmul.f32 %v968_v19, %v968_v19  ;;  %v390_v22 = vmul.f32 %v970_v20, %v970_v20  ;;  %584 = vmatpush.bf16.msra.mxu1 %v796_v0  ;;  %837 = vmatpush.bf16.msra.mxu3 %v796_v0 }
  0x8b   : > { %v400_v23 = vsel %vm362_vm0, %v392_v21, 0.0  ;;  %v394_v24 = vsel %vm362_vm0, %v390_v22, 0.0 }
  0x8c   : > { %401 = vadd.xlane.f32.xlu2 %v400_v23  ;;  %v374_v25 = vpop.xlane.xlu0 %373  ;;  %395 = vadd.xlane.f32.xlu0 %v394_v24  ;;  %v368_v26 = vpop.xlane.xlu1 %367 }
  0x8d   : > { %v385_v27 = vmul.f32 %v964_v14, %v374_v25  ;;  %v383_v28 = vmul.f32 %v964_v14, %v368_v26  ;;  %585 = vmatpush.bf16.msra.mxu1 %v788_v9  ;;  %838 = vmatpush.bf16.msra.mxu3 %v788_v9  ;;  %v461_v25 = vperm.slane %v459_v15, 0 }
  0x8f   : > { %v980_v29 = vsub.f32 %v361_v4, %v385_v27  ;;  %v982_v30 = vsub.f32 %v359_v5, %v383_v28 }
  0x91   : > { %v393_v31 = vmul.f32 %v980_v29, %v980_v29  ;;  %v391_v32 = vmul.f32 %v982_v30, %v982_v30 }
  0x93   : > { %v403_v33 = vsel %vm362_vm0, %v393_v31, 0.0  ;;  %v397_v34 = vsel %vm362_vm0, %v391_v32, 0.0  ;;  %v864_v32 = vld [vmem:[%s322_s25] ss:$0 sm:$0xff] }
  0x94   : > { %404 = vadd.xlane.f32.xlu2 %v403_v33  ;;  %398 = vadd.xlane.f32.xlu1 %v397_v34 }
  0xff   : > { %v402_v38 = vpop.xlane.xlu2 %401  ;;  %v396_v39 = vpop.xlane.xlu0 %395 }
 0x100   : > { %v408_v42 = vmul.f32 %v402_v38, %v964_v14  ;;  %v406_v43 = vmul.f32 %v396_v39, %v964_v14 }
 0x102   : > { %v1004_v45 = vadd.f32 1e-06, %v408_v42  ;;  %v1006_v46 = vadd.f32 1e-06, %v406_v43 }
 0x104   : > { %867 = vrsqrt.f32 %v1004_v45  ;;  %vm420_vm3 = vweird.f32 %v1006_v46  ;;  %vm440_vm5 = vweird.f32 %v1004_v45 }
 0x105   : > { %869 = vrsqrt.f32 %v1006_v46 }
 0x107   : > { %v405_v56 = vpop.xlane.xlu2 %404  ;;  %v399_v57 = vpop.xlane.xlu1 %398 }
 0x108   : > { %v409_v62 = vmul.f32 %v405_v56, %v964_v14  ;;  %v407_v63 = vmul.f32 %v399_v57, %v964_v14 }
 0x10a   : > { %v868_v3 = vpop.eup %867  ;;  %v413_v4 = vadd.f32 1e-06, %v409_v62  ;;  %v1052_v5 = vadd.f32 1e-06, %v407_v63 }
 0x10b   : > { %v870_v7 = vpop.eup %869  ;;  %v435_v8 = vmul.f32 %v868_v3, %v1004_v45  ;;  %vm441_vm2 = vweird.f32 %v868_v3 }
 0x10c   : > { %v415_v10 = vmul.f32 %v870_v7, %v1006_v46  ;;  %871 = vrsqrt.f32 %v413_v4  ;;  %vm421_vm4 = vweird.f32 %v870_v7  ;;  %vm442_vm6 = vmor %vm440_vm5, %vm441_vm2  ;;  %vm430_vm9 = vweird.f32 %v1052_v5 }
 0x10d   : > { %v436_v12 = vmul.f32 %v868_v3, %v435_v8  ;;  %873 = vrsqrt.f32 %v1052_v5  ;;  %vm422_vm7 = vmor %vm420_vm3, %vm421_vm4  ;;  %vm450_vm12 = vweird.f32 %v413_v4 }
 0x10e   : > { %v416_v13 = vmul.f32 %v870_v7, %v415_v10  ;;  %vm1086_vm2 = vmor %vm602_vm1, %vm601_vm15 }
 0x10f   : > { %v437_v14 = vmul.f32 0.5, %v436_v12 }
 0x110   : > { %v417_v16 = vmul.f32 0.5, %v416_v13 }
 0x111   : > { %v438_v17 = vsub.f32 1.5, %v437_v14 }
 0x112   : > { %v872_v18 = vpop.eup %871  ;;  %v418_v21 = vsub.f32 1.5, %v417_v16 }
 0x113   : > { %v874_v22 = vpop.eup %873  ;;  %v439_v23 = vmul.f32 %v868_v3, %v438_v17  ;;  %v445_v24 = vmul.f32 %v872_v18, %v413_v4  ;;  %vm451_vm8 = vweird.f32 %v872_v18 }
 0x114   : > { %v419_v26 = vmul.f32 %v870_v7, %v418_v21  ;;  %v425_v27 = vmul.f32 %v874_v22, %v1052_v5  ;;  %vm431_vm10 = vweird.f32 %v874_v22  ;;  %vm452_vm13 = vmor %vm450_vm12, %vm451_vm8 }
 0x115   : > { %v443_v28 = vsel %vm442_vm6, %v868_v3, %v439_v23  ;;  %v446_v31 = vmul.f32 %v872_v18, %v445_v24  ;;  %vm432_vm14 = vmor %vm430_vm9, %vm431_vm10 }
 0x116   : > { %v456_v33 = vmul.f32 %v443_v28, %v968_v19  ;;  %v423_v34 = vsel %vm422_vm7, %v870_v7, %v419_v26  ;;  %v426_v35 = vmul.f32 %v874_v22, %v425_v27 }
 0x117   : > { %v454_v36 = vmul.f32 %v423_v34, %v970_v20  ;;  %v447_v37 = vmul.f32 0.5, %v446_v31 }
 0x118   : > { %v465_v38 = vmul.f32 %v461_v25, %v456_v33  ;;  %v427_v39 = vmul.f32 0.5, %v426_v35 }
 0x119   : > { %v463_v40 = vmul.f32 %v461_v25, %v454_v36  ;;  %v448_v41 = vsub.f32 1.5, %v447_v37 }
 0x11a   : > { %v473_v42 = vadd.f32 %v864_v32, %v465_v38  ;;  %v428_v43 = vsub.f32 1.5, %v427_v39 }
 0x11b   : > { %v471_v44 = vadd.f32 %v864_v32, %v463_v40  ;;  %v449_v45 = vmul.f32 %v872_v18, %v448_v41 }
 0x11c   : > { %v477_v19 = vpack.c.bf16 %v473_v42, %v473_v42  ;;  %v429_v46 = vmul.f32 %v874_v22, %v428_v43 }
 0x11d   : > { %v475_v47 = vpack.c.bf16 %v471_v44, %v471_v44  ;;  %v453_v20 = vsel %vm452_vm13, %v872_v18, %v449_v45 }
 0x11e   : > { %482 = vst.msk [vmem:[#allocation2 + $0x8] sm:$0xf] %vm479_vm11, %v477_v19  ;;  %v457_v48 = vmul.f32 %v453_v20, %v980_v29  ;;  %v433_v49 = vsel %vm432_vm14, %v874_v22, %v429_v46  ;;  %v496_v29 = vld [vmem:[%s1111_s4] sm:$0x3] }
 0x11f   : > { %480 = vst.msk [vmem:[#allocation2] sm:$0xf] %vm479_vm11, %v475_v47  ;;  %v455_v50 = vmul.f32 %v433_v49, %v982_v30  ;;  %v498_v30 = vperm.slane %v496_v29, 0  ;;  %v499_v59 = vperm.slane %v496_v29, 1 }
 0x120   : > { %v466_v51 = vmul.f32 %v461_v25, %v457_v48 }
 0x121   : > { %v464_v52 = vmul.f32 %v461_v25, %v455_v50 }
 0x122   : > { %v474_v53 = vadd.f32 %v864_v32, %v466_v51 }
 0x123   : > { %v472_v54 = vadd.f32 %v864_v32, %v464_v52 }
 0x124   : > { %v478_v55 = vpack.c.bf16 %v474_v53, %v474_v53 }
 0x125   : > { %v476_v56 = vpack.c.bf16 %v472_v54, %v472_v54 }
 0x126   : > { %483 = vst.msk [vmem:[#allocation2 + $0xc] sm:$0xf] %vm479_vm11, %v478_v55 }
 0x127   : > { %481 = vst.msk [vmem:[#allocation2 + $0x4] sm:$0xf] %vm479_vm11, %v476_v56 }
 0x12d   : > { %v822_v57 = vld [vmem:[#allocation2 + $0x8] sm:$0xff] }
 0x12e   : > { %v821_v58 = vld [vmem:[#allocation2] sm:$0xff]  ;;  %814 = vmatmul.msk.bf16.vlgmr.msra.gmra.mxu2 %vm362_vm0, %v822_v57  ;;  %816 = vmatmul.msk.bf16.vlgmr.msra.gmra.mxu3 %vm362_vm0, %v822_v57 }
 0x12f   : > { %813 = vmatmul.msk.bf16.vlgmr.msra.gmra.mxu0 %vm362_vm0, %v821_v58  ;;  %815 = vmatmul.msk.bf16.vlgmr.msra.gmra.mxu1 %vm362_vm0, %v821_v58 }
 0x1ac   : > { %v568_v60 = vpop.f32.mrf.mxu0  ;;  %v587_v61 = vpop.f32.mrf.mxu1 }
 0x1ad   : > { %v569_v62 = vadd.f32 %v568_v60, %v498_v30  ;;  %v588_v63 = vadd.f32 %v587_v61, %v499_v59 }
 0x1af   : > { %v597_v1 = vpack.c.bf16 %v588_v63, %v569_v62 }
 0x1b1   : > { %604 = vst.msk [vmem:[%s350_s6] sm:$0xff] %vm1086_vm2, %v597_v1  ;;  %v573_v2 = vpop.f32.mrf.mxu2  ;;  %v592_v3 = vpop.f32.mrf.mxu3 }
 0x1b2   : > { %v574_v4 = vadd.f32 %v573_v2, %v498_v30  ;;  %v593_v5 = vadd.f32 %v592_v3, %v499_v59 }
 0x1b4   : > { %v599_v6 = vpack.c.bf16 %v593_v5, %v574_v4  ;;  %v570_v7 = vpop.f32.mrf.mxu0  ;;  %v589_v8 = vpop.f32.mrf.mxu1 }
 0x1b5   : > { %v571_v9 = vadd.f32 %v570_v7, %v498_v30  ;;  %v590_v10 = vadd.f32 %v589_v8, %v499_v59 }
 0x1b6   : > { %606 = vst.msk [vmem:[%s350_s6 + $0x10] sm:$0xff] %vm1086_vm2, %v599_v6 }
 0x1b7   : > { %v598_v11 = vpack.c.bf16 %v590_v10, %v571_v9 }
 0x1b9   : > { %605 = vst.msk [vmem:[%s350_s6 + $0x8] sm:$0xff] %vm1086_vm2, %v598_v11  ;;  %v575_v12 = vpop.f32.mrf.mxu2  ;;  %v594_v13 = vpop.f32.mrf.mxu3 }
 0x1ba   : > { %v576_v14 = vadd.f32 %v575_v12, %v498_v30  ;;  %v595_v15 = vadd.f32 %v594_v13, %v499_v59 }
 0x1bc   : > { %v600_v16 = vpack.c.bf16 %v595_v15, %v576_v14 }
 0x1be   : > { %607 = vst.msk [vmem:[%s350_s6 + $0x18] sm:$0xff] %vm1086_vm2, %v600_v16 }
 0x1bf PF: > { %s15_s20 = sadd.s32 1, %s897_s20   ;;  %s1115_s18 = smov %s893_s19 }
 0x1c0   : > { %p12_p5 = scmp.ge.s32.totalorder %s15_s20, 4   ;;  %s1116_s19 = smov %s1118_s21 }
 0x1c2   :  { %14 = sbr.rel (!%p12_p5) target bundleno = 2 (0x2), region = 86 }

// kernel: _lambda_.20
= control target key start
LH: loop header
LB: loop body
LE: loop exit
PB: predicated region body
PF: predicated region fallthrough
CT: control target
= control target key end

     0   :  { %s877_s12 = smov 0   ;;  %s879_s13 = smov 0   ;;  %s972_s0 = inlined_call_operand.vmem [shape: bf16[8,32,16], index: 0, kind: input, shape index: {}]   ;;  %s973_s1 = inlined_call_operand.vmem [shape: bf16[8,32,16], index: 1, kind: input, shape index: {}]   ;;  %s974_s2 = inlined_call_operand.vmem [shape: bf16[8,32,16], index: 2, kind: input, shape index: {}]   ;;  %s975_s3 = inlined_call_operand.vmem [shape: bf16[8,32,16], index: 3, kind: output, shape index: {}]  }
   0x1   :  { %s881_s14 = smov 0  }
   0x2 LB: > { %s32_s15 = sadd.s32 1, %s848_s13  ;;  %p723_p0 = scmp.ge.s32.totalorder %s852_s14, 1  ;;  %s852_s14 = sphi %s881_s14, %s13_s14   ;;  %s848_s13 = sphi %s879_s13, %s977_s13   ;;  %s844_s12 = sphi %s877_s12, %s976_s12  }
   0x3   : > { %p34_p1 = scmp.ge.s32.totalorder %s32_s15, 8  ;;  %p199_p2 = scmp.lt.s32.totalorder %s852_s14, 9 }
   0x5   : > { %s979_s15 = smov (%p34_p1, %s32_s15), 0  ;;  %p200_p3 = pnand %p723_p0, %p199_p2 }
   0x6   : > { %p250_p4 = scmp.lt.s32.totalorder (!%p200_p3), %s844_s12, 7 }
   0x7   : > { %203 = sbr.rel (%p200_p3) target bundleno = 706 (0x2c2), region = 32 }
   0xc   : > { %s981_s12 = smov (!%p250_p4, %s844_s12), 7  ;;  %vm303_vm0 = vcmask 130048   ;;  %vm294_vm1 = vcmask 7168   ;;  %v854_v6 = vmov -inf   ;;  %vm376_vm2 = vcmask 261120  }
   0xd   : > { %s895_s16 = sshll.u32 %s981_s12, 4  ;;  %295 = vst.msk [vmem:[#allocation2] sm:$0xff] %vm294_vm1, %v854_v6  ;;  %v855_v15 = vmov 0   ;;  %v856_v16 = vmov 0.0   ;;  %vm588_vm3 = vcmask 125952  }
   0xe   : > { %s267_s19 = scalar_lea.vmem %s973_s1, %s895_s16  ;;  %s257_s22 = scalar_lea.vmem %s972_s0, %s895_s16  ;;  %296 = vst.msk [vmem:[#allocation2 + $0x8] sm:$0xff] %vm294_vm1, %v854_v6  ;;  %804 = vset.pattern.permute.xlu0 %v855_v15  ;;  %803 = vset.pattern.permute.xlu2 %v855_v15 }
   0xf   : > { %v769_v0 = vld [vmem:[%s267_s19 + $0x8] sm:$0xff]  ;;  %v768_v2 = vld [vmem:[%s267_s19] sm:$0xff]  ;;  %297 = vst.msk [vmem:[#allocation2 + $0x10] sm:$0xff] %vm294_vm1, %v854_v6  ;;  %805 = vset.pattern.permute.xlu1 %v855_v15  ;;  %s277_s25 = scalar_lea.vmem %s974_s2, %s895_s16  ;;  %s287_s28 = scalar_lea.vmem %s975_s3, %s895_s16 }
  0x10   : > { %v351_v1 = vsel %vm303_vm0, %v769_v0, 0  ;;  %v348_v3 = vsel %vm303_vm0, %v768_v2, 0  ;;  %v766_v4 = vld [vmem:[%s257_s22] sm:$0xff]  ;;  %v767_v5 = vld [vmem:[%s257_s22 + $0x8] sm:$0xff]  ;;  %298 = vst.msk [vmem:[#allocation2 + $0x18] sm:$0xff] %vm294_vm1, %v854_v6 }
  0x11   : > { %359 = vmatpush.bf16.xpose.msra.mxu0 %v351_v1  ;;  %772 = vmatpush.bf16.xpose.msra.mxu2 %v351_v1  ;;  %301 = vst.msk [vmem:[#allocation3 + $0x10] sm:$0xff] %vm294_vm1, %v856_v16  ;;  %v771_v33 = vld [vmem:[%s277_s25 + $0x8] sm:$0xff]  ;;  %v770_v34 = vld [vmem:[%s277_s25] sm:$0xff] }
  0x12   : > { %299 = vst.msk [vmem:[#allocation3] sm:$0xff] %vm294_vm1, %v856_v16  ;;  %774 = vmatpush.bf16.msra.mxu3 %v771_v33  ;;  %520 = vmatpush.bf16.msra.mxu1 %v771_v33 }
  0x13   : > { %300 = vst.msk [vmem:[#allocation3 + $0x8] sm:$0xff] %vm294_vm1, %v856_v16 }
  0x14   : > { %302 = vst.msk [vmem:[#allocation3 + $0x18] sm:$0xff] %vm294_vm1, %v856_v16  ;;  %v372_v17 = vld [vmem:[#allocation2] sm:$0xff] }
  0x15   : > { %304 = vst.msk [vmem:[#allocation4] sm:$0xff] %vm303_vm0, %v856_v16  ;;  %v373_v23 = vld [vmem:[#allocation2 + $0x8] sm:$0xff] }
  0x16   : > { %305 = vst.msk [vmem:[#allocation4 + $0x8] sm:$0xff] %vm303_vm0, %v856_v16  ;;  %v374_v21 = vld [vmem:[#allocation2 + $0x10] sm:$0xff]  ;;  %775 = vmatpush.bf16.msra.mxu3 %v770_v34  ;;  %521 = vmatpush.bf16.msra.mxu1 %v770_v34 }
  0x17   : > { %306 = vst.msk [vmem:[#allocation4 + $0x10] sm:$0xff] %vm303_vm0, %v856_v16  ;;  %v375_v29 = vld [vmem:[#allocation2 + $0x18] sm:$0xff] }
  0x18   : > { %307 = vst.msk [vmem:[#allocation4 + $0x18] sm:$0xff] %vm303_vm0, %v856_v16  ;;  %v439_v0 = vld [vmem:[#allocation3 + $0x10] sm:$0xff] }
  0x19   : > { %360 = vmatpush.bf16.xpose.msra.mxu0 %v348_v3  ;;  %773 = vmatpush.bf16.xpose.msra.mxu2 %v348_v3  ;;  %v437_v6 = vld [vmem:[#allocation3] sm:$0xff] }
  0x1b   : > { %v440_v34 = vld [vmem:[#allocation3 + $0x18] sm:$0xff] }
  0x20   : > { %748 = vmatmul.msk.bf16.vlgmr.msra.gmra.mxu0 %vm303_vm0, %v766_v4  ;;  %749 = vmatmul.msk.bf16.vlgmr.msra.gmra.mxu2 %vm303_vm0, %v767_v5 }
  0x9d   : > { %v913_v7 = vpop.f32.mrf.mxu0 }
  0x9e   : > { %v377_v8 = vsel %vm376_vm2, %v913_v7, -inf }
  0x9f   : > { %378 = vmax.xlane.f32.xlu1 %v377_v8 }
  0xa3   : > { %v367_v9 = vpop.f32.mrf.mxu2 }
  0xa4   : > { %v383_v10 = vsel %vm376_vm2, %v367_v9, -inf }
  0xa5   : > { %384 = vmax.xlane.f32.xlu0 %v383_v10  ;;  %v918_v11 = vpop.f32.mrf.mxu0 }
  0xa6   : > { %v380_v12 = vsel %vm376_vm2, %v918_v11, -inf }
  0xa7   : > { %381 = vmax.xlane.f32.xlu1 %v380_v12 }
  0xab   : > { %v369_v13 = vpop.f32.mrf.mxu2 }
  0xac   : > { %v386_v14 = vsel %vm376_vm2, %v369_v13, -inf }
  0xad   : > { %387 = vmax.xlane.f32.xlu0 %v386_v14 }
 0x112   : > { %v379_v18 = vpop.xlane.xlu1 %378 }
 0x113   : > { %v389_v19 = vmax.f32 %v372_v17, %v379_v18  ;;  %v466_v18 = vld [vmem:[#allocation4] sm:$0xff] }
 0x115   : > { %v393_v20 = vsub.f32 %v372_v17, %v389_v19  ;;  %541 = vst.msk [vmem:[#allocation2] sm:$0xff] %vm294_vm1, %v389_v19  ;;  %407 = vperm.xlu0 %804, %v389_v19   ;;  %v468_v17 = vld [vmem:[#allocation4 + $0x10] sm:$0xff] }
 0x117   : > { %v397_v56 = vmul.f32 1.442695, %v393_v20 }
 0x118   : > { %v385_v22 = vpop.xlane.xlu0 %384 }
 0x119   : > { %v391_v24 = vmax.f32 %v374_v21, %v385_v22 }
 0x11a   : > { %v382_v25 = vpop.xlane.xlu1 %381 }
 0x11b   : > { %v395_v26 = vsub.f32 %v374_v21, %v391_v24  ;;  %543 = vst.msk [vmem:[#allocation2 + $0x10] sm:$0xff] %vm294_vm1, %v391_v24  ;;  %v390_v27 = vmax.f32 %v373_v23, %v382_v25  ;;  %417 = vperm.xlu2 %803, %v391_v24  }
 0x11d   : > { %v394_v28 = vsub.f32 %v373_v23, %v390_v27  ;;  %542 = vst.msk [vmem:[#allocation2 + $0x8] sm:$0xff] %vm294_vm1, %v390_v27  ;;  %412 = vperm.xlu1 %805, %v390_v27   ;;  %v401_v57 = vmul.f32 1.442695, %v395_v26 }
 0x11f   : > { %v399_v58 = vmul.f32 1.442695, %v394_v28 }
 0x120   : > { %v388_v30 = vpop.xlane.xlu0 %387 }
 0x121   : > { %v392_v31 = vmax.f32 %v375_v29, %v388_v30 }
 0x123   : > { %v396_v32 = vsub.f32 %v375_v29, %v392_v31  ;;  %544 = vst.msk [vmem:[#allocation2 + $0x18] sm:$0xff] %vm294_vm1, %v392_v31  ;;  %422 = vperm.xlu2 %803, %v392_v31   ;;  %v467_v29 = vld [vmem:[#allocation4 + $0x8] sm:$0xff] }
 0x125   : > { %v403_v63 = vmul.f32 1.442695, %v396_v32 }
 0x175   : > { %v418_v35 = vpop.permute.xlu2 %417 }
 0x176   : > { %v427_v36 = vsub.f32 %v367_v9, %v418_v35 }
 0x178   : > { %v433_v37 = vmul.f32 1.442695, %v427_v36 }
 0x17a   : > { %806 = vpow2.f32 %v433_v37 }
 0x17d   : > { %v423_v38 = vpop.permute.xlu2 %422 }
 0x17e   : > { %v428_v39 = vsub.f32 %v369_v13, %v423_v38  ;;  %v469_v38 = vld [vmem:[#allocation4 + $0x18] sm:$0xff] }
 0x180   : > { %v807_v40 = vpop.eup %806  ;;  %v435_v41 = vmul.f32 1.442695, %v428_v39 }
 0x181   : > { %v451_v42 = vsel %vm376_vm2, %v807_v40, 0.0 }
 0x182   : > { %808 = vpow2.f32 %v435_v41  ;;  %452 = vadd.xlane.f32.xlu0 %v451_v42 }
 0x187   : > { %v408_v43 = vpop.permute.xlu0 %407 }
 0x188   : > { %v809_v44 = vpop.eup %808  ;;  %v425_v45 = vsub.f32 %v913_v7, %v408_v43 }
 0x189   : > { %v495_v46 = vpack.c.bf16 %v809_v44, %v807_v40  ;;  %v454_v62 = vsel %vm376_vm2, %v809_v44, 0.0 }
 0x18a   : > { %v429_v47 = vmul.f32 1.442695, %v425_v45 }
 0x18b   : > { %759 = vmatmul.msk.bf16.vlgmr.msra.gmra.mxu3 %vm376_vm2, %v495_v46 }
 0x18c   : > { %810 = vpow2.f32 %v429_v47 }
 0x18f   : > { %v413_v48 = vpop.permute.xlu1 %412 }
 0x190   : > { %v426_v49 = vsub.f32 %v918_v11, %v413_v48  ;;  %v438_v11 = vld [vmem:[#allocation3 + $0x8] sm:$0xff] }
 0x192   : > { %v811_v50 = vpop.eup %810  ;;  %v431_v51 = vmul.f32 1.442695, %v426_v49 }
 0x193   : > { %v445_v52 = vsel %vm376_vm2, %v811_v50, 0.0 }
 0x194   : > { %812 = vpow2.f32 %v431_v51  ;;  %446 = vadd.xlane.f32.xlu2 %v445_v52 }
 0x195   : > { %814 = vpow2.f32 %v397_v56 }
 0x196   : > { %816 = vpow2.f32 %v401_v57 }
 0x197   : > { %818 = vpow2.f32 %v399_v58 }
 0x198   : > { %820 = vpow2.f32 %v403_v63 }
 0x19a   : > { %v813_v53 = vpop.eup %812 }
 0x19b   : > { %v448_v54 = vsel %vm376_vm2, %v813_v53, 0.0  ;;  %v494_v55 = vpack.c.bf16 %v813_v53, %v811_v50  ;;  %v815_v59 = vpop.eup %814 }
 0x19c   : > { %449 = vadd.xlane.f32.xlu1 %v448_v54  ;;  %v817_v60 = vpop.eup %816  ;;  %v441_v8 = vmul.f32 %v815_v59, %v437_v6 }
 0x19d   : > { %758 = vmatmul.msk.bf16.vlgmr.msra.gmra.mxu1 %vm376_vm2, %v494_v55  ;;  %v819_v61 = vpop.eup %818  ;;  %v443_v2 = vmul.f32 %v817_v60, %v439_v0 }
 0x19e   : > { %v821_v1 = vpop.eup %820  ;;  %v442_v12 = vmul.f32 %v819_v61, %v438_v11 }
 0x19f   : > { %v444_v35 = vmul.f32 %v821_v1, %v440_v34 }
 0x1ac   : > { %472 = vperm.xlu2 %803, %v815_v59  }
 0x1b4   : > { %482 = vperm.xlu2 %803, %v817_v60  }
 0x1b5   : > { %477 = vperm.xlu1 %805, %v819_v61  }
 0x1dd   : > { %455 = vadd.xlane.f32.xlu2 %v454_v62 }
 0x1f5   : > { %v453_v3 = vpop.xlane.xlu0 %452  ;;  %487 = vperm.xlu2 %803, %v821_v1  }
 0x1f6   : > { %v459_v4 = vadd.f32 %v453_v3, %v443_v2 }
 0x1f8   : > { %464 = vst.msk [vmem:[#allocation3 + $0x10] sm:$0xff] %vm294_vm1, %v459_v4 }
 0x1ff   : > { %v550_v5 = vld [vmem:[#allocation3 + $0x10] sm:$0xff] }
 0x200   : > { %822 = vrcp.f32 %v550_v5 }
 0x206   : > { %v823_v7 = vpop.eup %822 }
 0x207   : > { %v447_v9 = vpop.xlane.xlu2 %446  ;;  %572 = vperm.xlu1 %805, %v823_v7  }
 0x208   : > { %v457_v10 = vadd.f32 %v447_v9, %v441_v8 }
 0x20a   : > { %462 = vst.msk [vmem:[#allocation3] sm:$0xff] %vm294_vm1, %v457_v10 }
 0x20e   : > { %v528_v22 = vpop.f32.mrf.mxu3 }
 0x20f   : > { %v473_v13 = vpop.permute.xlu2 %472  ;;  %v450_v14 = vpop.xlane.xlu1 %449 }
 0x210   : > { %v458_v15 = vadd.f32 %v450_v14, %v442_v12  ;;  %v490_v23 = vmul.f32 %v473_v13, %v466_v18 }
 0x211   : > { %v548_v16 = vld [vmem:[#allocation3] sm:$0xff] }
 0x212   : > { %463 = vst.msk [vmem:[#allocation3 + $0x8] sm:$0xff] %vm294_vm1, %v458_v15  ;;  %824 = vrcp.f32 %v548_v16 }
 0x216   : > { %v530_v41 = vpop.f32.mrf.mxu3 }
 0x217   : > { %v483_v19 = vpop.permute.xlu2 %482 }
 0x218   : > { %v825_v20 = vpop.eup %824  ;;  %v492_v21 = vmul.f32 %v483_v19, %v468_v17 }
 0x219   : > { %562 = vperm.xlu0 %804, %v825_v20   ;;  %v549_v24 = vld [vmem:[#allocation3 + $0x8] sm:$0xff] }
 0x21a   : > { %v535_v25 = vadd.f32 %v528_v22, %v492_v21  ;;  %v523_v26 = vpop.f32.mrf.mxu1  ;;  %826 = vrcp.f32 %v549_v24 }
 0x21b   : > { %v533_v27 = vadd.f32 %v523_v26, %v490_v23 }
 0x21c   : > { %539 = vst.msk [vmem:[#allocation4 + $0x10] sm:$0xff] %vm303_vm0, %v535_v25 }
 0x21d   : > { %537 = vst.msk [vmem:[#allocation4] sm:$0xff] %vm303_vm0, %v533_v27 }
 0x220   : > { %v827_v28 = vpop.eup %826 }
 0x221   : > { %567 = vperm.xlu2 %803, %v827_v28  }
 0x222   : > { %v525_v32 = vpop.f32.mrf.mxu1 }
 0x223   : > { %v558_v45 = vld [vmem:[#allocation4 + $0x10] sm:$0xff] }
 0x224   : > { %v556_v54 = vld [vmem:[#allocation4] sm:$0xff] }
 0x227   : > { %v478_v30 = vpop.permute.xlu1 %477 }
 0x228   : > { %v491_v31 = vmul.f32 %v478_v30, %v467_v29 }
 0x22a   : > { %v534_v33 = vadd.f32 %v525_v32, %v491_v31 }
 0x22c   : > { %538 = vst.msk [vmem:[#allocation4 + $0x8] sm:$0xff] %vm303_vm0, %v534_v33 }
 0x233   : > { %v557_v48 = vld [vmem:[#allocation4 + $0x8] sm:$0xff] }
 0x250   : > { %v456_v36 = vpop.xlane.xlu2 %455 }
 0x251   : > { %v460_v37 = vadd.f32 %v456_v36, %v444_v35 }
 0x253   : > { %465 = vst.msk [vmem:[#allocation3 + $0x18] sm:$0xff] %vm294_vm1, %v460_v37 }
 0x258   : > { %v488_v39 = vpop.permute.xlu2 %487 }
 0x259   : > { %v493_v40 = vmul.f32 %v488_v39, %v469_v38 }
 0x25a   : > { %v551_v42 = vld [vmem:[#allocation3 + $0x18] sm:$0xff] }
 0x25b   : > { %v536_v43 = vadd.f32 %v530_v41, %v493_v40  ;;  %828 = vrcp.f32 %v551_v42 }
 0x25d   : > { %540 = vst.msk [vmem:[#allocation4 + $0x18] sm:$0xff] %vm303_vm0, %v536_v43 }
 0x261   : > { %v829_v44 = vpop.eup %828 }
 0x262   : > { %577 = vperm.xlu2 %803, %v829_v44  }
 0x264   : > { %v559_v57 = vld [vmem:[#allocation4 + $0x18] sm:$0xff] }
 0x279   : > { %v573_v46 = vpop.permute.xlu1 %572 }
 0x27a   : > { %v582_v47 = vmul.f32 %v573_v46, %v558_v45 }
 0x27b   : > { %v568_v49 = vpop.permute.xlu2 %567 }
 0x27c   : > { %v586_v50 = vpack.c.bf16 %v582_v47, %v582_v47  ;;  %v581_v51 = vmul.f32 %v568_v49, %v557_v48 }
 0x27e   : > { %591 = vst.msk [vmem:[%s287_s28 + $0x8] sm:$0xf] %vm588_vm3, %v586_v50  ;;  %v585_v52 = vpack.c.bf16 %v581_v51, %v581_v51 }
 0x280   : > { %590 = vst.msk [vmem:[%s287_s28 + $0x4] sm:$0xf] %vm588_vm3, %v585_v52 }
 0x28b   : > { %v563_v53 = vpop.permute.xlu0 %562 }
 0x28c   : > { %v580_v55 = vmul.f32 %v563_v53, %v556_v54 }
 0x28e   : > { %v584_v56 = vpack.c.bf16 %v580_v55, %v580_v55 }
 0x290   : > { %589 = vst.msk [vmem:[%s287_s28] sm:$0xf] %vm588_vm3, %v584_v56 }
 0x2bc   : > { %v578_v58 = vpop.permute.xlu2 %577 }
 0x2bd   : > { %v583_v59 = vmul.f32 %v578_v58, %v559_v57 }
 0x2bf   : > { %v587_v60 = vpack.c.bf16 %v583_v59, %v583_v59 }
 0x2c1   : > { %592 = vst.msk [vmem:[%s287_s28 + $0xc] sm:$0xf] %vm588_vm3, %v587_v60 }
 0x2c2 PF: > { %s13_s14 = sadd.s32 1, %s852_s14   ;;  %s976_s12 = smov %s848_s13 }
 0x2c3   : > { %p10_p5 = scmp.ge.s32.totalorder %s13_s14, 10   ;;  %s977_s13 = smov %s979_s15 }
 0x2c5   :  { %12 = sbr.rel (!%p10_p5) target bundleno = 2 (0x2), region = 76 }

// kernel: _lambda_.21
= control target key start
LH: loop header
LB: loop body
LE: loop exit
PB: predicated region body
PF: predicated region fallthrough
CT: control target
= control target key end

     0   :  { %s850_s18 = smov 0   ;;  %s852_s19 = smov 0   ;;  %s928_s0 = inlined_call_operand.vmem [shape: bf16[2,32,64], index: 0, kind: input, shape index: {}]   ;;  %s929_s1 = inlined_call_operand.vmem [shape: bf16[64,64], index: 1, kind: input, shape index: {}]   ;;  %s930_s2 = inlined_call_operand.vmem [shape: f32[1,64], index: 2, kind: input, shape index: {}]   ;;  %s931_s3 = inlined_call_operand.vmem [shape: f32[2,1,64], index: 3, kind: input, shape index: {}]   ;;  %s932_s4 = inlined_call_operand.vmem [shape: f32[2,32,64], index: 4, kind: input, shape index: {}]   ;;  %s933_s5 = inlined_call_operand.vmem [shape: f32[2,32,64], index: 5, kind: output, shape index: {}]  }
   0x1   :  { %s854_s20 = smov 0  }
   0x2 LB: > { %s41_s21 = sadd.s32 1, %s813_s19  ;;  %p720_p0 = scmp.ge.s32.totalorder %s817_s20, 1  ;;  %s817_s20 = sphi %s854_s20, %s15_s20   ;;  %s813_s19 = sphi %s852_s19, %s935_s19   ;;  %s809_s18 = sphi %s850_s18, %s934_s18  }
   0x3   : > { %p43_p1 = scmp.ge.s32.totalorder %s41_s21, 2  ;;  %p288_p2 = scmp.lt.s32.totalorder %s817_s20, 3 }
   0x5   : > { %s937_s21 = smov (%p43_p1, %s41_s21), 0  ;;  %p289_p3 = pnand %p720_p0, %p288_p2 }
   0x6   : > { %p360_p4 = scmp.lt.s32.totalorder (!%p289_p3), %s809_s18, 1 }
   0x7   : > { %292 = sbr.rel (%p289_p3) target bundleno = 180 (0xb4), region = 40 }
   0xc   : > { %v763_v0 = vld [vmem:[%s929_s1 + $0x18] sm:$0xff]  ;;  %vm421_vm0 = vcmask 523264   ;;  %v819_v1 = vmov 0.0   ;;  %v762_v2 = vld [vmem:[%s929_s1 + $0x10] sm:$0xff]  ;;  %s939_s18 = smov (!%p360_p4, %s809_s18), 1  ;;  %v761_v3 = vld [vmem:[%s929_s1 + $0x8] sm:$0xff] }
   0xd   : > { %422 = vst.msk [vmem:[#allocation2] sm:$0xff] %vm421_vm0, %v819_v1  ;;  %487 = vmatpush.bf16.msra.mxu0 %v763_v0  ;;  %764 = vmatpush.bf16.msra.mxu1 %v763_v0  ;;  %s389_s28 = scalar_lea.vmem %s931_s3, %s939_s18  ;;  %s755_s6 = sshll.u32 %s939_s18, 4  ;;  %v760_v4 = vld [vmem:[%s929_s1] sm:$0xff] }
   0xe   : > { %423 = vst.msk [vmem:[#allocation2 + $0x8] sm:$0xff] %vm421_vm0, %v819_v1  ;;  %s370_s11 = scalar_lea.vmem %s928_s0, %s755_s6  ;;  %s756_s12 = sshll.u32 %s939_s18, 5  ;;  %v794_v15 = vld [vmem:[%s930_s2] ss:$0 sm:$0xff] }
   0xf   : > { %424 = vst.msk [vmem:[#allocation2 + $0x10] sm:$0xff] %vm421_vm0, %v819_v1  ;;  %v758_v5 = vld [vmem:[%s370_s11] sm:$0xff]  ;;  %v759_v6 = vld [vmem:[%s370_s11 + $0x8] sm:$0xff]  ;;  %s401_s17 = scalar_lea.vmem %s932_s4, %s756_s12  ;;  %s414_s26 = scalar_lea.vmem %s933_s5, %s756_s12 }
  0x10   : > { %425 = vst.msk [vmem:[#allocation2 + $0x18] sm:$0xff] %vm421_vm0, %v819_v1  ;;  %v793_v18 = vld [vmem:[%s389_s28] ss:$0 sm:$0xff]  ;;  %v527_v26 = vld [vmem:[%s401_s17 + $0x10] sm:$0xff]  ;;  %v526_v34 = vld [vmem:[%s401_s17 + $0x8] sm:$0xff] }
  0x11   : > { %488 = vmatpush.bf16.msra.mxu0 %v762_v2  ;;  %765 = vmatpush.bf16.msra.mxu1 %v762_v2  ;;  %v525_v24 = vld [vmem:[%s401_s17] sm:$0xff]  ;;  %v528_v36 = vld [vmem:[%s401_s17 + $0x18] sm:$0xff] }
  0x14   : > { %v430_v7 = vld [vmem:[#allocation2] sm:$0xff] }
  0x15   : > { %489 = vmatpush.bf16.msra.mxu0 %v761_v3  ;;  %766 = vmatpush.bf16.msra.mxu1 %v761_v3  ;;  %v431_v13 = vld [vmem:[#allocation2 + $0x8] sm:$0xff] }
  0x16   : > { %v432_v8 = vld [vmem:[#allocation2 + $0x10] sm:$0xff] }
  0x17   : > { %v433_v14 = vld [vmem:[#allocation2 + $0x18] sm:$0xff] }
  0x19   : > { %490 = vmatpush.bf16.msra.mxu0 %v760_v4  ;;  %767 = vmatpush.bf16.msra.mxu1 %v760_v4 }
  0x1c   : > { %751 = vmatmul.msk.bf16.vlgmr.msra.gmra.mxu0 %vm421_vm0, %v758_v5  ;;  %752 = vmatmul.msk.bf16.vlgmr.msra.gmra.mxu1 %vm421_vm0, %v759_v6 }
  0x99   : > { %v492_v9 = vpop.f32.mrf.mxu0  ;;  %v497_v10 = vpop.f32.mrf.mxu1 }
  0x9a   : > { %v502_v11 = vadd.f32 %v492_v9, %v430_v7  ;;  %v504_v12 = vadd.f32 %v497_v10, %v432_v8 }
  0x9c   : > { %506 = vst.msk [vmem:[#allocation2] sm:$0xff] %vm421_vm0, %v502_v11 }
  0x9d   : > { %508 = vst.msk [vmem:[#allocation2 + $0x10] sm:$0xff] %vm421_vm0, %v504_v12 }
  0xa1   : > { %v494_v16 = vpop.f32.mrf.mxu0  ;;  %v499_v17 = vpop.f32.mrf.mxu1 }
  0xa2   : > { %v503_v19 = vadd.f32 %v494_v16, %v431_v13  ;;  %v505_v20 = vadd.f32 %v499_v17, %v433_v14 }
  0xa3   : > { %v513_v21 = vld [vmem:[#allocation2] sm:$0xff] }
  0xa4   : > { %v521_v22 = vadd.f32 %v794_v15, %v513_v21  ;;  %v515_v23 = vld [vmem:[#allocation2 + $0x10] sm:$0xff]  ;;  %507 = vst.msk [vmem:[#allocation2 + $0x8] sm:$0xff] %vm421_vm0, %v503_v19 }
  0xa5   : > { %v523_v25 = vadd.f32 %v794_v15, %v515_v23  ;;  %509 = vst.msk [vmem:[#allocation2 + $0x18] sm:$0xff] %vm421_vm0, %v505_v20 }
  0xa6   : > { %v533_v27 = vmul.f32 %v793_v18, %v521_v22 }
  0xa7   : > { %v535_v28 = vmul.f32 %v793_v18, %v523_v25 }
  0xa8   : > { %v537_v29 = vadd.f32 %v533_v27, %v525_v24 }
  0xa9   : > { %v539_v30 = vadd.f32 %v535_v28, %v527_v26 }
  0xaa   : > { %541 = vst.msk [vmem:[%s414_s26] sm:$0xff] %vm421_vm0, %v537_v29 }
  0xab   : > { %543 = vst.msk [vmem:[%s414_s26 + $0x10] sm:$0xff] %vm421_vm0, %v539_v30  ;;  %v514_v31 = vld [vmem:[#allocation2 + $0x8] sm:$0xff] }
  0xac   : > { %v522_v32 = vadd.f32 %v794_v15, %v514_v31  ;;  %v516_v33 = vld [vmem:[#allocation2 + $0x18] sm:$0xff] }
  0xad   : > { %v524_v35 = vadd.f32 %v794_v15, %v516_v33 }
  0xae   : > { %v534_v37 = vmul.f32 %v793_v18, %v522_v32 }
  0xaf   : > { %v536_v38 = vmul.f32 %v793_v18, %v524_v35 }
  0xb0   : > { %v538_v39 = vadd.f32 %v534_v37, %v526_v34 }
  0xb1   : > { %v540_v40 = vadd.f32 %v536_v38, %v528_v36 }
  0xb2   : > { %542 = vst.msk [vmem:[%s414_s26 + $0x8] sm:$0xff] %vm421_vm0, %v538_v39 }
  0xb3   : > { %544 = vst.msk [vmem:[%s414_s26 + $0x18] sm:$0xff] %vm421_vm0, %v540_v40 }
  0xb4 PF: > { %s15_s20 = sadd.s32 1, %s817_s20   ;;  %s934_s18 = smov %s813_s19 }
  0xb5   : > { %p12_p5 = scmp.ge.s32.totalorder %s15_s20, 4   ;;  %s935_s19 = smov %s937_s21 }
  0xb7   :  { %14 = sbr.rel (!%p12_p5) target bundleno = 2 (0x2), region = 90 }

// kernel: _lambda_.22
= control target key start
LH: loop header
LB: loop body
LE: loop exit
PB: predicated region body
PF: predicated region fallthrough
CT: control target
= control target key end

     0   :  { %s1015_s18 = smov 0   ;;  %s1017_s19 = smov 0   ;;  %s1207_s0 = inlined_call_operand.vmem [shape: f32[2,32,64], index: 0, kind: input, shape index: {}]   ;;  %s1208_s1 = inlined_call_operand.vmem [shape: f32[2,1,64], index: 1, kind: input, shape index: {}]   ;;  %s1209_s2 = inlined_call_operand.vmem [shape: f32[2,1,64], index: 2, kind: input, shape index: {}]   ;;  %s1210_s3 = inlined_call_operand.vmem [shape: bf16[64,256], index: 3, kind: input, shape index: {}]   ;;  %s1211_s4 = inlined_call_operand.vmem [shape: f32[1,256], index: 4, kind: input, shape index: {}]   ;;  %s1212_s5 = inlined_call_operand.vmem [shape: bf16[2,32,256], index: 5, kind: output, shape index: {}]  }
   0x1   :  { %s1019_s20 = smov 0  }
   0x2 LB: > { %s34_s21 = sadd.s32 1, %s978_s19  ;;  %p837_p0 = scmp.ge.s32.totalorder %s982_s20, 1  ;;  %s982_s20 = sphi %s1019_s20, %s15_s20   ;;  %s978_s19 = sphi %s1017_s19, %s1214_s19   ;;  %s974_s18 = sphi %s1015_s18, %s1213_s18  }
   0x3   : > { %p36_p1 = scmp.ge.s32.totalorder %s34_s21, 2  ;;  %p254_p2 = scmp.lt.s32.totalorder %s982_s20, 3 }
   0x5   : > { %s1216_s21 = smov (%p36_p1, %s34_s21), 0  ;;  %p255_p3 = pnand %p837_p0, %p254_p2 }
   0x6   : > { %p311_p4 = scmp.lt.s32.totalorder (!%p255_p3), %s974_s18, 1 }
   0x7   : > { %258 = sbr.rel (%p255_p3) target bundleno = 470 (0x1d6), region = 40 }
   0xc   : > { %s1218_s18 = smov (!%p311_p4, %s974_s18), 1  ;;  %vm362_vm0 = vcmask 523264   ;;  %v984_v8 = vmov 64.0   ;;  %v876_v35 = vld [vmem:[%s1210_s3 + $0x30] sm:$0xf]  ;;  %vm479_vm11 = vcmask 519168  }
   0xd   : > { %s888_s22 = sshll.u32 %s1218_s18, 5  ;;  %s322_s25 = scalar_lea.vmem %s1208_s1, %s1218_s18  ;;  %934 = vrcp.f32 %v984_v8  ;;  %v899_v36 = vld [vmem:[%s1210_s3 + $0x34] sm:$0xf0]  ;;  %v898_v37 = vld [vmem:[%s1210_s3 + $0x34] sm:$0xf] }
   0xe   : > { %s318_s28 = scalar_lea.vmem %s1207_s0, %s888_s22  ;;  %v877_v40 = vor.u32 %v899_v36, %v876_v35  ;;  %v878_v41 = vld [vmem:[%s1210_s3 + $0x38] sm:$0xf0]  ;;  %v868_v47 = vld [vmem:[%s1210_s3 + $0x20] sm:$0xf]  ;;  %v897_v48 = vld [vmem:[%s1210_s3 + $0x24] sm:$0xf0]  ;;  %s325_s24 = scalar_lea.vmem %s1209_s2, %s1218_s18 }
   0xf   : > { %v360_v0 = vld [vmem:[%s318_s28 + $0x10] sm:$0xff]  ;;  %v358_v1 = vld [vmem:[%s318_s28] sm:$0xff]  ;;  %v361_v4 = vld [vmem:[%s318_s28 + $0x18] sm:$0xff]  ;;  %v881_v44 = vor.u32 %v898_v37, %v878_v41  ;;  %v869_v51 = vor.u32 %v897_v48, %v868_v47  ;;  %s1189_s6 = scalar_lea.vmem %s1212_s5, %s888_s22 }
  0x10   : > { %v369_v2 = vsel %vm362_vm0, %v360_v0, 0.0  ;;  %v363_v3 = vsel %vm362_vm0, %v358_v1, 0.0  ;;  %v359_v5 = vld [vmem:[%s318_s28 + $0x8] sm:$0xff]  ;;  %v372_v6 = vsel %vm362_vm0, %v361_v4, 0.0  ;;  %563 = vmatpush.bf16.msra.mxu0 %v877_v40  ;;  %900 = vmatpush.bf16.msra.mxu2 %v877_v40  ;;  %v896_v49 = vld [vmem:[%s1210_s3 + $0x24] sm:$0xf] }
  0x11   : > { %370 = vadd.xlane.f32.xlu0 %v369_v2  ;;  %364 = vadd.xlane.f32.xlu1 %v363_v3  ;;  %v366_v7 = vsel %vm362_vm0, %v359_v5, 0.0  ;;  %v870_v50 = vld [vmem:[%s1210_s3 + $0x28] sm:$0xf0]  ;;  %v860_v53 = vld [vmem:[%s1210_s3 + $0x10] sm:$0xf] }
  0x12   : > { %582 = vmatpush.bf16.msra.mxu1 %v881_v44  ;;  %904 = vmatpush.bf16.msra.mxu3 %v881_v44  ;;  %v873_v52 = vor.u32 %v896_v49, %v870_v50  ;;  %v895_v54 = vld [vmem:[%s1210_s3 + $0x14] sm:$0xf0]  ;;  %v894_v55 = vld [vmem:[%s1210_s3 + $0x14] sm:$0xf]  ;;  %v862_v59 = vld [vmem:[%s1210_s3 + $0x18] sm:$0xf0] }
  0x13   : > { %v935_v9 = vpop.eup %934  ;;  %v861_v58 = vor.u32 %v895_v54, %v860_v53  ;;  %v852_v60 = vld [vmem:[%s1210_s3] sm:$0xf]  ;;  %v893_v61 = vld [vmem:[%s1210_s3 + $0x4] sm:$0xf0]  ;;  %v854_v2 = vld [vmem:[%s1210_s3 + $0x8] sm:$0xf0] }
  0x14   : > { %v376_v10 = vmul.f32 64.0, %v935_v9  ;;  %vm380_vm1 = vweird.f32 %v935_v9  ;;  %564 = vmatpush.bf16.msra.mxu0 %v869_v51  ;;  %901 = vmatpush.bf16.msra.mxu2 %v869_v51 }
  0x16   : > { %v377_v11 = vsub.f32 1.0, %v376_v10  ;;  %583 = vmatpush.bf16.msra.mxu1 %v873_v52  ;;  %905 = vmatpush.bf16.msra.mxu3 %v873_v52 }
  0x18   : > { %v378_v12 = vmul.f32 %v935_v9, %v377_v11  ;;  %565 = vmatpush.bf16.msra.mxu0 %v861_v58  ;;  %902 = vmatpush.bf16.msra.mxu2 %v861_v58  ;;  %v458_v11 = vld [vmem:[%s325_s24] sm:$0x1] }
  0x19   : > { %373 = vadd.xlane.f32.xlu0 %v372_v6  ;;  %367 = vadd.xlane.f32.xlu1 %v366_v7  ;;  %v853_v6 = vor.u32 %v893_v61, %v852_v60 }
  0x1a   : > { %v379_v13 = vadd.f32 %v935_v9, %v378_v12 }
  0x1c   : > { %v1049_v14 = vsel %vm380_vm1, %v935_v9, %v379_v13  ;;  %566 = vmatpush.bf16.msra.mxu0 %v853_v6  ;;  %903 = vmatpush.bf16.msra.mxu2 %v853_v6 }
  0x84   : > { %v371_v15 = vpop.xlane.xlu0 %370  ;;  %v365_v16 = vpop.xlane.xlu1 %364 }
  0x85   : > { %v384_v17 = vmul.f32 %v1049_v14, %v371_v15  ;;  %v382_v18 = vmul.f32 %v1049_v14, %v365_v16  ;;  %v459_v15 = vadd.f32 1.0, %v458_v11 }
  0x87   : > { %v1053_v19 = vsub.f32 %v360_v0, %v384_v17  ;;  %v1055_v20 = vsub.f32 %v358_v1, %v382_v18  ;;  %v865_v0 = vor.u32 %v894_v55, %v862_v59  ;;  %v892_v1 = vld [vmem:[%s1210_s3 + $0x4] sm:$0xf] }
  0x88   : > { %v857_v9 = vor.u32 %v892_v1, %v854_v2 }
  0x89   : > { %v392_v21 = vmul.f32 %v1053_v19, %v1053_v19  ;;  %v390_v22 = vmul.f32 %v1055_v20, %v1055_v20  ;;  %584 = vmatpush.bf16.msra.mxu1 %v865_v0  ;;  %906 = vmatpush.bf16.msra.mxu3 %v865_v0 }
  0x8b   : > { %v400_v23 = vsel %vm362_vm0, %v392_v21, 0.0  ;;  %v394_v24 = vsel %vm362_vm0, %v390_v22, 0.0 }
  0x8c   : > { %401 = vadd.xlane.f32.xlu2 %v400_v23  ;;  %v374_v25 = vpop.xlane.xlu0 %373  ;;  %395 = vadd.xlane.f32.xlu0 %v394_v24  ;;  %v368_v26 = vpop.xlane.xlu1 %367 }
  0x8d   : > { %v385_v27 = vmul.f32 %v1049_v14, %v374_v25  ;;  %v383_v28 = vmul.f32 %v1049_v14, %v368_v26  ;;  %585 = vmatpush.bf16.msra.mxu1 %v857_v9  ;;  %907 = vmatpush.bf16.msra.mxu3 %v857_v9  ;;  %v461_v25 = vperm.slane %v459_v15, 0 }
  0x8f   : > { %v1065_v29 = vsub.f32 %v361_v4, %v385_v27  ;;  %v1067_v30 = vsub.f32 %v359_v5, %v383_v28 }
  0x91   : > { %v393_v31 = vmul.f32 %v1065_v29, %v1065_v29  ;;  %v391_v32 = vmul.f32 %v1067_v30, %v1067_v30 }
  0x93   : > { %v403_v33 = vsel %vm362_vm0, %v393_v31, 0.0  ;;  %v397_v34 = vsel %vm362_vm0, %v391_v32, 0.0  ;;  %v933_v32 = vld [vmem:[%s322_s25] ss:$0 sm:$0xff] }
  0x94   : > { %404 = vadd.xlane.f32.xlu2 %v403_v33  ;;  %398 = vadd.xlane.f32.xlu1 %v397_v34 }
  0xff   : > { %v402_v38 = vpop.xlane.xlu2 %401  ;;  %v396_v39 = vpop.xlane.xlu0 %395 }
 0x100   : > { %v408_v42 = vmul.f32 %v402_v38, %v1049_v14  ;;  %v406_v43 = vmul.f32 %v396_v39, %v1049_v14 }
 0x102   : > { %v1089_v45 = vadd.f32 1e-06, %v408_v42  ;;  %v1091_v46 = vadd.f32 1e-06, %v406_v43 }
 0x104   : > { %936 = vrsqrt.f32 %v1089_v45  ;;  %vm420_vm3 = vweird.f32 %v1091_v46  ;;  %vm440_vm5 = vweird.f32 %v1089_v45 }
 0x105   : > { %938 = vrsqrt.f32 %v1091_v46 }
 0x107   : > { %v405_v56 = vpop.xlane.xlu2 %404  ;;  %v399_v57 = vpop.xlane.xlu1 %398 }
 0x108   : > { %v409_v62 = vmul.f32 %v405_v56, %v1049_v14  ;;  %v407_v63 = vmul.f32 %v399_v57, %v1049_v14 }
 0x10a   : > { %v937_v3 = vpop.eup %936  ;;  %v413_v4 = vadd.f32 1e-06, %v409_v62  ;;  %v1137_v5 = vadd.f32 1e-06, %v407_v63 }
 0x10b   : > { %v939_v7 = vpop.eup %938  ;;  %v435_v8 = vmul.f32 %v937_v3, %v1089_v45  ;;  %vm441_vm2 = vweird.f32 %v937_v3 }
 0x10c   : > { %v415_v10 = vmul.f32 %v939_v7, %v1091_v46  ;;  %940 = vrsqrt.f32 %v413_v4  ;;  %vm421_vm4 = vweird.f32 %v939_v7  ;;  %vm442_vm6 = vmor %vm440_vm5, %vm441_vm2  ;;  %vm430_vm9 = vweird.f32 %v1137_v5 }
 0x10d   : > { %v436_v12 = vmul.f32 %v937_v3, %v435_v8  ;;  %942 = vrsqrt.f32 %v1137_v5  ;;  %vm422_vm7 = vmor %vm420_vm3, %vm421_vm4  ;;  %vm450_vm12 = vweird.f32 %v413_v4 }
 0x10e   : > { %v416_v13 = vmul.f32 %v939_v7, %v415_v10 }
 0x10f   : > { %v437_v14 = vmul.f32 0.5, %v436_v12 }
 0x110   : > { %v417_v16 = vmul.f32 0.5, %v416_v13 }
 0x111   : > { %v438_v17 = vsub.f32 1.5, %v437_v14 }
 0x112   : > { %v941_v18 = vpop.eup %940  ;;  %v418_v21 = vsub.f32 1.5, %v417_v16 }
 0x113   : > { %v943_v22 = vpop.eup %942  ;;  %v439_v23 = vmul.f32 %v937_v3, %v438_v17  ;;  %v445_v24 = vmul.f32 %v941_v18, %v413_v4  ;;  %vm451_vm8 = vweird.f32 %v941_v18 }
 0x114   : > { %v419_v26 = vmul.f32 %v939_v7, %v418_v21  ;;  %v425_v27 = vmul.f32 %v943_v22, %v1137_v5  ;;  %vm431_vm10 = vweird.f32 %v943_v22  ;;  %vm452_vm13 = vmor %vm450_vm12, %vm451_vm8 }
 0x115   : > { %v443_v28 = vsel %vm442_vm6, %v937_v3, %v439_v23  ;;  %v446_v31 = vmul.f32 %v941_v18, %v445_v24  ;;  %vm432_vm14 = vmor %vm430_vm9, %vm431_vm10 }
 0x116   : > { %v456_v33 = vmul.f32 %v443_v28, %v1053_v19  ;;  %v423_v34 = vsel %vm422_vm7, %v939_v7, %v419_v26  ;;  %v426_v35 = vmul.f32 %v943_v22, %v425_v27 }
 0x117   : > { %v454_v36 = vmul.f32 %v423_v34, %v1055_v20  ;;  %v447_v37 = vmul.f32 0.5, %v446_v31 }
 0x118   : > { %v465_v38 = vmul.f32 %v461_v25, %v456_v33  ;;  %v427_v39 = vmul.f32 0.5, %v426_v35 }
 0x119   : > { %v463_v40 = vmul.f32 %v461_v25, %v454_v36  ;;  %v448_v41 = vsub.f32 1.5, %v447_v37 }
 0x11a   : > { %v473_v42 = vadd.f32 %v933_v32, %v465_v38  ;;  %v428_v43 = vsub.f32 1.5, %v427_v39 }
 0x11b   : > { %v471_v44 = vadd.f32 %v933_v32, %v463_v40  ;;  %v449_v45 = vmul.f32 %v941_v18, %v448_v41 }
 0x11c   : > { %v477_v19 = vpack.c.bf16 %v473_v42, %v473_v42  ;;  %v429_v46 = vmul.f32 %v943_v22, %v428_v43 }
 0x11d   : > { %v475_v47 = vpack.c.bf16 %v471_v44, %v471_v44  ;;  %v453_v20 = vsel %vm452_vm13, %v941_v18, %v449_v45 }
 0x11e   : > { %482 = vst.msk [vmem:[#allocation2 + $0x8] sm:$0xf] %vm479_vm11, %v477_v19  ;;  %v457_v48 = vmul.f32 %v453_v20, %v1065_v29  ;;  %v433_v49 = vsel %vm432_vm14, %v943_v22, %v429_v46  ;;  %v496_v29 = vld [vmem:[%s1211_s4] sm:$0x3] }
 0x11f   : > { %480 = vst.msk [vmem:[#allocation2] sm:$0xf] %vm479_vm11, %v475_v47  ;;  %v455_v50 = vmul.f32 %v433_v49, %v1067_v30  ;;  %v498_v30 = vperm.slane %v496_v29, 0  ;;  %v499_v59 = vperm.slane %v496_v29, 1 }
 0x120   : > { %v466_v51 = vmul.f32 %v461_v25, %v457_v48 }
 0x121   : > { %v464_v52 = vmul.f32 %v461_v25, %v455_v50 }
 0x122   : > { %v474_v53 = vadd.f32 %v933_v32, %v466_v51 }
 0x123   : > { %v472_v54 = vadd.f32 %v933_v32, %v464_v52 }
 0x124   : > { %v478_v55 = vpack.c.bf16 %v474_v53, %v474_v53 }
 0x125   : > { %v476_v56 = vpack.c.bf16 %v472_v54, %v472_v54 }
 0x126   : > { %483 = vst.msk [vmem:[#allocation2 + $0xc] sm:$0xf] %vm479_vm11, %v478_v55 }
 0x127   : > { %481 = vst.msk [vmem:[#allocation2 + $0x4] sm:$0xf] %vm479_vm11, %v476_v56 }
 0x12d   : > { %v891_v57 = vld [vmem:[#allocation2 + $0x8] sm:$0xff] }
 0x12e   : > { %v890_v58 = vld [vmem:[#allocation2] sm:$0xff]  ;;  %883 = vmatmul.msk.bf16.vlgmr.msra.gmra.mxu2 %vm362_vm0, %v891_v57  ;;  %885 = vmatmul.msk.bf16.vlgmr.msra.gmra.mxu3 %vm362_vm0, %v891_v57 }
 0x12f   : > { %882 = vmatmul.msk.bf16.vlgmr.msra.gmra.mxu0 %vm362_vm0, %v890_v58  ;;  %884 = vmatmul.msk.bf16.vlgmr.msra.gmra.mxu1 %vm362_vm0, %v890_v58 }
 0x1ac   : > { %v568_v60 = vpop.f32.mrf.mxu0  ;;  %v587_v61 = vpop.f32.mrf.mxu1 }
 0x1ad   : > { %v569_v62 = vadd.f32 %v568_v60, %v498_v30  ;;  %v588_v63 = vadd.f32 %v587_v61, %v499_v59 }
 0x1af   : > { %v605_v0 = vmul.f32 0.044715, %v569_v62  ;;  %v606_v1 = vmul.f32 0.044715, %v588_v63  ;;  %v597_v20 = vmul.f32 0.5, %v569_v62  ;;  %v598_v51 = vmul.f32 0.5, %v588_v63 }
 0x1b1   : > { %v613_v2 = vmul.f32 %v605_v0, %v569_v62  ;;  %v614_v3 = vmul.f32 %v606_v1, %v588_v63  ;;  %v573_v4 = vpop.f32.mrf.mxu2  ;;  %v592_v5 = vpop.f32.mrf.mxu3 }
 0x1b2   : > { %v574_v6 = vadd.f32 %v573_v4, %v498_v30  ;;  %v1166_v7 = vadd.f32 %v592_v5, %v499_v59 }
 0x1b3   : > { %v621_v8 = vmul.f32 %v613_v2, %v569_v62  ;;  %v622_v9 = vmul.f32 %v614_v3, %v588_v63 }
 0x1b4   : > { %v609_v10 = vmul.f32 0.044715, %v574_v6  ;;  %v610_v11 = vmul.f32 0.044715, %v1166_v7  ;;  %v570_v12 = vpop.f32.mrf.mxu0  ;;  %v589_v13 = vpop.f32.mrf.mxu1  ;;  %v601_v61 = vmul.f32 0.5, %v574_v6  ;;  %v602_v0 = vmul.f32 0.5, %v1166_v7 }
 0x1b5   : > { %v629_v14 = vadd.f32 %v621_v8, %v569_v62  ;;  %v630_v15 = vadd.f32 %v622_v9, %v588_v63  ;;  %v1169_v16 = vadd.f32 %v570_v12, %v498_v30  ;;  %v1171_v17 = vadd.f32 %v589_v13, %v499_v59 }
 0x1b6   : > { %v617_v18 = vmul.f32 %v609_v10, %v574_v6  ;;  %v618_v21 = vmul.f32 %v610_v11, %v1166_v7 }
 0x1b7   : > { %v637_v22 = vmul.f32 0.7978845, %v629_v14  ;;  %v638_v23 = vmul.f32 0.7978845, %v630_v15  ;;  %v607_v26 = vmul.f32 0.044715, %v1169_v16 }
 0x1b8   : > { %v625_v24 = vmul.f32 %v617_v18, %v574_v6  ;;  %v626_v25 = vmul.f32 %v618_v21, %v1166_v7  ;;  %v608_v27 = vmul.f32 0.044715, %v1171_v17  ;;  %v599_v9 = vmul.f32 0.5, %v1169_v16 }
 0x1b9   : > { %944 = vtanh.f32 %v637_v22  ;;  %v575_v28 = vpop.f32.mrf.mxu2  ;;  %v594_v31 = vpop.f32.mrf.mxu3  ;;  %v615_v34 = vmul.f32 %v607_v26, %v1169_v16 }
 0x1ba   : > { %946 = vtanh.f32 %v638_v23  ;;  %v633_v32 = vadd.f32 %v625_v24, %v574_v6  ;;  %v634_v33 = vadd.f32 %v626_v25, %v1166_v7  ;;  %v616_v35 = vmul.f32 %v608_v27, %v1171_v17 }
 0x1bb   : > { %v576_v36 = vadd.f32 %v575_v28, %v498_v30  ;;  %v595_v37 = vadd.f32 %v594_v31, %v499_v59  ;;  %v623_v40 = vmul.f32 %v615_v34, %v1169_v16  ;;  %v600_v6 = vmul.f32 0.5, %v1171_v17 }
 0x1bc   : > { %v641_v38 = vmul.f32 0.7978845, %v633_v32  ;;  %v642_v39 = vmul.f32 0.7978845, %v634_v33  ;;  %v624_v41 = vmul.f32 %v616_v35, %v1171_v17 }
 0x1bd   : > { %v611_v42 = vmul.f32 0.044715, %v576_v36  ;;  %v631_v43 = vadd.f32 %v623_v40, %v1169_v16  ;;  %v612_v44 = vmul.f32 0.044715, %v595_v37  ;;  %v603_v21 = vmul.f32 0.5, %v576_v36 }
 0x1be   : > { %948 = vtanh.f32 %v641_v38  ;;  %v632_v19 = vadd.f32 %v624_v41, %v1171_v17  ;;  %v604_v23 = vmul.f32 0.5, %v595_v37 }
 0x1bf   : > { %v945_v45 = vpop.eup %944  ;;  %950 = vtanh.f32 %v642_v39  ;;  %v619_v46 = vmul.f32 %v611_v42, %v576_v36  ;;  %v639_v49 = vmul.f32 0.7978845, %v631_v43  ;;  %v620_v50 = vmul.f32 %v612_v44, %v595_v37 }
 0x1c0   : > { %v947_v47 = vpop.eup %946  ;;  %v653_v48 = vadd.f32 1.0, %v945_v45  ;;  %v640_v53 = vmul.f32 0.7978845, %v632_v19 }
 0x1c1   : > { %v654_v52 = vadd.f32 1.0, %v947_v47  ;;  %v627_v54 = vmul.f32 %v619_v46, %v576_v36  ;;  %952 = vtanh.f32 %v639_v49  ;;  %v628_v56 = vmul.f32 %v620_v50, %v595_v37 }
 0x1c2   : > { %v661_v55 = vmul.f32 %v653_v48, %v597_v20  ;;  %954 = vtanh.f32 %v640_v53 }
 0x1c3   : > { %v662_v57 = vmul.f32 %v654_v52, %v598_v51  ;;  %v635_v58 = vadd.f32 %v627_v54, %v576_v36  ;;  %v636_v30 = vadd.f32 %v628_v56, %v595_v37 }
 0x1c4   : > { %v949_v29 = vpop.eup %948 }
 0x1c5   : > { %v951_v59 = vpop.eup %950  ;;  %v669_v60 = vpack.c.bf16 %v662_v57, %v661_v55  ;;  %v657_v62 = vadd.f32 1.0, %v949_v29  ;;  %v643_v63 = vmul.f32 0.7978845, %v635_v58  ;;  %v644_v2 = vmul.f32 0.7978845, %v636_v30 }
 0x1c6   : > { %v658_v1 = vadd.f32 1.0, %v951_v59 }
 0x1c7   : > { %673 = vst [vmem:[%s1189_s6] sm:$0xff] %v669_v60  ;;  %v665_v3 = vmul.f32 %v657_v62, %v601_v61  ;;  %956 = vtanh.f32 %v643_v63  ;;  %v953_v4 = vpop.eup %952 }
 0x1c8   : > { %v666_v5 = vmul.f32 %v658_v1, %v602_v0  ;;  %958 = vtanh.f32 %v644_v2  ;;  %v955_v8 = vpop.eup %954  ;;  %v655_v10 = vadd.f32 1.0, %v953_v4 }
 0x1c9   : > { %v656_v12 = vadd.f32 1.0, %v955_v8 }
 0x1ca   : > { %v671_v11 = vpack.c.bf16 %v666_v5, %v665_v3  ;;  %v663_v7 = vmul.f32 %v655_v10, %v599_v9 }
 0x1cb   : > { %v664_v13 = vmul.f32 %v656_v12, %v600_v6 }
 0x1cc   : > { %675 = vst [vmem:[%s1189_s6 + $0x10] sm:$0xff] %v671_v11 }
 0x1cd   : > { %v957_v14 = vpop.eup %956  ;;  %v670_v18 = vpack.c.bf16 %v664_v13, %v663_v7 }
 0x1ce   : > { %v959_v15 = vpop.eup %958  ;;  %v659_v22 = vadd.f32 1.0, %v957_v14 }
 0x1cf   : > { %v660_v24 = vadd.f32 1.0, %v959_v15  ;;  %674 = vst [vmem:[%s1189_s6 + $0x8] sm:$0xff] %v670_v18 }
 0x1d0   : > { %v667_v25 = vmul.f32 %v659_v22, %v603_v21 }
 0x1d1   : > { %v668_v26 = vmul.f32 %v660_v24, %v604_v23 }
 0x1d3   : > { %v672_v16 = vpack.c.bf16 %v668_v26, %v667_v25 }
 0x1d5   : > { %676 = vst [vmem:[%s1189_s6 + $0x18] sm:$0xff] %v672_v16 }
 0x1d6 PF: > { %s15_s20 = sadd.s32 1, %s982_s20   ;;  %s1213_s18 = smov %s978_s19 }
 0x1d7   : > { %p12_p5 = scmp.ge.s32.totalorder %s15_s20, 4   ;;  %s1214_s19 = smov %s1216_s21 }
 0x1d9   :  { %14 = sbr.rel (!%p12_p5) target bundleno = 2 (0x2), region = 86 }

// kernel: _lambda_.23
= control target key start
LH: loop header
LB: loop body
LE: loop exit
PB: predicated region body
PF: predicated region fallthrough
CT: control target
= control target key end

     0   :  { %s1059_s18 = smov 0   ;;  %s1061_s19 = smov 0   ;;  %s1181_s0 = inlined_call_operand.vmem [shape: bf16[2,32,256], index: 0, kind: input, shape index: {}]   ;;  %s1182_s1 = inlined_call_operand.vmem [shape: bf16[256,64], index: 1, kind: input, shape index: {}]   ;;  %s1183_s2 = inlined_call_operand.vmem [shape: f32[1,64], index: 2, kind: input, shape index: {}]   ;;  %s1184_s3 = inlined_call_operand.vmem [shape: f32[2,1,64], index: 3, kind: input, shape index: {}]   ;;  %s1185_s4 = inlined_call_operand.vmem [shape: f32[2,32,64], index: 4, kind: input, shape index: {}]   ;;  %s1186_s5 = inlined_call_operand.vmem [shape: f32[2,32,64], index: 5, kind: output, shape index: {}]  }
   0x1   :  { %s1063_s20 = smov 0  }
   0x2 LB: > { %s41_s21 = sadd.s32 1, %s1022_s19  ;;  %p849_p0 = scmp.ge.s32.totalorder %s1026_s20, 1  ;;  %s1026_s20 = sphi %s1063_s20, %s15_s20   ;;  %s1022_s19 = sphi %s1061_s19, %s1188_s19   ;;  %s1018_s18 = sphi %s1059_s18, %s1187_s18  }
   0x3   : > { %p43_p1 = scmp.ge.s32.totalorder %s41_s21, 2  ;;  %p291_p2 = scmp.lt.s32.totalorder %s1026_s20, 3 }
   0x5   : > { %s1190_s21 = smov (%p43_p1, %s41_s21), 0  ;;  %p292_p3 = pnand %p849_p0, %p291_p2 }
   0x6   : > { %p366_p4 = scmp.lt.s32.totalorder (!%p292_p3), %s1018_s18, 1 }
   0x7   : > { %295 = sbr.rel (%p292_p3) target bundleno = 205 (0xcd), region = 40 }
   0xc   : > { %v952_v0 = vld [vmem:[%s1182_s1 + $0x38] sm:$0xff]  ;;  %v951_v2 = vld [vmem:[%s1182_s1 + $0x30] sm:$0xff]  ;;  %s1192_s18 = smov (!%p366_p4, %s1018_s18), 1  ;;  %v950_v4 = vld [vmem:[%s1182_s1 + $0x28] sm:$0xff]  ;;  %vm428_vm0 = vcmask 523264   ;;  %v1028_v28 = vmov 0.0  }
   0xd   : > { %v960_v1 = vld [vmem:[%s1182_s1 + $0x78] sm:$0xff]  ;;  %589 = vmatpush.bf16.msra.mxu0 %v952_v0  ;;  %961 = vmatpush.bf16.msra.mxu2 %v952_v0  ;;  %v959_v3 = vld [vmem:[%s1182_s1 + $0x70] sm:$0xff]  ;;  %s397_s7 = scalar_lea.vmem %s1184_s3, %s1192_s18  ;;  %v958_v5 = vld [vmem:[%s1182_s1 + $0x68] sm:$0xff]  ;;  %s1120_s28 = sshll.u32 %s1192_s18, 5  ;;  %429 = vst.msk [vmem:[#allocation2] sm:$0xff] %vm428_vm0, %v1028_v28 }
   0xe   : > { %608 = vmatpush.bf16.msra.mxu1 %v960_v1  ;;  %969 = vmatpush.bf16.msra.mxu3 %v960_v1  ;;  %v949_v6 = vld [vmem:[%s1182_s1 + $0x20] sm:$0xff]  ;;  %v948_v8 = vld [vmem:[%s1182_s1 + $0x18] sm:$0xff]  ;;  %v947_v10 = vld [vmem:[%s1182_s1 + $0x10] sm:$0xff]  ;;  %s377_s9 = scalar_lea.vmem %s1181_s0, %s1120_s28  ;;  %430 = vst.msk [vmem:[#allocation2 + $0x8] sm:$0xff] %vm428_vm0, %v1028_v28  ;;  %s1150_s24 = scalar_lea.vmem %s1185_s4, %s1120_s28 }
   0xf   : > { %v957_v7 = vld [vmem:[%s1182_s1 + $0x60] sm:$0xff]  ;;  %v956_v9 = vld [vmem:[%s1182_s1 + $0x58] sm:$0xff]  ;;  %v955_v11 = vld [vmem:[%s1182_s1 + $0x50] sm:$0xff]  ;;  %431 = vst.msk [vmem:[#allocation2 + $0x10] sm:$0xff] %vm428_vm0, %v1028_v28  ;;  %s422_s18 = scalar_lea.vmem %s1186_s5, %s1120_s28 }
  0x10   : > { %v946_v12 = vld [vmem:[%s1182_s1 + $0x8] sm:$0xff]  ;;  %v945_v14 = vld [vmem:[%s1182_s1] sm:$0xff]  ;;  %v866_v18 = vld [vmem:[%s377_s9 + $0x10] sm:$0xf]  ;;  %432 = vst.msk [vmem:[#allocation2 + $0x18] sm:$0xff] %vm428_vm0, %v1028_v28 }
  0x11   : > { %590 = vmatpush.bf16.msra.mxu0 %v951_v2  ;;  %962 = vmatpush.bf16.msra.mxu2 %v951_v2  ;;  %v954_v13 = vld [vmem:[%s1182_s1 + $0x48] sm:$0xff]  ;;  %v953_v15 = vld [vmem:[%s1182_s1 + $0x40] sm:$0xff]  ;;  %v944_v19 = vld [vmem:[%s377_s9 + $0x14] sm:$0xf0] }
  0x12   : > { %609 = vmatpush.bf16.msra.mxu1 %v959_v3  ;;  %970 = vmatpush.bf16.msra.mxu3 %v959_v3  ;;  %v858_v16 = vld [vmem:[%s377_s9] sm:$0xf]  ;;  %v942_v17 = vld [vmem:[%s377_s9 + $0x4] sm:$0xf0]  ;;  %v941_v20 = vld [vmem:[%s377_s9 + $0x4] sm:$0xf]  ;;  %v867_v25 = vor.u32 %v944_v19, %v866_v18 }
  0x13   : > { %v860_v21 = vld [vmem:[%s377_s9 + $0x8] sm:$0xf0]  ;;  %v943_v22 = vld [vmem:[%s377_s9 + $0x14] sm:$0xf]  ;;  %v868_v23 = vld [vmem:[%s377_s9 + $0x18] sm:$0xf0]  ;;  %v859_v24 = vor.u32 %v942_v17, %v858_v16 }
  0x14   : > { %v863_v26 = vor.u32 %v941_v20, %v860_v21  ;;  %v871_v27 = vor.u32 %v943_v22, %v868_v23  ;;  %v437_v30 = vld [vmem:[#allocation2] sm:$0xff]  ;;  %v653_v58 = vld [vmem:[%s1150_s24 + $0x10] sm:$0xff]  ;;  %v652_v62 = vld [vmem:[%s1150_s24 + $0x8] sm:$0xff] }
  0x15   : > { %591 = vmatpush.bf16.msra.mxu0 %v950_v4  ;;  %963 = vmatpush.bf16.msra.mxu2 %v950_v4  ;;  %v438_v39 = vld [vmem:[#allocation2 + $0x8] sm:$0xff]  ;;  %v1003_v41 = vld [vmem:[%s1183_s2] ss:$0 sm:$0xff]  ;;  %v654_v4 = vld [vmem:[%s1150_s24 + $0x18] sm:$0xff] }
  0x16   : > { %610 = vmatpush.bf16.msra.mxu1 %v958_v5  ;;  %971 = vmatpush.bf16.msra.mxu3 %v958_v5  ;;  %v439_v35 = vld [vmem:[#allocation2 + $0x10] sm:$0xff]  ;;  %v1002_v44 = vld [vmem:[%s397_s7] ss:$0 sm:$0xff] }
  0x17   : > { %v651_v49 = vld [vmem:[%s1150_s24] sm:$0xff]  ;;  %v440_v50 = vld [vmem:[#allocation2 + $0x18] sm:$0xff] }
  0x19   : > { %592 = vmatpush.bf16.msra.mxu0 %v949_v6  ;;  %964 = vmatpush.bf16.msra.mxu2 %v949_v6 }
  0x1a   : > { %611 = vmatpush.bf16.msra.mxu1 %v957_v7  ;;  %972 = vmatpush.bf16.msra.mxu3 %v957_v7 }
  0x1d   : > { %593 = vmatpush.bf16.msra.mxu0 %v948_v8  ;;  %965 = vmatpush.bf16.msra.mxu2 %v948_v8 }
  0x1e   : > { %612 = vmatpush.bf16.msra.mxu1 %v956_v9  ;;  %973 = vmatpush.bf16.msra.mxu3 %v956_v9 }
  0x21   : > { %594 = vmatpush.bf16.msra.mxu0 %v947_v10  ;;  %966 = vmatpush.bf16.msra.mxu2 %v947_v10 }
  0x22   : > { %613 = vmatpush.bf16.msra.mxu1 %v955_v11  ;;  %974 = vmatpush.bf16.msra.mxu3 %v955_v11 }
  0x25   : > { %595 = vmatpush.bf16.msra.mxu0 %v946_v12  ;;  %967 = vmatpush.bf16.msra.mxu2 %v946_v12 }
  0x26   : > { %614 = vmatpush.bf16.msra.mxu1 %v954_v13  ;;  %975 = vmatpush.bf16.msra.mxu3 %v954_v13 }
  0x29   : > { %596 = vmatpush.bf16.msra.mxu0 %v945_v14  ;;  %968 = vmatpush.bf16.msra.mxu2 %v945_v14 }
  0x2a   : > { %615 = vmatpush.bf16.msra.mxu1 %v953_v15  ;;  %976 = vmatpush.bf16.msra.mxu3 %v953_v15 }
  0x2c   : > { %597 = vmatmul.bf16.vlgmr.msra.gmra.mxu0 %v859_v24  ;;  %602 = vmatmul.bf16.vlgmr.msra.gmra.mxu2 %v867_v25 }
  0x2d   : > { %616 = vmatmul.bf16.vlgmr.msra.gmra.mxu1 %v863_v26  ;;  %621 = vmatmul.bf16.vlgmr.msra.gmra.mxu3 %v871_v27 }
  0xa9   : > { %v598_v29 = vpop.f32.mrf.mxu0 }
  0xaa   : > { %v617_v31 = vpop.f32.mrf.mxu1 }
  0xab   : > { %v618_v32 = vadd.f32 %v617_v31, %v598_v29 }
  0xad   : > { %v627_v33 = vadd.f32 %v618_v32, %v437_v30 }
  0xaf   : > { %632 = vst.msk [vmem:[#allocation2] sm:$0xff] %vm428_vm0, %v627_v33  ;;  %v603_v34 = vpop.f32.mrf.mxu2 }
  0xb0   : > { %v622_v36 = vpop.f32.mrf.mxu3 }
  0xb1   : > { %v623_v37 = vadd.f32 %v622_v36, %v603_v34  ;;  %v600_v38 = vpop.f32.mrf.mxu0 }
  0xb2   : > { %v619_v40 = vpop.f32.mrf.mxu1 }
  0xb3   : > { %v629_v42 = vadd.f32 %v623_v37, %v439_v35  ;;  %v620_v43 = vadd.f32 %v619_v40, %v600_v38 }
  0xb5   : > { %634 = vst.msk [vmem:[#allocation2 + $0x10] sm:$0xff] %vm428_vm0, %v629_v42  ;;  %v628_v45 = vadd.f32 %v620_v43, %v438_v39 }
  0xb6   : > { %v639_v46 = vld [vmem:[#allocation2] sm:$0xff] }
  0xb7   : > { %v647_v47 = vadd.f32 %v1003_v41, %v639_v46  ;;  %633 = vst.msk [vmem:[#allocation2 + $0x8] sm:$0xff] %vm428_vm0, %v628_v45  ;;  %v605_v48 = vpop.f32.mrf.mxu2 }
  0xb8   : > { %v624_v51 = vpop.f32.mrf.mxu3 }
  0xb9   : > { %v659_v52 = vmul.f32 %v1002_v44, %v647_v47  ;;  %v625_v53 = vadd.f32 %v624_v51, %v605_v48 }
  0xbb   : > { %v663_v54 = vadd.f32 %v659_v52, %v651_v49  ;;  %v630_v55 = vadd.f32 %v625_v53, %v440_v50 }
  0xbc   : > { %v641_v56 = vld [vmem:[#allocation2 + $0x10] sm:$0xff] }
  0xbd   : > { %667 = vst.msk [vmem:[%s422_s18] sm:$0xff] %vm428_vm0, %v663_v54  ;;  %v649_v57 = vadd.f32 %v1003_v41, %v641_v56 }
  0xbe   : > { %v640_v59 = vld [vmem:[#allocation2 + $0x8] sm:$0xff]  ;;  %635 = vst.msk [vmem:[#allocation2 + $0x18] sm:$0xff] %vm428_vm0, %v630_v55 }
  0xbf   : > { %v661_v60 = vmul.f32 %v1002_v44, %v649_v57  ;;  %v648_v61 = vadd.f32 %v1003_v41, %v640_v59 }
  0xc1   : > { %v665_v63 = vadd.f32 %v661_v60, %v653_v58  ;;  %v660_v0 = vmul.f32 %v1002_v44, %v648_v61 }
  0xc3   : > { %669 = vst.msk [vmem:[%s422_s18 + $0x10] sm:$0xff] %vm428_vm0, %v665_v63  ;;  %v664_v1 = vadd.f32 %v660_v0, %v652_v62 }
  0xc5   : > { %668 = vst.msk [vmem:[%s422_s18 + $0x8] sm:$0xff] %vm428_vm0, %v664_v1  ;;  %v642_v2 = vld [vmem:[#allocation2 + $0x18] sm:$0xff] }
  0xc6   : > { %v650_v3 = vadd.f32 %v1003_v41, %v642_v2 }
  0xc8   : > { %v662_v5 = vmul.f32 %v1002_v44, %v650_v3 }
  0xca   : > { %v666_v6 = vadd.f32 %v662_v5, %v654_v4 }
  0xcc   : > { %670 = vst.msk [vmem:[%s422_s18 + $0x18] sm:$0xff] %vm428_vm0, %v666_v6 }
  0xcd PF: > { %s15_s20 = sadd.s32 1, %s1026_s20   ;;  %s1187_s18 = smov %s1022_s19 }
  0xce   : > { %p12_p5 = scmp.ge.s32.totalorder %s15_s20, 4   ;;  %s1188_s19 = smov %s1190_s21 }
  0xd0   :  { %14 = sbr.rel (!%p12_p5) target bundleno = 2 (0x2), region = 90 }

// kernel: _lambda_.30
= control target key start
LH: loop header
LB: loop body
LE: loop exit
PB: predicated region body
PF: predicated region fallthrough
CT: control target
= control target key end

     0   :  { %8 = vsyncpa [#allocation3], 0  ;;  %s747_s0 = inlined_call_operand.vmem [shape: f32[2,2,16,64], index: 0, kind: input, shape index: {}]   ;;  %s748_s1 = inlined_call_operand.vmem [shape: f32[2,5], index: 1, kind: input, shape index: {}]   ;;  %s749_s2 = inlined_call_operand.vmem [shape: f32[5], index: 2, kind: input, shape index: {}]   ;;  %s750_s3 = inlined_call_operand.vmem [shape: f32[2,5,16,64], index: 3, kind: output, shape index: {}]  }
   0x1   :  { %9 = vsyncpa [#allocation5], 0  ;;  %s628_s12 = smov 0   ;;  %s630_s13 = smov 0  }
   0x2   :  { %s632_s14 = smov 0  }
   0x3 LB: > { %s452_s15 = sadd.s32 4294967295, %s604_s14   ;;  %s27_s16 = sadd.s32 1, %s600_s13  ;;  %s604_s14 = sphi %s632_s14, %s15_s14   ;;  %s600_s13 = sphi %s630_s13, %s753_s13   ;;  %s596_s12 = sphi %s628_s12, %s752_s12  }
   0x4   : > { %p29_p0 = scmp.ge.s32.totalorder %s27_s16, 2  ;;  %p454_p1 = scmp.ge.s32.totalorder %s604_s14, 1 }
   0x5   : > { %p130_p2 = scmp.lt.s32.totalorder %s604_s14, 3  ;;  %p649_p4 = scmp.eq.s32.totalorder %s452_s15, 0 }
   0x6   : > { %s755_s16 = smov (%p29_p0, %s27_s16), 0  ;;  %s142_s20 = sshll.u32 %s748_s1, 4  ;;  %s143_s20 = int_to_ptr.vmem [resolvable:$true] %s142_s20 }
   0x7   : > { %p131_p3 = pnand %p454_p1, %p130_p2  ;;  %s152_s23 = sshll.u32 %s749_s2, 4  ;;  %s153_s23 = int_to_ptr.vmem [resolvable:$true] %s152_s23 }
   0x8   : > { %s606_s24 = smov [#allocation2]   ;;  %s607_s25 = smov [#allocation4]  }
   0x9   : > { %p507_p5 = pneg %p131_p3 }
   0xa   : > { %178 = sbr.rel (%p131_p3) target bundleno = 48 (0x30), region = 32 }
   0xb   : > { %p508_p6 = pnand %p649_p4, %p507_p5 }
   0xd   : > { %510 = dma.vmem_to_smem (!%p508_p6), %s143_s20, 32, %s606_s24, [#allocation3]  }
   0xe   : > { %513 = dma.vmem_to_smem (!%p508_p6), %s153_s23, 16, %s607_s25, [#allocation5]  }
   0xf   : > { %587 = dma.done.wait (%p649_p4), [#allocation3], 32  }
  0x10   : > { %589 = vsyncadd (%p649_p4), [#allocation3], 4294967264 }
  0x11   : > { %591 = dma.done.wait (%p649_p4), [#allocation5], 16  }
  0x12   : > { %593 = vsyncadd (%p649_p4), [#allocation5], 4294967280 }
  0x13   : > { %190 = sfence }
  0x14   : > { %p218_p7 = scmp.lt.s32.totalorder %s596_s12, 1  ;;  %s239_s26 = sld [smem:[#allocation2]]  ;;  %vm256_vm0 = vcmask 523264  }
  0x15   : > { %s466_s27 = sld [smem:[#allocation2 + $0x80]] }
  0x16   : > { %s757_s12 = smov (!%p218_p7, %s596_s12), 1  ;;  %s252_s28 = sld [smem:[#allocation4]] }
  0x17   : > { %s497_s29 = sshll.u32 %s757_s12, 5  ;;  %s467_s6 = sld [smem:[#allocation2 + $0x1]] }
  0x18   : > { %s225_s5 = scalar_lea.vmem %s747_s0, %s497_s29  ;;  %s470_s7 = sld [smem:[#allocation2 + $0x81]] }
  0x19   : > { %v674_v0 = vld [vmem:[%s225_s5] sm:$0xff]  ;;  %v676_v2 = vld [vmem:[%s225_s5 + $0x10] sm:$0xff]  ;;  %v678_v3 = vld [vmem:[%s225_s5 + $0x8] sm:$0xff]  ;;  %s498_s8 = smul.u32 80, %s757_s12  ;;  %s682_s9 = sld [smem:[#allocation4 + $0x1]] }
  0x1a   : > { %v240_v1 = vstv %s239_s26  ;;  %v465_v7 = vld [vmem:[%s225_s5 + $0x18] sm:$0xff]  ;;  %s474_s10 = sld [smem:[#allocation2 + $0x2]] }
  0x1b   : > { %v241_v4 = vmul.f32 %v240_v1, %v674_v0  ;;  %v247_v5 = vstv %s466_s27  ;;  %v242_v6 = vmul.f32 %v240_v1, %v678_v3  ;;  %s477_s11 = sld [smem:[#allocation2 + $0x82]]  ;;  %s690_s18 = scalar_lea.vmem %s750_s3, %s498_s8 }
  0x1c   : > { %v248_v8 = vmul.f32 %v676_v2, %v247_v5  ;;  %v249_v9 = vmul.f32 %v465_v7, %v247_v5  ;;  %v253_v10 = vstv %s252_s28  ;;  %s685_s15 = sld [smem:[#allocation4 + $0x2]] }
  0x1d   : > { %v262_v13 = vstv %s467_s6  ;;  %s692_s19 = sld [smem:[#allocation2 + $0x3]] }
  0x1e   : > { %v250_v11 = vadd.f32 %v248_v8, %v241_v4  ;;  %v251_v12 = vadd.f32 %v249_v9, %v242_v6  ;;  %v263_v16 = vmul.f32 %v262_v13, %v674_v0  ;;  %v268_v17 = vstv %s470_s7  ;;  %s484_s20 = sld [smem:[#allocation2 + $0x83]] }
  0x1f   : > { %v269_v18 = vmul.f32 %v676_v2, %v268_v17  ;;  %v264_v19 = vmul.f32 %v262_v13, %v678_v3  ;;  %v270_v20 = vmul.f32 %v465_v7, %v268_v17  ;;  %s697_s21 = sld [smem:[#allocation4 + $0x3]]  ;;  %v274_v21 = vstv %s682_s9 }
  0x20   : > { %v254_v14 = vadd.f32 %v253_v10, %v250_v11  ;;  %v255_v15 = vadd.f32 %v253_v10, %v251_v12  ;;  %v283_v22 = vstv %s474_s10  ;;  %s702_s22 = sld [smem:[#allocation2 + $0x4]] }
  0x21   : > { %v271_v23 = vadd.f32 %v269_v18, %v263_v16  ;;  %v272_v24 = vadd.f32 %v270_v20, %v264_v19  ;;  %v284_v25 = vmul.f32 %v283_v22, %v674_v0  ;;  %v289_v26 = vstv %s477_s11  ;;  %s491_s23 = sld [smem:[#allocation2 + $0x84]] }
  0x22   : > { %257 = vst.msk [vmem:[%s690_s18] sm:$0xff] %vm256_vm0, %v254_v14  ;;  %v290_v27 = vmul.f32 %v676_v2, %v289_v26  ;;  %v285_v28 = vmul.f32 %v283_v22, %v678_v3  ;;  %v291_v29 = vmul.f32 %v465_v7, %v289_v26  ;;  %s709_s24 = sld [smem:[#allocation4 + $0x4]]  ;;  %v295_v32 = vstv %s685_s15 }
  0x23   : > { %258 = vst.msk [vmem:[%s690_s18 + $0x8] sm:$0xff] %vm256_vm0, %v255_v15  ;;  %v275_v30 = vadd.f32 %v274_v21, %v271_v23  ;;  %v276_v31 = vadd.f32 %v274_v21, %v272_v24  ;;  %v304_v33 = vstv %s692_s19 }
  0x24   : > { %v292_v34 = vadd.f32 %v290_v27, %v284_v25  ;;  %v293_v35 = vadd.f32 %v291_v29, %v285_v28  ;;  %v305_v36 = vmul.f32 %v304_v33, %v674_v0  ;;  %v310_v37 = vstv %s484_s20 }
  0x25   : > { %472 = vst.msk [vmem:[%s690_s18 + $0x10] sm:$0xff] %vm256_vm0, %v275_v30  ;;  %v311_v38 = vmul.f32 %v676_v2, %v310_v37  ;;  %v306_v39 = vmul.f32 %v304_v33, %v678_v3  ;;  %v312_v40 = vmul.f32 %v465_v7, %v310_v37  ;;  %v316_v43 = vstv %s697_s21 }
  0x26   : > { %473 = vst.msk [vmem:[%s690_s18 + $0x18] sm:$0xff] %vm256_vm0, %v276_v31  ;;  %v296_v41 = vadd.f32 %v295_v32, %v292_v34  ;;  %v297_v42 = vadd.f32 %v295_v32, %v293_v35  ;;  %v325_v44 = vstv %s702_s22 }
  0x27   : > { %v313_v45 = vadd.f32 %v311_v38, %v305_v36  ;;  %v314_v46 = vadd.f32 %v312_v40, %v306_v39  ;;  %v326_v47 = vmul.f32 %v325_v44, %v674_v0  ;;  %v331_v48 = vstv %s491_s23 }
  0x28   : > { %479 = vst.msk [vmem:[%s690_s18 + $0x20] sm:$0xff] %vm256_vm0, %v296_v41  ;;  %v332_v49 = vmul.f32 %v676_v2, %v331_v48  ;;  %v327_v50 = vmul.f32 %v325_v44, %v678_v3  ;;  %v333_v51 = vmul.f32 %v465_v7, %v331_v48  ;;  %v337_v54 = vstv %s709_s24 }
  0x29   : > { %480 = vst.msk [vmem:[%s690_s18 + $0x28] sm:$0xff] %vm256_vm0, %v297_v42  ;;  %v317_v52 = vadd.f32 %v316_v43, %v313_v45  ;;  %v318_v53 = vadd.f32 %v316_v43, %v314_v46 }
  0x2a   : > { %v334_v55 = vadd.f32 %v332_v49, %v326_v47  ;;  %v335_v56 = vadd.f32 %v333_v51, %v327_v50 }
  0x2b   : > { %486 = vst.msk [vmem:[%s690_s18 + $0x30] sm:$0xff] %vm256_vm0, %v317_v52 }
  0x2c   : > { %487 = vst.msk [vmem:[%s690_s18 + $0x38] sm:$0xff] %vm256_vm0, %v318_v53  ;;  %v338_v57 = vadd.f32 %v337_v54, %v334_v55  ;;  %v339_v58 = vadd.f32 %v337_v54, %v335_v56 }
  0x2e   : > { %493 = vst.msk [vmem:[%s690_s18 + $0x40] sm:$0xff] %vm256_vm0, %v338_v57 }
  0x2f   : > { %494 = vst.msk [vmem:[%s690_s18 + $0x48] sm:$0xff] %vm256_vm0, %v339_v58 }
  0x30 PF: > { %s15_s14 = sadd.s32 1, %s604_s14   ;;  %s752_s12 = smov %s600_s13 }
  0x31   : > { %p12_p8 = scmp.ge.s32.totalorder %s15_s14, 4   ;;  %s753_s13 = smov %s755_s16 }
  0x33   :  { %14 = sbr.rel (!%p12_p8) target bundleno = 3 (0x3), region = 76 }
  0x38   :  { %373 = vsyncpa [#allocation3], 1 }
  0x39   :  { %375 = vsyncpa [#allocation3 + $0x1], 1 }
  0x3a   :  { %376 = vsyncpa [#allocation5], 1 }

// kernel: _lambda_.31
= control target key start
LH: loop header
LB: loop body
LE: loop exit
PB: predicated region body
PF: predicated region fallthrough
CT: control target
= control target key end

     0   :  { %s670_s12 = smov 0   ;;  %s672_s13 = smov 0   ;;  %s779_s0 = inlined_call_operand.vmem [shape: f32[160,64], index: 0, kind: input, shape index: {}]   ;;  %s780_s1 = inlined_call_operand.vmem [shape: bf16[64,48], index: 1, kind: input, shape index: {}]   ;;  %s781_s2 = inlined_call_operand.vmem [shape: f32[1,48], index: 2, kind: input, shape index: {}]   ;;  %s782_s3 = inlined_call_operand.vmem [shape: f32[160,48], index: 3, kind: output, shape index: {}]  }
   0x1   :  { %s674_s14 = smov 0  }
   0x2 LB: > { %s32_s15 = sadd.s32 1, %s643_s13  ;;  %p557_p0 = scmp.ge.s32.totalorder %s647_s14, 1  ;;  %s647_s14 = sphi %s674_s14, %s13_s14   ;;  %s643_s13 = sphi %s672_s13, %s784_s13   ;;  %s639_s12 = sphi %s670_s12, %s783_s12  }
   0x3   : > { %p34_p1 = scmp.ge.s32.totalorder %s32_s15, 2  ;;  %p188_p2 = scmp.lt.s32.totalorder %s647_s14, 3 }
   0x5   : > { %s786_s15 = smov (%p34_p1, %s32_s15), 0  ;;  %p189_p3 = pnand %p557_p0, %p188_p2 }
   0x6   : > { %s229_s18 = smul.u32 (!%p189_p3), 10, %s639_s12 }
   0x7   : > { %192 = sbr.rel (%p189_p3) target bundleno = 197 (0xc5), region = 32 }
   0x8   : > { %p230_p4 = scmp.lt.s32.totalorder (!%p189_p3), %s229_s18, 19 }
   0xc   : > { %v586_v0 = vld [vmem:[%s780_s1 + $0x18] sm:$0xff]  ;;  %vm264_vm0 = vcmask 392192   ;;  %v585_v1 = vld [vmem:[%s780_s1 + $0x10] sm:$0xff]  ;;  %v649_v2 = vmov 0.0   ;;  %s788_s18 = smov (!%p230_p4, %s229_s18), 19  ;;  %v584_v3 = vld [vmem:[%s780_s1 + $0x8] sm:$0xff] }
   0xd   : > { %589 = vmatpush.bf16.msra.mxu3 %v586_v0  ;;  %588 = vmatpush.bf16.msra.mxu2 %v586_v0  ;;  %271 = vst.msk [vmem:[#allocation2 + $0x30] sm:$0xff] %vm264_vm0, %v649_v2  ;;  %s558_s23 = sshll.u32 %s788_s18, 3  ;;  %v583_v4 = vld [vmem:[%s780_s1] sm:$0xff]  ;;  %vm332_vm1 = vcmask 523264  }
   0xe   : > { %352 = vmatpush.bf16.msra.mxu0 %v586_v0  ;;  %587 = vmatpush.bf16.msra.mxu1 %v586_v0  ;;  %265 = vst.msk [vmem:[#allocation2] sm:$0xff] %vm264_vm0, %v649_v2  ;;  %s710_s26 = scalar_lea.vmem %s779_s0, %s558_s23  ;;  %v624_v36 = vld [vmem:[%s781_s2] ss:$0 sm:$0xff]  ;;  %s743_s6 = scalar_lea.vmem %s782_s3, %s558_s23 }
   0xf   : > { %266 = vst.msk [vmem:[#allocation2 + $0x8] sm:$0xff] %vm264_vm0, %v649_v2  ;;  %v281_v5 = vld [vmem:[%s710_s26 + $0x30] sm:$0xff]  ;;  %v282_v6 = vld [vmem:[%s710_s26 + $0x38] sm:$0xff]  ;;  %v279_v7 = vld [vmem:[%s710_s26 + $0x20] sm:$0xff] }
  0x10   : > { %267 = vst.msk [vmem:[#allocation2 + $0x10] sm:$0xff] %vm264_vm0, %v649_v2  ;;  %v280_v8 = vld [vmem:[%s710_s26 + $0x28] sm:$0xff]  ;;  %v275_v9 = vld [vmem:[%s710_s26] sm:$0xff]  ;;  %v277_v11 = vld [vmem:[%s710_s26 + $0x10] sm:$0xff]  ;;  %v288_v13 = vpack.c.bf16 %v282_v6, %v281_v5 }
  0x11   : > { %592 = vmatpush.bf16.msra.mxu3 %v585_v1  ;;  %591 = vmatpush.bf16.msra.mxu2 %v585_v1  ;;  %268 = vst.msk [vmem:[#allocation2 + $0x18] sm:$0xff] %vm264_vm0, %v649_v2  ;;  %v276_v10 = vld [vmem:[%s710_s26 + $0x8] sm:$0xff]  ;;  %v278_v12 = vld [vmem:[%s710_s26 + $0x18] sm:$0xff]  ;;  %v287_v14 = vpack.c.bf16 %v280_v8, %v279_v7  ;;  %v283_v17 = vld [vmem:[%s710_s26 + $0x40] sm:$0xff] }
  0x12   : > { %353 = vmatpush.bf16.msra.mxu0 %v585_v1  ;;  %590 = vmatpush.bf16.msra.mxu1 %v585_v1  ;;  %269 = vst.msk [vmem:[#allocation2 + $0x20] sm:$0xff] %vm264_vm0, %v649_v2  ;;  %v285_v15 = vpack.c.bf16 %v276_v10, %v275_v9  ;;  %v286_v16 = vpack.c.bf16 %v278_v12, %v277_v11  ;;  %v284_v18 = vld [vmem:[%s710_s26 + $0x48] sm:$0xff] }
  0x13   : > { %270 = vst.msk [vmem:[#allocation2 + $0x28] sm:$0xff] %vm264_vm0, %v649_v2  ;;  %v289_v19 = vpack.c.bf16 %v284_v18, %v283_v17 }
  0x14   : > { %272 = vst.msk [vmem:[#allocation2 + $0x38] sm:$0xff] %vm264_vm0, %v649_v2  ;;  %v296_v26 = vld [vmem:[#allocation2 + $0x30] sm:$0xff] }
  0x15   : > { %595 = vmatpush.bf16.msra.mxu3 %v584_v3  ;;  %594 = vmatpush.bf16.msra.mxu2 %v584_v3  ;;  %273 = vst.msk [vmem:[#allocation2 + $0x40] sm:$0xff] %vm264_vm0, %v649_v2  ;;  %v290_v20 = vld [vmem:[#allocation2] sm:$0xff] }
  0x16   : > { %354 = vmatpush.bf16.msra.mxu0 %v584_v3  ;;  %593 = vmatpush.bf16.msra.mxu1 %v584_v3  ;;  %274 = vst.msk [vmem:[#allocation2 + $0x48] sm:$0xff] %vm264_vm0, %v649_v2  ;;  %v291_v32 = vld [vmem:[#allocation2 + $0x8] sm:$0xff] }
  0x17   : > { %v292_v21 = vld [vmem:[#allocation2 + $0x10] sm:$0xff] }
  0x18   : > { %v293_v33 = vld [vmem:[#allocation2 + $0x18] sm:$0xff] }
  0x19   : > { %598 = vmatpush.bf16.msra.mxu3 %v583_v4  ;;  %597 = vmatpush.bf16.msra.mxu2 %v583_v4  ;;  %v294_v27 = vld [vmem:[#allocation2 + $0x20] sm:$0xff] }
  0x1a   : > { %355 = vmatpush.bf16.msra.mxu0 %v583_v4  ;;  %596 = vmatpush.bf16.msra.mxu1 %v583_v4  ;;  %v295_v43 = vld [vmem:[#allocation2 + $0x28] sm:$0xff] }
  0x1b   : > { %v297_v42 = vld [vmem:[#allocation2 + $0x38] sm:$0xff] }
  0x1c   : > { %579 = vmatmul.msk.bf16.vlgmr.msra.gmra.mxu3 %vm332_vm1, %v288_v13  ;;  %578 = vmatmul.msk.bf16.vlgmr.msra.gmra.mxu2 %vm332_vm1, %v287_v14  ;;  %v298_v56 = vld [vmem:[#allocation2 + $0x40] sm:$0xff] }
  0x1d   : > { %576 = vmatmul.msk.bf16.vlgmr.msra.gmra.mxu0 %vm332_vm1, %v285_v15  ;;  %577 = vmatmul.msk.bf16.vlgmr.msra.gmra.mxu1 %vm332_vm1, %v286_v16  ;;  %v299_v0 = vld [vmem:[#allocation2 + $0x48] sm:$0xff] }
  0x2c   : > { %580 = vmatmul.msk.bf16.gmra.mxu3 %vm332_vm1, %v289_v19 }
  0x9a   : > { %v357_v22 = vpop.f32.mrf.mxu0  ;;  %v362_v23 = vpop.f32.mrf.mxu1 }
  0x9b   : > { %v382_v24 = vadd.f32 %v357_v22, %v290_v20  ;;  %v384_v25 = vadd.f32 %v362_v23, %v292_v21 }
  0x9d   : > { %393 = vst.msk [vmem:[#allocation2] sm:$0xff] %vm264_vm0, %v382_v24 }
  0x9e   : > { %395 = vst.msk [vmem:[#allocation2 + $0x10] sm:$0xff] %vm264_vm0, %v384_v25 }
  0x9f   : > { %v372_v28 = vpop.f32.mrf.mxu3  ;;  %v367_v29 = vpop.f32.mrf.mxu2 }
  0xa0   : > { %v388_v30 = vadd.f32 %v372_v28, %v296_v26  ;;  %v386_v31 = vadd.f32 %v367_v29, %v294_v27 }
  0xa2   : > { %399 = vst.msk [vmem:[#allocation2 + $0x30] sm:$0xff] %vm264_vm0, %v388_v30  ;;  %v359_v34 = vpop.f32.mrf.mxu0  ;;  %v364_v35 = vpop.f32.mrf.mxu1 }
  0xa3   : > { %397 = vst.msk [vmem:[#allocation2 + $0x20] sm:$0xff] %vm264_vm0, %v386_v31  ;;  %v383_v37 = vadd.f32 %v359_v34, %v291_v32  ;;  %v385_v38 = vadd.f32 %v364_v35, %v293_v33 }
  0xa4   : > { %v406_v39 = vld [vmem:[#allocation2] sm:$0xff] }
  0xa5   : > { %v420_v40 = vadd.f32 %v624_v36, %v406_v39  ;;  %v408_v41 = vld [vmem:[#allocation2 + $0x10] sm:$0xff]  ;;  %394 = vst.msk [vmem:[#allocation2 + $0x8] sm:$0xff] %vm264_vm0, %v383_v37 }
  0xa6   : > { %v422_v44 = vadd.f32 %v624_v36, %v408_v41  ;;  %396 = vst.msk [vmem:[#allocation2 + $0x18] sm:$0xff] %vm264_vm0, %v385_v38 }
  0xa7   : > { %430 = vst.msk [vmem:[%s743_s6] sm:$0xff] %vm264_vm0, %v420_v40  ;;  %v374_v45 = vpop.f32.mrf.mxu3  ;;  %v369_v46 = vpop.f32.mrf.mxu2 }
  0xa8   : > { %432 = vst.msk [vmem:[%s743_s6 + $0x10] sm:$0xff] %vm264_vm0, %v422_v44  ;;  %v389_v47 = vadd.f32 %v374_v45, %v297_v42  ;;  %v387_v48 = vadd.f32 %v369_v46, %v295_v43 }
  0xa9   : > { %v412_v49 = vld [vmem:[#allocation2 + $0x30] sm:$0xff] }
  0xaa   : > { %v426_v50 = vadd.f32 %v624_v36, %v412_v49  ;;  %v410_v51 = vld [vmem:[#allocation2 + $0x20] sm:$0xff]  ;;  %400 = vst.msk [vmem:[#allocation2 + $0x38] sm:$0xff] %vm264_vm0, %v389_v47 }
  0xab   : > { %v424_v52 = vadd.f32 %v624_v36, %v410_v51  ;;  %398 = vst.msk [vmem:[#allocation2 + $0x28] sm:$0xff] %vm264_vm0, %v387_v48 }
  0xac   : > { %436 = vst.msk [vmem:[%s743_s6 + $0x30] sm:$0xff] %vm264_vm0, %v426_v50  ;;  %v407_v53 = vld [vmem:[#allocation2 + $0x8] sm:$0xff] }
  0xad   : > { %434 = vst.msk [vmem:[%s743_s6 + $0x20] sm:$0xff] %vm264_vm0, %v424_v52  ;;  %v421_v54 = vadd.f32 %v624_v36, %v407_v53  ;;  %v409_v55 = vld [vmem:[#allocation2 + $0x18] sm:$0xff] }
  0xae   : > { %v423_v57 = vadd.f32 %v624_v36, %v409_v55 }
  0xaf   : > { %431 = vst.msk [vmem:[%s743_s6 + $0x8] sm:$0xff] %vm264_vm0, %v421_v54  ;;  %v377_v58 = vpop.f32.mrf.mxu3 }
  0xb0   : > { %433 = vst.msk [vmem:[%s743_s6 + $0x18] sm:$0xff] %vm264_vm0, %v423_v57  ;;  %v390_v59 = vadd.f32 %v377_v58, %v298_v56 }
  0xb1   : > { %v413_v60 = vld [vmem:[#allocation2 + $0x38] sm:$0xff] }
  0xb2   : > { %v427_v61 = vadd.f32 %v624_v36, %v413_v60  ;;  %v411_v62 = vld [vmem:[#allocation2 + $0x28] sm:$0xff]  ;;  %401 = vst.msk [vmem:[#allocation2 + $0x40] sm:$0xff] %vm264_vm0, %v390_v59 }
  0xb3   : > { %v425_v63 = vadd.f32 %v624_v36, %v411_v62 }
  0xb4   : > { %437 = vst.msk [vmem:[%s743_s6 + $0x38] sm:$0xff] %vm264_vm0, %v427_v61 }
  0xb5   : > { %435 = vst.msk [vmem:[%s743_s6 + $0x28] sm:$0xff] %vm264_vm0, %v425_v63 }
  0xb7   : > { %v379_v1 = vpop.f32.mrf.mxu3 }
  0xb8   : > { %v391_v2 = vadd.f32 %v379_v1, %v299_v0 }
  0xb9   : > { %v414_v3 = vld [vmem:[#allocation2 + $0x40] sm:$0xff] }
  0xba   : > { %v428_v4 = vadd.f32 %v624_v36, %v414_v3  ;;  %402 = vst.msk [vmem:[#allocation2 + $0x48] sm:$0xff] %vm264_vm0, %v391_v2 }
  0xbc   : > { %438 = vst.msk [vmem:[%s743_s6 + $0x40] sm:$0xff] %vm264_vm0, %v428_v4 }
  0xc1   : > { %v415_v5 = vld [vmem:[#allocation2 + $0x48] sm:$0xff] }
  0xc2   : > { %v429_v6 = vadd.f32 %v624_v36, %v415_v5 }
  0xc4   : > { %439 = vst.msk [vmem:[%s743_s6 + $0x48] sm:$0xff] %vm264_vm0, %v429_v6 }
  0xc5 PF: > { %s13_s14 = sadd.s32 1, %s647_s14   ;;  %s783_s12 = smov %s643_s13 }
  0xc6   : > { %p10_p5 = scmp.ge.s32.totalorder %s13_s14, 4   ;;  %s784_s13 = smov %s786_s15 }
  0xc8   :  { %12 = sbr.rel (!%p10_p5) target bundleno = 2 (0x2), region = 76 }

</bundles_post_ra>
